<compile_context>
chip_gen: v6e
topology: v6e:2x2x1
jax: 0.10.0
libtpu: 0.0.40
codegen_flags: <defaults>
</compile_context>

<pallas_src>
import functools
import math

import jax
import jax.numpy as jnp
from jax.experimental import pallas as pl
from jax.experimental.pallas import tpu as pltpu


# --------------------- pass 1: conv(3x3) + ReLU + 2x2 maxpool + partial BN stats -----------------


def conv_pool_stats_kernel(x_ref, w_ref, b_ref, pooled_ref, sum_ref, sq_ref,
                           *, nb, hp, wp, cin, cp):
    """One batch tile.

    x_ref     : (nb, 4, hp+1, wp+1, cin) bf16  parity-decomposed padded input
                (parity p = rh*2+rw holds padded pixel (2u+rh, 2v+rw) at (u, v))
    w_ref     : (9*cin, cp)              bf16  conv taps, row index = (kh*3+kw)*cin + c
    b_ref     : (1, cp)                  f32   conv bias (zero on padded channels)
    pooled_ref: (nb*hp*wp, cp)           bf16  conv+ReLU+maxpool rows for this tile
    sum_ref   : (1, 1, cp)               f32   per-channel sum over this tile's rows
    sq_ref    : (1, 1, cp)               f32   per-channel sum of squares
    """
    x = x_ref[...]
    w = w_ref[...]
    r = nb * hp * wp

    def im2col(a, b):
        # K-folded im2col for pooling parity (a, b): conv output position (2u+a, 2v+b).
        cols = []
        for kh in range(3):
            for kw in range(3):
                qh, rh = divmod(a + kh, 2)
                qw, rw = divmod(b + kw, 2)
                cols.append(x[:, rh * 2 + rw, qh:qh + hp, qw:qw + wp, :].reshape(r, cin))
        return jnp.concatenate(cols, axis=-1)                         # (r, 9*cin)

    # One (r, 9*cin) x (9*cin, cp) MXU dot per pooling parity; 2x2 max-pool == 4-way max.
    conv = jnp.dot(im2col(0, 0), w, preferred_element_type=jnp.float32)
    for (a, b) in ((0, 1), (1, 0), (1, 1)):
        conv = jnp.maximum(conv,
                           jnp.dot(im2col(a, b), w, preferred_element_type=jnp.float32))

    # Bias + ReLU hoisted after the max (bias identical across parities, ReLU monotone).
    pooled = jnp.maximum(conv + b_ref[...], 0.0)                      # f32 (r, cp)

    pooled_ref[...] = pooled.astype(pooled_ref.dtype)                 # bf16 lane-dense store
    sum_ref[...] = jnp.sum(pooled, axis=0, keepdims=True).reshape(1, 1, cp)
    sq_ref[...] = jnp.sum(pooled * pooled, axis=0, keepdims=True).reshape(1, 1, cp)


# --------------------- pass 2: apply BatchNorm (streaming FMA, lane-dense) -----------------------


def bn_apply_kernel(x_ref, scale_ref, shift_ref, out_ref):
    """out = x[:, :Cout] * scale + shift   (f32 math, cast to the next block's input dtype)."""
    c = out_ref.shape[-1]
    x = x_ref[...][:, :c].astype(jnp.float32)
    out_ref[...] = (x * scale_ref[...] + shift_ref[...]).astype(out_ref.dtype)


# --------------------- tiling helpers --------------------------------------------------------------


def _round_up(x, m):
    return (x + m - 1) // m * m


def _vmem_limit_bytes():
    """Portable VMEM budget: generous on v5e/v6e (128 MiB physical), bounded on v7x (64 MiB)."""
    try:
        cap = pltpu.get_tpu_info().vmem_capacity_bytes
    except Exception:
        cap = 64 * 1024 * 1024
    return int(min(96 * 1024 * 1024, (3 * cap) // 4))


def _choose_nb(n, rows_per_image, bytes_per_image, budget):
    """Batch-tile size: divides n, sublane-aligned rows, fits the VMEM budget, prefers >=2 steps."""
    divs = [d for d in range(1, n + 1) if n % d == 0]
    aligned = [d for d in divs if (d * rows_per_image) % 8 == 0] or [n]
    fits = [d for d in aligned if d * bytes_per_image <= budget] or [min(aligned)]
    multi = [d for d in fits if n // d >= 2]        # keep both TensorCores / the pipeline busy
    return max(multi) if multi else max(fits)
    # TODO(synk): for very large spatial planes add an Hp-row grid axis (overlapping halo blocks)
    # so the per-step footprint is bounded even at nb=1.


def _choose_row_tile(m, target=2048):
    """Largest multiple-of-8 divisor of m that is <= target (full extent if m is small)."""
    if m <= target:
        return m
    for t in range(target - target % 8, 7, -8):
        if m % t == 0:
            return t
    return m   # no aligned divisor: correct fallback (full extent)


# --------------------- one block (NHWC in / NHWC out) ---------------------------------------------


def cnn_block_2d_nhwc(x_nhwc, conv_w, conv_b, bn_gamma, bn_beta, *,
                      eps=1e-5, out_dtype=jnp.bfloat16):
    """x_nhwc: (N, H, W, Cin) bf16;  conv_w: (Cout, Cin, 3, 3) f32.
    Returns (N, H//2, W//2, Cout) in out_dtype."""
    N, H, W, Cin = x_nhwc.shape
    Cout = conv_w.shape[0]
    Hp, Wp = H // 2, W // 2
    M = N * Hp * Wp
    CP = _round_up(Cout, 128)      # lane-dense channel padding for conv / pooled / stats internals

    # --- glue: parity-decomposed padded input (same total bytes as the padded input, bf16) ---
    x_pad = jnp.pad(x_nhwc.astype(jnp.bfloat16), ((0, 0), (1, 1), (1, 1), (0, 0)))
    x_par = (x_pad.reshape(N, Hp + 1, 2, Wp + 1, 2, Cin)
                  .transpose(0, 2, 4, 1, 3, 5)
                  .reshape(N, 4, Hp + 1, Wp + 1, Cin))
    # TODO(synk): fold this pad + parity transpose into the previous block's pass-2 output scatter
    # to remove the last piece of inter-block XLA glue.

    w9 = jnp.transpose(conv_w, (2, 3, 1, 0)).reshape(9 * Cin, Cout)   # row = (kh*3+kw)*Cin + c
    w9 = jnp.pad(w9, ((0, 0), (0, CP - Cout))).astype(jnp.bfloat16)
    bias = jnp.pad(conv_b, (0, CP - Cout)).reshape(1, CP).astype(jnp.float32)

    vmem_limit = _vmem_limit_bytes()
    # Per-image VMEM estimate: double-buffered input & pooled tiles + im2col temp + f32 accumulators.
    per_img = (2 * (2 * 4 * (Hp + 1) * (Wp + 1) * Cin)      # x tile (bf16) x2 buffers
               + 2 * (2 * Hp * Wp * CP)                     # pooled tile (bf16) x2 buffers
               + 2 * Hp * Wp * 9 * Cin                      # im2col operand (bf16)
               + 2 * 4 * Hp * Wp * CP)                      # f32 conv acc + pooled
    nb = _choose_nb(N, Hp * Wp, per_img, vmem_limit // 2)
    num_tiles = N // nb
    rows = nb * Hp * Wp

    kernel1 = functools.partial(conv_pool_stats_kernel, nb=nb, hp=Hp, wp=Wp, cin=Cin, cp=CP)
    flops1 = 2 * 4 * 9 * M * Cin * CP
    bytes1 = (x_par.size * 2 + w9.size * 2 + bias.size * 4
              + M * CP * 2 + 2 * num_tiles * CP * 4)

    pooled, psum, psq = pl.pallas_call(
        kernel1,
        out_shape=(jax.ShapeDtypeStruct((M, CP), jnp.bfloat16),
                   jax.ShapeDtypeStruct((num_tiles, 1, CP), jnp.float32),
                   jax.ShapeDtypeStruct((num_tiles, 1, CP), jnp.float32)),
        grid=(num_tiles,),
        in_specs=[
            pl.BlockSpec((nb, 4, Hp + 1, Wp + 1, Cin), lambda i: (i, 0, 0, 0, 0)),
            pl.BlockSpec((9 * Cin, CP), lambda i: (0, 0)),
            pl.BlockSpec((1, CP), lambda i: (0, 0)),
        ],
        out_specs=(
            pl.BlockSpec((rows, CP), lambda i: (i, 0)),
            pl.BlockSpec((1, 1, CP), lambda i: (i, 0, 0)),
            pl.BlockSpec((1, 1, CP), lambda i: (i, 0, 0)),
        ),
        compiler_params=pltpu.CompilerParams(
            dimension_semantics=("parallel",),           # independent tiles -> megacore-shardable
            vmem_limit_bytes=vmem_limit),
        cost_estimate=pl.CostEstimate(flops=flops1, transcendentals=0, bytes_accessed=bytes1),
    )(x_par, w9, bias)

    # --- glue: O(Cout) BatchNorm finalize (training-mode batch stats, biased variance) ---
    tot = jnp.sum(psum, axis=0).reshape(CP)[:Cout]
    tot_sq = jnp.sum(psq, axis=0).reshape(CP)[:Cout]
    mean = tot / M
    var = jnp.maximum(tot_sq / M - mean * mean, 0.0)
    scale = bn_gamma * jax.lax.rsqrt(var + eps)
    shift = bn_beta - mean * scale
    scale = scale.reshape(1, Cout).astype(jnp.float32)
    shift = shift.reshape(1, Cout).astype(jnp.float32)

    tm = _choose_row_tile(M)
    out_itemsize = jnp.dtype(out_dtype).itemsize
    flops2 = 2 * M * Cout
    bytes2 = M * CP * 2 + M * Cout * out_itemsize + 2 * Cout * 4
    out_rows = pl.pallas_call(
        bn_apply_kernel,
        out_shape=jax.ShapeDtypeStruct((M, Cout), out_dtype),
        grid=(M // tm,),
        in_specs=[
            pl.BlockSpec((tm, CP), lambda i: (i, 0)),
            pl.BlockSpec((1, Cout), lambda i: (0, 0)),
            pl.BlockSpec((1, Cout), lambda i: (0, 0)),
        ],
        out_specs=pl.BlockSpec((tm, Cout), lambda i: (i, 0)),
        compiler_params=pltpu.CompilerParams(
            dimension_semantics=("parallel",),
            vmem_limit_bytes=vmem_limit),
        cost_estimate=pl.CostEstimate(flops=flops2, transcendentals=0, bytes_accessed=bytes2),
    )(pooled, scale, shift)

    return out_rows.reshape(N, Hp, Wp, Cout)


# --------------------- extractor (NCHW in / NCHW out, like the PyTorch module) --------------------


def cnn_extractor_2d(x_nchw, params, eps=1e-5):
    """params: list of (conv_w, conv_b, bn_gamma, bn_beta), one per block."""
    y = jnp.transpose(x_nchw, (0, 2, 3, 1)).astype(jnp.bfloat16)   # NCHW -> NHWC once, bf16
    for li, (cw, cb, g, b) in enumerate(params):
        last = li == len(params) - 1
        y = cnn_block_2d_nhwc(y, cw, cb, g, b, eps=eps,
                              out_dtype=jnp.float32 if last else jnp.bfloat16)
    return jnp.transpose(y, (0, 3, 1, 2))


# --------------------- pure-JAX reference (f32 semantics) -----------------------------------------


def reference_block(x, cw, cb, g, b, eps=1e-5):
    y = jax.lax.conv_general_dilated(
        x, cw, window_strides=(1, 1), padding=((1, 1), (1, 1)),
        dimension_numbers=("NCHW", "OIHW", "NCHW"))
    y = y + cb[None, :, None, None]
    y = jnp.maximum(y, 0.0)
    y = jax.lax.reduce_window(y, -jnp.inf, jax.lax.max, (1, 1, 2, 2), (1, 1, 2, 2), "VALID")
    mean = jnp.mean(y, axis=(0, 2, 3), keepdims=True)
    var = jnp.mean((y - mean) ** 2, axis=(0, 2, 3), keepdims=True)
    y = (y - mean) * jax.lax.rsqrt(var + eps)
    return y * g[None, :, None, None] + b[None, :, None, None]


def reference(x, params, eps=1e-5):
    for p in params:
        x = reference_block(x, *p, eps=eps)
    return x


# --------------------- main -------------------------------------------------------------------------


if __name__ == "__main__":
    N, Cin, H, W = 2, 4, 16, 16
    widths = (32, 64, 128)                     # CNN_Extractor_2D: in_chn -> 32 -> 64 -> 128

    key = jax.random.PRNGKey(0)
    kx, *pkeys = jax.random.split(key, 1 + 2 * len(widths))

    x = jax.random.normal(kx, (N, Cin, H, W), dtype=jnp.float32)

    params = []
    c_in = Cin
    for li, c_out in enumerate(widths):
        fan_in = c_in * 9
        bound = 1.0 / math.sqrt(fan_in)        # PyTorch default Conv2d init bounds
        cw = jax.random.uniform(pkeys[2 * li], (c_out, c_in, 3, 3), jnp.float32, -bound, bound)
        cb = jax.random.uniform(pkeys[2 * li + 1], (c_out,), jnp.float32, -bound, bound)
        params.append((cw, cb, jnp.ones((c_out,), jnp.float32), jnp.zeros((c_out,), jnp.float32)))
        c_in = c_out

    extractor = jax.jit(cnn_extractor_2d)
    out = jax.block_until_ready(extractor(x, params))
    ref = jax.block_until_ready(reference(x, params))

    assert out.shape == (N, widths[-1], H // 8, W // 8), out.shape
    # bf16 matmul operands + bf16 pooled/inter-block activations (per the perf review), so compare
    # against the f32 reference with a scaled tolerance.
    err = float(jnp.max(jnp.abs(out - ref) / (jnp.abs(ref) + 1.0)))
    assert err < 7.5e-2, err
    print("KERNEL_OK")
</pallas_src>

<mosaic_0001>
module attributes {stable_mosaic.version = 11 : i64} {
  func.func @bn_apply_kernel(%arg0: i32, %arg1: memref<128x128xbf16, #tpu.memory_space<vmem>>, %arg2: memref<1x32xf32, #tpu.memory_space<vmem>>, %arg3: memref<1x32xf32, #tpu.memory_space<vmem>>, %arg4: memref<128x32xbf16, #tpu.memory_space<vmem>>) attributes {dimension_semantics = [#tpu.dimension_semantics<parallel>], iteration_bounds = array<i64: 1>, scalar_prefetch = 0 : i64, scratch_operands = 0 : i64, tpu.core_type = #tpu.core_type<tc>, window_params = [{transform_indices = @transform_0, window_bounds = array<i64: 128, 128>}, {pipeline_mode = #tpu.pipeline_mode<synchronous>, transform_indices = @transform_1, window_bounds = array<i64: 1, 32>}, {pipeline_mode = #tpu.pipeline_mode<synchronous>, transform_indices = @transform_2, window_bounds = array<i64: 1, 32>}, {transform_indices = @transform_3, window_bounds = array<i64: 128, 32>}]} {
    %c0 = arith.constant 0 : index
    %c0_0 = arith.constant 0 : index
    %0 = vector.load %arg1[%c0, %c0_0] : memref<128x128xbf16, #tpu.memory_space<vmem>>, vector<128x128xbf16>
    %1 = vector.extract_strided_slice %0 {offsets = [0, 0], sizes = [128, 32], strides = [1, 1]} : vector<128x128xbf16> to vector<128x32xbf16>
    %2 = arith.extf %1 : vector<128x32xbf16> to vector<128x32xf32>
    %c0_1 = arith.constant 0 : index
    %c0_2 = arith.constant 0 : index
    %3 = vector.load %arg2[%c0_1, %c0_2] : memref<1x32xf32, #tpu.memory_space<vmem>>, vector<1x32xf32>
    %4 = vector.broadcast %3 : vector<1x32xf32> to vector<128x32xf32>
    %5 = arith.mulf %2, %4 : vector<128x32xf32>
    %c0_3 = arith.constant 0 : index
    %c0_4 = arith.constant 0 : index
    %6 = vector.load %arg3[%c0_3, %c0_4] : memref<1x32xf32, #tpu.memory_space<vmem>>, vector<1x32xf32>
    %7 = vector.broadcast %6 : vector<1x32xf32> to vector<128x32xf32>
    %8 = arith.addf %5, %7 : vector<128x32xf32>
    %9 = arith.truncf %8 : vector<128x32xf32> to vector<128x32xbf16>
    %c0_5 = arith.constant 0 : index
    %c0_6 = arith.constant 0 : index
    %10 = vector.load %arg4[%c0_5, %c0_6] : memref<128x32xbf16, #tpu.memory_space<vmem>>, vector<128x32xbf16>
    tpu.vector_store %arg4[%c0_5, %c0_6], %9 {strides = array<i32>} : memref<128x32xbf16, #tpu.memory_space<vmem>>, vector<128x32xbf16>,
    return
  }
  func.func @transform_0(%arg0: i32) -> (i32, i32) {
    %c0_i32 = arith.constant 0 : i32
    %c0_i32_0 = arith.constant 0 : i32
    return %arg0, %c0_i32 : i32, i32
  }
  func.func @transform_1(%arg0: i32) -> (i32, i32) {
    %c0_i32 = arith.constant 0 : i32
    %c0_i32_0 = arith.constant 0 : i32
    %c0_i32_1 = arith.constant 0 : i32
    return %c0_i32, %c0_i32_0 : i32, i32
  }
  func.func @transform_2(%arg0: i32) -> (i32, i32) {
    %c0_i32 = arith.constant 0 : i32
    %c0_i32_0 = arith.constant 0 : i32
    %c0_i32_1 = arith.constant 0 : i32
    return %c0_i32, %c0_i32_0 : i32, i32
  }
  func.func @transform_3(%arg0: i32) -> (i32, i32) {
    %c0_i32 = arith.constant 0 : i32
    %c0_i32_0 = arith.constant 0 : i32
    return %arg0, %c0_i32 : i32, i32
  }
}

module attributes {stable_mosaic.version = 11 : i64} {
  func.func @conv_pool_stats_kernel(%arg0: i32, %arg1: memref<1x4x9x9x4xbf16, #tpu.memory_space<vmem>>, %arg2: memref<36x128xbf16, #tpu.memory_space<vmem>>, %arg3: memref<1x128xf32, #tpu.memory_space<vmem>>, %arg4: memref<64x128xbf16, #tpu.memory_space<vmem>>, %arg5: memref<1x1x128xf32, #tpu.memory_space<vmem>>, %arg6: memref<1x1x128xf32, #tpu.memory_space<vmem>>) attributes {dimension_semantics = [#tpu.dimension_semantics<parallel>], iteration_bounds = array<i64: 2>, scalar_prefetch = 0 : i64, scratch_operands = 0 : i64, tpu.core_type = #tpu.core_type<tc>, window_params = [{transform_indices = @transform_0, window_bounds = array<i64: 1, 4, 9, 9, 4>}, {pipeline_mode = #tpu.pipeline_mode<synchronous>, transform_indices = @transform_1, window_bounds = array<i64: 36, 128>}, {pipeline_mode = #tpu.pipeline_mode<synchronous>, transform_indices = @transform_2, window_bounds = array<i64: 1, 128>}, {transform_indices = @transform_3, window_bounds = array<i64: 64, 128>}, {transform_indices = @transform_4, window_bounds = array<i64: 1, 1, 128>}, {transform_indices = @transform_5, window_bounds = array<i64: 1, 1, 128>}]} {
    %c0 = arith.constant 0 : index
    %c0_0 = arith.constant 0 : index
    %c0_1 = arith.constant 0 : index
    %c0_2 = arith.constant 0 : index
    %c0_3 = arith.constant 0 : index
    %0 = vector.load %arg1[%c0, %c0_0, %c0_1, %c0_2, %c0_3] : memref<1x4x9x9x4xbf16, #tpu.memory_space<vmem>>, vector<1x4x9x9x4xbf16>
    %c0_4 = arith.constant 0 : index
    %c0_5 = arith.constant 0 : index
    %1 = vector.load %arg2[%c0_4, %c0_5] : memref<36x128xbf16, #tpu.memory_space<vmem>>, vector<36x128xbf16>
    %2 = vector.extract_strided_slice %0 {offsets = [0, 0, 0, 0, 0], sizes = [1, 1, 8, 8, 4], strides = [1, 1, 1, 1, 1]} : vector<1x4x9x9x4xbf16> to vector<1x1x8x8x4xbf16>
    %3 = vector.shape_cast %2 : vector<1x1x8x8x4xbf16> to vector<1x8x8x4xbf16>
    %4 = vector.shape_cast %3 : vector<1x8x8x4xbf16> to vector<64x4xbf16>
    %5 = vector.extract_strided_slice %0 {offsets = [0, 1, 0, 0, 0], sizes = [1, 1, 8, 8, 4], strides = [1, 1, 1, 1, 1]} : vector<1x4x9x9x4xbf16> to vector<1x1x8x8x4xbf16>
    %6 = vector.shape_cast %5 : vector<1x1x8x8x4xbf16> to vector<1x8x8x4xbf16>
    %7 = vector.shape_cast %6 : vector<1x8x8x4xbf16> to vector<64x4xbf16>
    %8 = vector.extract_strided_slice %0 {offsets = [0, 0, 0, 1, 0], sizes = [1, 1, 8, 8, 4], strides = [1, 1, 1, 1, 1]} : vector<1x4x9x9x4xbf16> to vector<1x1x8x8x4xbf16>
    %9 = vector.shape_cast %8 : vector<1x1x8x8x4xbf16> to vector<1x8x8x4xbf16>
    %10 = vector.shape_cast %9 : vector<1x8x8x4xbf16> to vector<64x4xbf16>
    %11 = vector.extract_strided_slice %0 {offsets = [0, 2, 0, 0, 0], sizes = [1, 1, 8, 8, 4], strides = [1, 1, 1, 1, 1]} : vector<1x4x9x9x4xbf16> to vector<1x1x8x8x4xbf16>
    %12 = vector.shape_cast %11 : vector<1x1x8x8x4xbf16> to vector<1x8x8x4xbf16>
    %13 = vector.shape_cast %12 : vector<1x8x8x4xbf16> to vector<64x4xbf16>
    %14 = vector.extract_strided_slice %0 {offsets = [0, 3, 0, 0, 0], sizes = [1, 1, 8, 8, 4], strides = [1, 1, 1, 1, 1]} : vector<1x4x9x9x4xbf16> to vector<1x1x8x8x4xbf16>
    %15 = vector.shape_cast %14 : vector<1x1x8x8x4xbf16> to vector<1x8x8x4xbf16>
    %16 = vector.shape_cast %15 : vector<1x8x8x4xbf16> to vector<64x4xbf16>
    %17 = vector.extract_strided_slice %0 {offsets = [0, 2, 0, 1, 0], sizes = [1, 1, 8, 8, 4], strides = [1, 1, 1, 1, 1]} : vector<1x4x9x9x4xbf16> to vector<1x1x8x8x4xbf16>
    %18 = vector.shape_cast %17 : vector<1x1x8x8x4xbf16> to vector<1x8x8x4xbf16>
    %19 = vector.shape_cast %18 : vector<1x8x8x4xbf16> to vector<64x4xbf16>
    %20 = vector.extract_strided_slice %0 {offsets = [0, 0, 1, 0, 0], sizes = [1, 1, 8, 8, 4], strides = [1, 1, 1, 1, 1]} : vector<1x4x9x9x4xbf16> to vector<1x1x8x8x4xbf16>
    %21 = vector.shape_cast %20 : vector<1x1x8x8x4xbf16> to vector<1x8x8x4xbf16>
    %22 = vector.shape_cast %21 : vector<1x8x8x4xbf16> to vector<64x4xbf16>
    %23 = vector.extract_strided_slice %0 {offsets = [0, 1, 1, 0, 0], sizes = [1, 1, 8, 8, 4], strides = [1, 1, 1, 1, 1]} : vector<1x4x9x9x4xbf16> to vector<1x1x8x8x4xbf16>
    %24 = vector.shape_cast %23 : vector<1x1x8x8x4xbf16> to vector<1x8x8x4xbf16>
    %25 = vector.shape_cast %24 : vector<1x8x8x4xbf16> to vector<64x4xbf16>
    %26 = vector.extract_strided_slice %0 {offsets = [0, 0, 1, 1, 0], sizes = [1, 1, 8, 8, 4], strides = [1, 1, 1, 1, 1]} : vector<1x4x9x9x4xbf16> to vector<1x1x8x8x4xbf16>
    %27 = vector.shape_cast %26 : vector<1x1x8x8x4xbf16> to vector<1x8x8x4xbf16>
    %28 = vector.shape_cast %27 : vector<1x8x8x4xbf16> to vector<64x4xbf16>
    %29 = tpu.concatenate %4, %7, %10, %13, %16, %19, %22, %25, %28 in 1 : vector<64x4xbf16>, vector<64x4xbf16>, vector<64x4xbf16>, vector<64x4xbf16>, vector<64x4xbf16>, vector<64x4xbf16>, vector<64x4xbf16>, vector<64x4xbf16>, vector<64x4xbf16> -> vector<64x36xbf16>
    %cst = arith.constant dense<0.000000e+00> : vector<64x128xf32>
    %30 = tpu.matmul %29, %1, %cst {dimension_numbers = #tpu.dot_dimension_numbers<[1], [0], [0], [1], [0, 0, 1, 1], [], []>} : vector<64x36xbf16>, vector<36x128xbf16>, vector<64x128xf32> -> vector<64x128xf32>
    %31 = vector.extract_strided_slice %0 {offsets = [0, 1, 0, 0, 0], sizes = [1, 1, 8, 8, 4], strides = [1, 1, 1, 1, 1]} : vector<1x4x9x9x4xbf16> to vector<1x1x8x8x4xbf16>
    %32 = vector.shape_cast %31 : vector<1x1x8x8x4xbf16> to vector<1x8x8x4xbf16>
    %33 = vector.shape_cast %32 : vector<1x8x8x4xbf16> to vector<64x4xbf16>
    %34 = vector.extract_strided_slice %0 {offsets = [0, 0, 0, 1, 0], sizes = [1, 1, 8, 8, 4], strides = [1, 1, 1, 1, 1]} : vector<1x4x9x9x4xbf16> to vector<1x1x8x8x4xbf16>
    %35 = vector.shape_cast %34 : vector<1x1x8x8x4xbf16> to vector<1x8x8x4xbf16>
    %36 = vector.shape_cast %35 : vector<1x8x8x4xbf16> to vector<64x4xbf16>
    %37 = vector.extract_strided_slice %0 {offsets = [0, 1, 0, 1, 0], sizes = [1, 1, 8, 8, 4], strides = [1, 1, 1, 1, 1]} : vector<1x4x9x9x4xbf16> to vector<1x1x8x8x4xbf16>
    %38 = vector.shape_cast %37 : vector<1x1x8x8x4xbf16> to vector<1x8x8x4xbf16>
    %39 = vector.shape_cast %38 : vector<1x8x8x4xbf16> to vector<64x4xbf16>
    %40 = vector.extract_strided_slice %0 {offsets = [0, 3, 0, 0, 0], sizes = [1, 1, 8, 8, 4], strides = [1, 1, 1, 1, 1]} : vector<1x4x9x9x4xbf16> to vector<1x1x8x8x4xbf16>
    %41 = vector.shape_cast %40 : vector<1x1x8x8x4xbf16> to vector<1x8x8x4xbf16>
    %42 = vector.shape_cast %41 : vector<1x8x8x4xbf16> to vector<64x4xbf16>
    %43 = vector.extract_strided_slice %0 {offsets = [0, 2, 0, 1, 0], sizes = [1, 1, 8, 8, 4], strides = [1, 1, 1, 1, 1]} : vector<1x4x9x9x4xbf16> to vector<1x1x8x8x4xbf16>
    %44 = vector.shape_cast %43 : vector<1x1x8x8x4xbf16> to vector<1x8x8x4xbf16>
    %45 = vector.shape_cast %44 : vector<1x8x8x4xbf16> to vector<64x4xbf16>
    %46 = vector.extract_strided_slice %0 {offsets = [0, 3, 0, 1, 0], sizes = [1, 1, 8, 8, 4], strides = [1, 1, 1, 1, 1]} : vector<1x4x9x9x4xbf16> to vector<1x1x8x8x4xbf16>
    %47 = vector.shape_cast %46 : vector<1x1x8x8x4xbf16> to vector<1x8x8x4xbf16>
    %48 = vector.shape_cast %47 : vector<1x8x8x4xbf16> to vector<64x4xbf16>
    %49 = vector.extract_strided_slice %0 {offsets = [0, 1, 1, 0, 0], sizes = [1, 1, 8, 8, 4], strides = [1, 1, 1, 1, 1]} : vector<1x4x9x9x4xbf16> to vector<1x1x8x8x4xbf16>
    %50 = vector.shape_cast %49 : vector<1x1x8x8x4xbf16> to vector<1x8x8x4xbf16>
    %51 = vector.shape_cast %50 : vector<1x8x8x4xbf16> to vector<64x4xbf16>
    %52 = vector.extract_strided_slice %0 {offsets = [0, 0, 1, 1, 0], sizes = [1, 1, 8, 8, 4], strides = [1, 1, 1, 1, 1]} : vector<1x4x9x9x4xbf16> to vector<1x1x8x8x4xbf16>
    %53 = vector.shape_cast %52 : vector<1x1x8x8x4xbf16> to vector<1x8x8x4xbf16>
    %54 = vector.shape_cast %53 : vector<1x8x8x4xbf16> to vector<64x4xbf16>
    %55 = vector.extract_strided_slice %0 {offsets = [0, 1, 1, 1, 0], sizes = [1, 1, 8, 8, 4], strides = [1, 1, 1, 1, 1]} : vector<1x4x9x9x4xbf16> to vector<1x1x8x8x4xbf16>
    %56 = vector.shape_cast %55 : vector<1x1x8x8x4xbf16> to vector<1x8x8x4xbf16>
    %57 = vector.shape_cast %56 : vector<1x8x8x4xbf16> to vector<64x4xbf16>
    %58 = tpu.concatenate %33, %36, %39, %42, %45, %48, %51, %54, %57 in 1 : vector<64x4xbf16>, vector<64x4xbf16>, vector<64x4xbf16>, vector<64x4xbf16>, vector<64x4xbf16>, vector<64x4xbf16>, vector<64x4xbf16>, vector<64x4xbf16>, vector<64x4xbf16> -> vector<64x36xbf16>
    %cst_6 = arith.constant dense<0.000000e+00> : vector<64x128xf32>
    %59 = tpu.matmul %58, %1, %cst_6 {dimension_numbers = #tpu.dot_dimension_numbers<[1], [0], [0], [1], [0, 0, 1, 1], [], []>} : vector<64x36xbf16>, vector<36x128xbf16>, vector<64x128xf32> -> vector<64x128xf32>
    %60 = arith.maximumf %30, %59 : vector<64x128xf32>
    %61 = vector.extract_strided_slice %0 {offsets = [0, 2, 0, 0, 0], sizes = [1, 1, 8, 8, 4], strides = [1, 1, 1, 1, 1]} : vector<1x4x9x9x4xbf16> to vector<1x1x8x8x4xbf16>
    %62 = vector.shape_cast %61 : vector<1x1x8x8x4xbf16> to vector<1x8x8x4xbf16>
    %63 = vector.shape_cast %62 : vector<1x8x8x4xbf16> to vector<64x4xbf16>
    %64 = vector.extract_strided_slice %0 {offsets = [0, 3, 0, 0, 0], sizes = [1, 1, 8, 8, 4], strides = [1, 1, 1, 1, 1]} : vector<1x4x9x9x4xbf16> to vector<1x1x8x8x4xbf16>
    %65 = vector.shape_cast %64 : vector<1x1x8x8x4xbf16> to vector<1x8x8x4xbf16>
    %66 = vector.shape_cast %65 : vector<1x8x8x4xbf16> to vector<64x4xbf16>
    %67 = vector.extract_strided_slice %0 {offsets = [0, 2, 0, 1, 0], sizes = [1, 1, 8, 8, 4], strides = [1, 1, 1, 1, 1]} : vector<1x4x9x9x4xbf16> to vector<1x1x8x8x4xbf16>
    %68 = vector.shape_cast %67 : vector<1x1x8x8x4xbf16> to vector<1x8x8x4xbf16>
    %69 = vector.shape_cast %68 : vector<1x8x8x4xbf16> to vector<64x4xbf16>
    %70 = vector.extract_strided_slice %0 {offsets = [0, 0, 1, 0, 0], sizes = [1, 1, 8, 8, 4], strides = [1, 1, 1, 1, 1]} : vector<1x4x9x9x4xbf16> to vector<1x1x8x8x4xbf16>
    %71 = vector.shape_cast %70 : vector<1x1x8x8x4xbf16> to vector<1x8x8x4xbf16>
    %72 = vector.shape_cast %71 : vector<1x8x8x4xbf16> to vector<64x4xbf16>
    %73 = vector.extract_strided_slice %0 {offsets = [0, 1, 1, 0, 0], sizes = [1, 1, 8, 8, 4], strides = [1, 1, 1, 1, 1]} : vector<1x4x9x9x4xbf16> to vector<1x1x8x8x4xbf16>
    %74 = vector.shape_cast %73 : vector<1x1x8x8x4xbf16> to vector<1x8x8x4xbf16>
    %75 = vector.shape_cast %74 : vector<1x8x8x4xbf16> to vector<64x4xbf16>
    %76 = vector.extract_strided_slice %0 {offsets = [0, 0, 1, 1, 0], sizes = [1, 1, 8, 8, 4], strides = [1, 1, 1, 1, 1]} : vector<1x4x9x9x4xbf16> to vector<1x1x8x8x4xbf16>
    %77 = vector.shape_cast %76 : vector<1x1x8x8x4xbf16> to vector<1x8x8x4xbf16>
    %78 = vector.shape_cast %77 : vector<1x8x8x4xbf16> to vector<64x4xbf16>
    %79 = vector.extract_strided_slice %0 {offsets = [0, 2, 1, 0, 0], sizes = [1, 1, 8, 8, 4], strides = [1, 1, 1, 1, 1]} : vector<1x4x9x9x4xbf16> to vector<1x1x8x8x4xbf16>
    %80 = vector.shape_cast %79 : vector<1x1x8x8x4xbf16> to vector<1x8x8x4xbf16>
    %81 = vector.shape_cast %80 : vector<1x8x8x4xbf16> to vector<64x4xbf16>
    %82 = vector.extract_strided_slice %0 {offsets = [0, 3, 1, 0, 0], sizes = [1, 1, 8, 8, 4], strides = [1, 1, 1, 1, 1]} : vector<1x4x9x9x4xbf16> to vector<1x1x8x8x4xbf16>
    %83 = vector.shape_cast %82 : vector<1x1x8x8x4xbf16> to vector<1x8x8x4xbf16>
    %84 = vector.shape_cast %83 : vector<1x8x8x4xbf16> to vector<64x4xbf16>
    %85 = vector.extract_strided_slice %0 {offsets = [0, 2, 1, 1, 0], sizes = [1, 1, 8, 8, 4], strides = [1, 1, 1, 1, 1]} : vector<1x4x9x9x4xbf16> to vector<1x1x8x8x4xbf16>
    %86 = vector.shape_cast %85 : vector<1x1x8x8x4xbf16> to vector<1x8x8x4xbf16>
    %87 = vector.shape_cast %86 : vector<1x8x8x4xbf16> to vector<64x4xbf16>
    %88 = tpu.concatenate %63, %66, %69, %72, %75, %78, %81, %84, %87 in 1 : vector<64x4xbf16>, vector<64x4xbf16>, vector<64x4xbf16>, vector<64x4xbf16>, vector<64x4xbf16>, vector<64x4xbf16>, vector<64x4xbf16>, vector<64x4xbf16>, vector<64x4xbf16> -> vector<64x36xbf16>
    %cst_7 = arith.constant dense<0.000000e+00> : vector<64x128xf32>
    %89 = tpu.matmul %88, %1, %cst_7 {dimension_numbers = #tpu.dot_dimension_numbers<[1], [0], [0], [1], [0, 0, 1, 1], [], []>} : vector<64x36xbf16>, vector<36x128xbf16>, vector<64x128xf32> -> vector<64x128xf32>
    %90 = arith.maximumf %60, %89 : vector<64x128xf32>
    %91 = vector.extract_strided_slice %0 {offsets = [0, 3, 0, 0, 0], sizes = [1, 1, 8, 8, 4], strides = [1, 1, 1, 1, 1]} : vector<1x4x9x9x4xbf16> to vector<1x1x8x8x4xbf16>
    %92 = vector.shape_cast %91 : vector<1x1x8x8x4xbf16> to vector<1x8x8x4xbf16>
    %93 = vector.shape_cast %92 : vector<1x8x8x4xbf16> to vector<64x4xbf16>
    %94 = vector.extract_strided_slice %0 {offsets = [0, 2, 0, 1, 0], sizes = [1, 1, 8, 8, 4], strides = [1, 1, 1, 1, 1]} : vector<1x4x9x9x4xbf16> to vector<1x1x8x8x4xbf16>
    %95 = vector.shape_cast %94 : vector<1x1x8x8x4xbf16> to vector<1x8x8x4xbf16>
    %96 = vector.shape_cast %95 : vector<1x8x8x4xbf16> to vector<64x4xbf16>
    %97 = vector.extract_strided_slice %0 {offsets = [0, 3, 0, 1, 0], sizes = [1, 1, 8, 8, 4], strides = [1, 1, 1, 1, 1]} : vector<1x4x9x9x4xbf16> to vector<1x1x8x8x4xbf16>
    %98 = vector.shape_cast %97 : vector<1x1x8x8x4xbf16> to vector<1x8x8x4xbf16>
    %99 = vector.shape_cast %98 : vector<1x8x8x4xbf16> to vector<64x4xbf16>
    %100 = vector.extract_strided_slice %0 {offsets = [0, 1, 1, 0, 0], sizes = [1, 1, 8, 8, 4], strides = [1, 1, 1, 1, 1]} : vector<1x4x9x9x4xbf16> to vector<1x1x8x8x4xbf16>
    %101 = vector.shape_cast %100 : vector<1x1x8x8x4xbf16> to vector<1x8x8x4xbf16>
    %102 = vector.shape_cast %101 : vector<1x8x8x4xbf16> to vector<64x4xbf16>
    %103 = vector.extract_strided_slice %0 {offsets = [0, 0, 1, 1, 0], sizes = [1, 1, 8, 8, 4], strides = [1, 1, 1, 1, 1]} : vector<1x4x9x9x4xbf16> to vector<1x1x8x8x4xbf16>
    %104 = vector.shape_cast %103 : vector<1x1x8x8x4xbf16> to vector<1x8x8x4xbf16>
    %105 = vector.shape_cast %104 : vector<1x8x8x4xbf16> to vector<64x4xbf16>
    %106 = vector.extract_strided_slice %0 {offsets = [0, 1, 1, 1, 0], sizes = [1, 1, 8, 8, 4], strides = [1, 1, 1, 1, 1]} : vector<1x4x9x9x4xbf16> to vector<1x1x8x8x4xbf16>
    %107 = vector.shape_cast %106 : vector<1x1x8x8x4xbf16> to vector<1x8x8x4xbf16>
    %108 = vector.shape_cast %107 : vector<1x8x8x4xbf16> to vector<64x4xbf16>
    %109 = vector.extract_strided_slice %0 {offsets = [0, 3, 1, 0, 0], sizes = [1, 1, 8, 8, 4], strides = [1, 1, 1, 1, 1]} : vector<1x4x9x9x4xbf16> to vector<1x1x8x8x4xbf16>
    %110 = vector.shape_cast %109 : vector<1x1x8x8x4xbf16> to vector<1x8x8x4xbf16>
    %111 = vector.shape_cast %110 : vector<1x8x8x4xbf16> to vector<64x4xbf16>
    %112 = vector.extract_strided_slice %0 {offsets = [0, 2, 1, 1, 0], sizes = [1, 1, 8, 8, 4], strides = [1, 1, 1, 1, 1]} : vector<1x4x9x9x4xbf16> to vector<1x1x8x8x4xbf16>
    %113 = vector.shape_cast %112 : vector<1x1x8x8x4xbf16> to vector<1x8x8x4xbf16>
    %114 = vector.shape_cast %113 : vector<1x8x8x4xbf16> to vector<64x4xbf16>
    %115 = vector.extract_strided_slice %0 {offsets = [0, 3, 1, 1, 0], sizes = [1, 1, 8, 8, 4], strides = [1, 1, 1, 1, 1]} : vector<1x4x9x9x4xbf16> to vector<1x1x8x8x4xbf16>
    %116 = vector.shape_cast %115 : vector<1x1x8x8x4xbf16> to vector<1x8x8x4xbf16>
    %117 = vector.shape_cast %116 : vector<1x8x8x4xbf16> to vector<64x4xbf16>
    %118 = tpu.concatenate %93, %96, %99, %102, %105, %108, %111, %114, %117 in 1 : vector<64x4xbf16>, vector<64x4xbf16>, vector<64x4xbf16>, vector<64x4xbf16>, vector<64x4xbf16>, vector<64x4xbf16>, vector<64x4xbf16>, vector<64x4xbf16>, vector<64x4xbf16> -> vector<64x36xbf16>
    %cst_8 = arith.constant dense<0.000000e+00> : vector<64x128xf32>
    %119 = tpu.matmul %118, %1, %cst_8 {dimension_numbers = #tpu.dot_dimension_numbers<[1], [0], [0], [1], [0, 0, 1, 1], [], []>} : vector<64x36xbf16>, vector<36x128xbf16>, vector<64x128xf32> -> vector<64x128xf32>
    %120 = arith.maximumf %90, %119 : vector<64x128xf32>
    %c0_9 = arith.constant 0 : index
    %c0_10 = arith.constant 0 : index
    %121 = vector.load %arg3[%c0_9, %c0_10] : memref<1x128xf32, #tpu.memory_space<vmem>>, vector<1x128xf32>
    %122 = vector.broadcast %121 : vector<1x128xf32> to vector<64x128xf32>
    %123 = arith.addf %120, %122 : vector<64x128xf32>
    %cst_11 = arith.constant 0.000000e+00 : f32
    %124 = vector.broadcast %cst_11 : f32 to vector<64x128xf32>
    %125 = arith.maximumf %123, %124 : vector<64x128xf32>
    %126 = arith.truncf %125 : vector<64x128xf32> to vector<64x128xbf16>
    %c0_12 = arith.constant 0 : index
    %c0_13 = arith.constant 0 : index
    %127 = vector.load %arg4[%c0_12, %c0_13] : memref<64x128xbf16, #tpu.memory_space<vmem>>, vector<64x128xbf16>
    tpu.vector_store %arg4[%c0_12, %c0_13], %126 {strides = array<i32>} : memref<64x128xbf16, #tpu.memory_space<vmem>>, vector<64x128xbf16>,
    %cst_14 = arith.constant dense<0.000000e+00> : vector<128xf32>
    %128 = vector.multi_reduction <add>, %125, %cst_14 [0] : vector<64x128xf32> to vector<128xf32>
    %129 = vector.shape_cast %128 : vector<128xf32> to vector<1x128xf32>
    %130 = vector.shape_cast %129 : vector<1x128xf32> to vector<1x1x128xf32>
    %c0_15 = arith.constant 0 : index
    %c0_16 = arith.constant 0 : index
    %c0_17 = arith.constant 0 : index
    %131 = vector.load %arg5[%c0_15, %c0_16, %c0_17] : memref<1x1x128xf32, #tpu.memory_space<vmem>>, vector<1x1x128xf32>
    tpu.vector_store %arg5[%c0_15, %c0_16, %c0_17], %130 {strides = array<i32>} : memref<1x1x128xf32, #tpu.memory_space<vmem>>, vector<1x1x128xf32>,
    %132 = arith.mulf %125, %125 : vector<64x128xf32>
    %cst_18 = arith.constant dense<0.000000e+00> : vector<128xf32>
    %133 = vector.multi_reduction <add>, %132, %cst_18 [0] : vector<64x128xf32> to vector<128xf32>
    %134 = vector.shape_cast %133 : vector<128xf32> to vector<1x128xf32>
    %135 = vector.shape_cast %134 : vector<1x128xf32> to vector<1x1x128xf32>
    %c0_19 = arith.constant 0 : index
    %c0_20 = arith.constant 0 : index
    %c0_21 = arith.constant 0 : index
    %136 = vector.load %arg6[%c0_19, %c0_20, %c0_21] : memref<1x1x128xf32, #tpu.memory_space<vmem>>, vector<1x1x128xf32>
    tpu.vector_store %arg6[%c0_19, %c0_20, %c0_21], %135 {strides = array<i32>} : memref<1x1x128xf32, #tpu.memory_space<vmem>>, vector<1x1x128xf32>,
    return
  }
  func.func @transform_0(%arg0: i32) -> (i32, i32, i32, i32, i32) {
    %c0_i32 = arith.constant 0 : i32
    %c0_i32_0 = arith.constant 0 : i32
    %c0_i32_1 = arith.constant 0 : i32
    %c0_i32_2 = arith.constant 0 : i32
    %c0_i32_3 = arith.constant 0 : i32
    return %arg0, %c0_i32, %c0_i32_0, %c0_i32_1, %c0_i32_2 : i32, i32, i32, i32, i32
  }
  func.func @transform_1(%arg0: i32) -> (i32, i32) {
    %c0_i32 = arith.constant 0 : i32
    %c0_i32_0 = arith.constant 0 : i32
    %c0_i32_1 = arith.constant 0 : i32
    return %c0_i32, %c0_i32_0 : i32, i32
  }
  func.func @transform_2(%arg0: i32) -> (i32, i32) {
    %c0_i32 = arith.constant 0 : i32
    %c0_i32_0 = arith.constant 0 : i32
    %c0_i32_1 = arith.constant 0 : i32
    return %c0_i32, %c0_i32_0 : i32, i32
  }
  func.func @transform_3(%arg0: i32) -> (i32, i32) {
    %c0_i32 = arith.constant 0 : i32
    %c0_i32_0 = arith.constant 0 : i32
    return %arg0, %c0_i32 : i32, i32
  }
  func.func @transform_4(%arg0: i32) -> (i32, i32, i32) {
    %c0_i32 = arith.constant 0 : i32
    %c0_i32_0 = arith.constant 0 : i32
    %c0_i32_1 = arith.constant 0 : i32
    return %arg0, %c0_i32, %c0_i32_0 : i32, i32, i32
  }
  func.func @transform_5(%arg0: i32) -> (i32, i32, i32) {
    %c0_i32 = arith.constant 0 : i32
    %c0_i32_0 = arith.constant 0 : i32
    %c0_i32_1 = arith.constant 0 : i32
    return %arg0, %c0_i32, %c0_i32_0 : i32, i32, i32
  }
}

module attributes {stable_mosaic.version = 11 : i64} {
  func.func @conv_pool_stats_kernel(%arg0: i32, %arg1: memref<1x4x5x5x32xbf16, #tpu.memory_space<vmem>>, %arg2: memref<288x128xbf16, #tpu.memory_space<vmem>>, %arg3: memref<1x128xf32, #tpu.memory_space<vmem>>, %arg4: memref<16x128xbf16, #tpu.memory_space<vmem>>, %arg5: memref<1x1x128xf32, #tpu.memory_space<vmem>>, %arg6: memref<1x1x128xf32, #tpu.memory_space<vmem>>) attributes {dimension_semantics = [#tpu.dimension_semantics<parallel>], iteration_bounds = array<i64: 2>, scalar_prefetch = 0 : i64, scratch_operands = 0 : i64, tpu.core_type = #tpu.core_type<tc>, window_params = [{transform_indices = @transform_0, window_bounds = array<i64: 1, 4, 5, 5, 32>}, {pipeline_mode = #tpu.pipeline_mode<synchronous>, transform_indices = @transform_1, window_bounds = array<i64: 288, 128>}, {pipeline_mode = #tpu.pipeline_mode<synchronous>, transform_indices = @transform_2, window_bounds = array<i64: 1, 128>}, {transform_indices = @transform_3, window_bounds = array<i64: 16, 128>}, {transform_indices = @transform_4, window_bounds = array<i64: 1, 1, 128>}, {transform_indices = @transform_5, window_bounds = array<i64: 1, 1, 128>}]} {
    %c0 = arith.constant 0 : index
    %c0_0 = arith.constant 0 : index
    %c0_1 = arith.constant 0 : index
    %c0_2 = arith.constant 0 : index
    %c0_3 = arith.constant 0 : index
    %0 = vector.load %arg1[%c0, %c0_0, %c0_1, %c0_2, %c0_3] : memref<1x4x5x5x32xbf16, #tpu.memory_space<vmem>>, vector<1x4x5x5x32xbf16>
    %c0_4 = arith.constant 0 : index
    %c0_5 = arith.constant 0 : index
    %1 = vector.load %arg2[%c0_4, %c0_5] : memref<288x128xbf16, #tpu.memory_space<vmem>>, vector<288x128xbf16>
    %2 = vector.extract_strided_slice %0 {offsets = [0, 0, 0, 0, 0], sizes = [1, 1, 4, 4, 32], strides = [1, 1, 1, 1, 1]} : vector<1x4x5x5x32xbf16> to vector<1x1x4x4x32xbf16>
    %3 = vector.shape_cast %2 : vector<1x1x4x4x32xbf16> to vector<1x4x4x32xbf16>
    %4 = vector.shape_cast %3 : vector<1x4x4x32xbf16> to vector<16x32xbf16>
    %5 = vector.extract_strided_slice %0 {offsets = [0, 1, 0, 0, 0], sizes = [1, 1, 4, 4, 32], strides = [1, 1, 1, 1, 1]} : vector<1x4x5x5x32xbf16> to vector<1x1x4x4x32xbf16>
    %6 = vector.shape_cast %5 : vector<1x1x4x4x32xbf16> to vector<1x4x4x32xbf16>
    %7 = vector.shape_cast %6 : vector<1x4x4x32xbf16> to vector<16x32xbf16>
    %8 = vector.extract_strided_slice %0 {offsets = [0, 0, 0, 1, 0], sizes = [1, 1, 4, 4, 32], strides = [1, 1, 1, 1, 1]} : vector<1x4x5x5x32xbf16> to vector<1x1x4x4x32xbf16>
    %9 = vector.shape_cast %8 : vector<1x1x4x4x32xbf16> to vector<1x4x4x32xbf16>
    %10 = vector.shape_cast %9 : vector<1x4x4x32xbf16> to vector<16x32xbf16>
    %11 = vector.extract_strided_slice %0 {offsets = [0, 2, 0, 0, 0], sizes = [1, 1, 4, 4, 32], strides = [1, 1, 1, 1, 1]} : vector<1x4x5x5x32xbf16> to vector<1x1x4x4x32xbf16>
    %12 = vector.shape_cast %11 : vector<1x1x4x4x32xbf16> to vector<1x4x4x32xbf16>
    %13 = vector.shape_cast %12 : vector<1x4x4x32xbf16> to vector<16x32xbf16>
    %14 = vector.extract_strided_slice %0 {offsets = [0, 3, 0, 0, 0], sizes = [1, 1, 4, 4, 32], strides = [1, 1, 1, 1, 1]} : vector<1x4x5x5x32xbf16> to vector<1x1x4x4x32xbf16>
    %15 = vector.shape_cast %14 : vector<1x1x4x4x32xbf16> to vector<1x4x4x32xbf16>
    %16 = vector.shape_cast %15 : vector<1x4x4x32xbf16> to vector<16x32xbf16>
    %17 = vector.extract_strided_slice %0 {offsets = [0, 2, 0, 1, 0], sizes = [1, 1, 4, 4, 32], strides = [1, 1, 1, 1, 1]} : vector<1x4x5x5x32xbf16> to vector<1x1x4x4x32xbf16>
    %18 = vector.shape_cast %17 : vector<1x1x4x4x32xbf16> to vector<1x4x4x32xbf16>
    %19 = vector.shape_cast %18 : vector<1x4x4x32xbf16> to vector<16x32xbf16>
    %20 = vector.extract_strided_slice %0 {offsets = [0, 0, 1, 0, 0], sizes = [1, 1, 4, 4, 32], strides = [1, 1, 1, 1, 1]} : vector<1x4x5x5x32xbf16> to vector<1x1x4x4x32xbf16>
    %21 = vector.shape_cast %20 : vector<1x1x4x4x32xbf16> to vector<1x4x4x32xbf16>
    %22 = vector.shape_cast %21 : vector<1x4x4x32xbf16> to vector<16x32xbf16>
    %23 = vector.extract_strided_slice %0 {offsets = [0, 1, 1, 0, 0], sizes = [1, 1, 4, 4, 32], strides = [1, 1, 1, 1, 1]} : vector<1x4x5x5x32xbf16> to vector<1x1x4x4x32xbf16>
    %24 = vector.shape_cast %23 : vector<1x1x4x4x32xbf16> to vector<1x4x4x32xbf16>
    %25 = vector.shape_cast %24 : vector<1x4x4x32xbf16> to vector<16x32xbf16>
    %26 = vector.extract_strided_slice %0 {offsets = [0, 0, 1, 1, 0], sizes = [1, 1, 4, 4, 32], strides = [1, 1, 1, 1, 1]} : vector<1x4x5x5x32xbf16> to vector<1x1x4x4x32xbf16>
    %27 = vector.shape_cast %26 : vector<1x1x4x4x32xbf16> to vector<1x4x4x32xbf16>
    %28 = vector.shape_cast %27 : vector<1x4x4x32xbf16> to vector<16x32xbf16>
    %29 = tpu.concatenate %4, %7, %10, %13, %16, %19, %22, %25, %28 in 1 : vector<16x32xbf16>, vector<16x32xbf16>, vector<16x32xbf16>, vector<16x32xbf16>, vector<16x32xbf16>, vector<16x32xbf16>, vector<16x32xbf16>, vector<16x32xbf16>, vector<16x32xbf16> -> vector<16x288xbf16>
    %cst = arith.constant dense<0.000000e+00> : vector<16x128xf32>
    %30 = tpu.matmul %29, %1, %cst {dimension_numbers = #tpu.dot_dimension_numbers<[1], [0], [0], [1], [0, 0, 1, 1], [], []>} : vector<16x288xbf16>, vector<288x128xbf16>, vector<16x128xf32> -> vector<16x128xf32>
    %31 = vector.extract_strided_slice %0 {offsets = [0, 1, 0, 0, 0], sizes = [1, 1, 4, 4, 32], strides = [1, 1, 1, 1, 1]} : vector<1x4x5x5x32xbf16> to vector<1x1x4x4x32xbf16>
    %32 = vector.shape_cast %31 : vector<1x1x4x4x32xbf16> to vector<1x4x4x32xbf16>
    %33 = vector.shape_cast %32 : vector<1x4x4x32xbf16> to vector<16x32xbf16>
    %34 = vector.extract_strided_slice %0 {offsets = [0, 0, 0, 1, 0], sizes = [1, 1, 4, 4, 32], strides = [1, 1, 1, 1, 1]} : vector<1x4x5x5x32xbf16> to vector<1x1x4x4x32xbf16>
    %35 = vector.shape_cast %34 : vector<1x1x4x4x32xbf16> to vector<1x4x4x32xbf16>
    %36 = vector.shape_cast %35 : vector<1x4x4x32xbf16> to vector<16x32xbf16>
    %37 = vector.extract_strided_slice %0 {offsets = [0, 1, 0, 1, 0], sizes = [1, 1, 4, 4, 32], strides = [1, 1, 1, 1, 1]} : vector<1x4x5x5x32xbf16> to vector<1x1x4x4x32xbf16>
    %38 = vector.shape_cast %37 : vector<1x1x4x4x32xbf16> to vector<1x4x4x32xbf16>
    %39 = vector.shape_cast %38 : vector<1x4x4x32xbf16> to vector<16x32xbf16>
    %40 = vector.extract_strided_slice %0 {offsets = [0, 3, 0, 0, 0], sizes = [1, 1, 4, 4, 32], strides = [1, 1, 1, 1, 1]} : vector<1x4x5x5x32xbf16> to vector<1x1x4x4x32xbf16>
    %41 = vector.shape_cast %40 : vector<1x1x4x4x32xbf16> to vector<1x4x4x32xbf16>
    %42 = vector.shape_cast %41 : vector<1x4x4x32xbf16> to vector<16x32xbf16>
    %43 = vector.extract_strided_slice %0 {offsets = [0, 2, 0, 1, 0], sizes = [1, 1, 4, 4, 32], strides = [1, 1, 1, 1, 1]} : vector<1x4x5x5x32xbf16> to vector<1x1x4x4x32xbf16>
    %44 = vector.shape_cast %43 : vector<1x1x4x4x32xbf16> to vector<1x4x4x32xbf16>
    %45 = vector.shape_cast %44 : vector<1x4x4x32xbf16> to vector<16x32xbf16>
    %46 = vector.extract_strided_slice %0 {offsets = [0, 3, 0, 1, 0], sizes = [1, 1, 4, 4, 32], strides = [1, 1, 1, 1, 1]} : vector<1x4x5x5x32xbf16> to vector<1x1x4x4x32xbf16>
    %47 = vector.shape_cast %46 : vector<1x1x4x4x32xbf16> to vector<1x4x4x32xbf16>
    %48 = vector.shape_cast %47 : vector<1x4x4x32xbf16> to vector<16x32xbf16>
    %49 = vector.extract_strided_slice %0 {offsets = [0, 1, 1, 0, 0], sizes = [1, 1, 4, 4, 32], strides = [1, 1, 1, 1, 1]} : vector<1x4x5x5x32xbf16> to vector<1x1x4x4x32xbf16>
    %50 = vector.shape_cast %49 : vector<1x1x4x4x32xbf16> to vector<1x4x4x32xbf16>
    %51 = vector.shape_cast %50 : vector<1x4x4x32xbf16> to vector<16x32xbf16>
    %52 = vector.extract_strided_slice %0 {offsets = [0, 0, 1, 1, 0], sizes = [1, 1, 4, 4, 32], strides = [1, 1, 1, 1, 1]} : vector<1x4x5x5x32xbf16> to vector<1x1x4x4x32xbf16>
    %53 = vector.shape_cast %52 : vector<1x1x4x4x32xbf16> to vector<1x4x4x32xbf16>
    %54 = vector.shape_cast %53 : vector<1x4x4x32xbf16> to vector<16x32xbf16>
    %55 = vector.extract_strided_slice %0 {offsets = [0, 1, 1, 1, 0], sizes = [1, 1, 4, 4, 32], strides = [1, 1, 1, 1, 1]} : vector<1x4x5x5x32xbf16> to vector<1x1x4x4x32xbf16>
    %56 = vector.shape_cast %55 : vector<1x1x4x4x32xbf16> to vector<1x4x4x32xbf16>
    %57 = vector.shape_cast %56 : vector<1x4x4x32xbf16> to vector<16x32xbf16>
    %58 = tpu.concatenate %33, %36, %39, %42, %45, %48, %51, %54, %57 in 1 : vector<16x32xbf16>, vector<16x32xbf16>, vector<16x32xbf16>, vector<16x32xbf16>, vector<16x32xbf16>, vector<16x32xbf16>, vector<16x32xbf16>, vector<16x32xbf16>, vector<16x32xbf16> -> vector<16x288xbf16>
    %cst_6 = arith.constant dense<0.000000e+00> : vector<16x128xf32>
    %59 = tpu.matmul %58, %1, %cst_6 {dimension_numbers = #tpu.dot_dimension_numbers<[1], [0], [0], [1], [0, 0, 1, 1], [], []>} : vector<16x288xbf16>, vector<288x128xbf16>, vector<16x128xf32> -> vector<16x128xf32>
    %60 = arith.maximumf %30, %59 : vector<16x128xf32>
    %61 = vector.extract_strided_slice %0 {offsets = [0, 2, 0, 0, 0], sizes = [1, 1, 4, 4, 32], strides = [1, 1, 1, 1, 1]} : vector<1x4x5x5x32xbf16> to vector<1x1x4x4x32xbf16>
    %62 = vector.shape_cast %61 : vector<1x1x4x4x32xbf16> to vector<1x4x4x32xbf16>
    %63 = vector.shape_cast %62 : vector<1x4x4x32xbf16> to vector<16x32xbf16>
    %64 = vector.extract_strided_slice %0 {offsets = [0, 3, 0, 0, 0], sizes = [1, 1, 4, 4, 32], strides = [1, 1, 1, 1, 1]} : vector<1x4x5x5x32xbf16> to vector<1x1x4x4x32xbf16>
    %65 = vector.shape_cast %64 : vector<1x1x4x4x32xbf16> to vector<1x4x4x32xbf16>
    %66 = vector.shape_cast %65 : vector<1x4x4x32xbf16> to vector<16x32xbf16>
    %67 = vector.extract_strided_slice %0 {offsets = [0, 2, 0, 1, 0], sizes = [1, 1, 4, 4, 32], strides = [1, 1, 1, 1, 1]} : vector<1x4x5x5x32xbf16> to vector<1x1x4x4x32xbf16>
    %68 = vector.shape_cast %67 : vector<1x1x4x4x32xbf16> to vector<1x4x4x32xbf16>
    %69 = vector.shape_cast %68 : vector<1x4x4x32xbf16> to vector<16x32xbf16>
    %70 = vector.extract_strided_slice %0 {offsets = [0, 0, 1, 0, 0], sizes = [1, 1, 4, 4, 32], strides = [1, 1, 1, 1, 1]} : vector<1x4x5x5x32xbf16> to vector<1x1x4x4x32xbf16>
    %71 = vector.shape_cast %70 : vector<1x1x4x4x32xbf16> to vector<1x4x4x32xbf16>
    %72 = vector.shape_cast %71 : vector<1x4x4x32xbf16> to vector<16x32xbf16>
    %73 = vector.extract_strided_slice %0 {offsets = [0, 1, 1, 0, 0], sizes = [1, 1, 4, 4, 32], strides = [1, 1, 1, 1, 1]} : vector<1x4x5x5x32xbf16> to vector<1x1x4x4x32xbf16>
    %74 = vector.shape_cast %73 : vector<1x1x4x4x32xbf16> to vector<1x4x4x32xbf16>
    %75 = vector.shape_cast %74 : vector<1x4x4x32xbf16> to vector<16x32xbf16>
    %76 = vector.extract_strided_slice %0 {offsets = [0, 0, 1, 1, 0], sizes = [1, 1, 4, 4, 32], strides = [1, 1, 1, 1, 1]} : vector<1x4x5x5x32xbf16> to vector<1x1x4x4x32xbf16>
    %77 = vector.shape_cast %76 : vector<1x1x4x4x32xbf16> to vector<1x4x4x32xbf16>
    %78 = vector.shape_cast %77 : vector<1x4x4x32xbf16> to vector<16x32xbf16>
    %79 = vector.extract_strided_slice %0 {offsets = [0, 2, 1, 0, 0], sizes = [1, 1, 4, 4, 32], strides = [1, 1, 1, 1, 1]} : vector<1x4x5x5x32xbf16> to vector<1x1x4x4x32xbf16>
    %80 = vector.shape_cast %79 : vector<1x1x4x4x32xbf16> to vector<1x4x4x32xbf16>
    %81 = vector.shape_cast %80 : vector<1x4x4x32xbf16> to vector<16x32xbf16>
    %82 = vector.extract_strided_slice %0 {offsets = [0, 3, 1, 0, 0], sizes = [1, 1, 4, 4, 32], strides = [1, 1, 1, 1, 1]} : vector<1x4x5x5x32xbf16> to vector<1x1x4x4x32xbf16>
    %83 = vector.shape_cast %82 : vector<1x1x4x4x32xbf16> to vector<1x4x4x32xbf16>
    %84 = vector.shape_cast %83 : vector<1x4x4x32xbf16> to vector<16x32xbf16>
    %85 = vector.extract_strided_slice %0 {offsets = [0, 2, 1, 1, 0], sizes = [1, 1, 4, 4, 32], strides = [1, 1, 1, 1, 1]} : vector<1x4x5x5x32xbf16> to vector<1x1x4x4x32xbf16>
    %86 = vector.shape_cast %85 : vector<1x1x4x4x32xbf16> to vector<1x4x4x32xbf16>
    %87 = vector.shape_cast %86 : vector<1x4x4x32xbf16> to vector<16x32xbf16>
    %88 = tpu.concatenate %63, %66, %69, %72, %75, %78, %81, %84, %87 in 1 : vector<16x32xbf16>, vector<16x32xbf16>, vector<16x32xbf16>, vector<16x32xbf16>, vector<16x32xbf16>, vector<16x32xbf16>, vector<16x32xbf16>, vector<16x32xbf16>, vector<16x32xbf16> -> vector<16x288xbf16>
    %cst_7 = arith.constant dense<0.000000e+00> : vector<16x128xf32>
    %89 = tpu.matmul %88, %1, %cst_7 {dimension_numbers = #tpu.dot_dimension_numbers<[1], [0], [0], [1], [0, 0, 1, 1], [], []>} : vector<16x288xbf16>, vector<288x128xbf16>, vector<16x128xf32> -> vector<16x128xf32>
    %90 = arith.maximumf %60, %89 : vector<16x128xf32>
    %91 = vector.extract_strided_slice %0 {offsets = [0, 3, 0, 0, 0], sizes = [1, 1, 4, 4, 32], strides = [1, 1, 1, 1, 1]} : vector<1x4x5x5x32xbf16> to vector<1x1x4x4x32xbf16>
    %92 = vector.shape_cast %91 : vector<1x1x4x4x32xbf16> to vector<1x4x4x32xbf16>
    %93 = vector.shape_cast %92 : vector<1x4x4x32xbf16> to vector<16x32xbf16>
    %94 = vector.extract_strided_slice %0 {offsets = [0, 2, 0, 1, 0], sizes = [1, 1, 4, 4, 32], strides = [1, 1, 1, 1, 1]} : vector<1x4x5x5x32xbf16> to vector<1x1x4x4x32xbf16>
    %95 = vector.shape_cast %94 : vector<1x1x4x4x32xbf16> to vector<1x4x4x32xbf16>
    %96 = vector.shape_cast %95 : vector<1x4x4x32xbf16> to vector<16x32xbf16>
    %97 = vector.extract_strided_slice %0 {offsets = [0, 3, 0, 1, 0], sizes = [1, 1, 4, 4, 32], strides = [1, 1, 1, 1, 1]} : vector<1x4x5x5x32xbf16> to vector<1x1x4x4x32xbf16>
    %98 = vector.shape_cast %97 : vector<1x1x4x4x32xbf16> to vector<1x4x4x32xbf16>
    %99 = vector.shape_cast %98 : vector<1x4x4x32xbf16> to vector<16x32xbf16>
    %100 = vector.extract_strided_slice %0 {offsets = [0, 1, 1, 0, 0], sizes = [1, 1, 4, 4, 32], strides = [1, 1, 1, 1, 1]} : vector<1x4x5x5x32xbf16> to vector<1x1x4x4x32xbf16>
    %101 = vector.shape_cast %100 : vector<1x1x4x4x32xbf16> to vector<1x4x4x32xbf16>
    %102 = vector.shape_cast %101 : vector<1x4x4x32xbf16> to vector<16x32xbf16>
    %103 = vector.extract_strided_slice %0 {offsets = [0, 0, 1, 1, 0], sizes = [1, 1, 4, 4, 32], strides = [1, 1, 1, 1, 1]} : vector<1x4x5x5x32xbf16> to vector<1x1x4x4x32xbf16>
    %104 = vector.shape_cast %103 : vector<1x1x4x4x32xbf16> to vector<1x4x4x32xbf16>
    %105 = vector.shape_cast %104 : vector<1x4x4x32xbf16> to vector<16x32xbf16>
    %106 = vector.extract_strided_slice %0 {offsets = [0, 1, 1, 1, 0], sizes = [1, 1, 4, 4, 32], strides = [1, 1, 1, 1, 1]} : vector<1x4x5x5x32xbf16> to vector<1x1x4x4x32xbf16>
    %107 = vector.shape_cast %106 : vector<1x1x4x4x32xbf16> to vector<1x4x4x32xbf16>
    %108 = vector.shape_cast %107 : vector<1x4x4x32xbf16> to vector<16x32xbf16>
    %109 = vector.extract_strided_slice %0 {offsets = [0, 3, 1, 0, 0], sizes = [1, 1, 4, 4, 32], strides = [1, 1, 1, 1, 1]} : vector<1x4x5x5x32xbf16> to vector<1x1x4x4x32xbf16>
    %110 = vector.shape_cast %109 : vector<1x1x4x4x32xbf16> to vector<1x4x4x32xbf16>
    %111 = vector.shape_cast %110 : vector<1x4x4x32xbf16> to vector<16x32xbf16>
    %112 = vector.extract_strided_slice %0 {offsets = [0, 2, 1, 1, 0], sizes = [1, 1, 4, 4, 32], strides = [1, 1, 1, 1, 1]} : vector<1x4x5x5x32xbf16> to vector<1x1x4x4x32xbf16>
    %113 = vector.shape_cast %112 : vector<1x1x4x4x32xbf16> to vector<1x4x4x32xbf16>
    %114 = vector.shape_cast %113 : vector<1x4x4x32xbf16> to vector<16x32xbf16>
    %115 = vector.extract_strided_slice %0 {offsets = [0, 3, 1, 1, 0], sizes = [1, 1, 4, 4, 32], strides = [1, 1, 1, 1, 1]} : vector<1x4x5x5x32xbf16> to vector<1x1x4x4x32xbf16>
    %116 = vector.shape_cast %115 : vector<1x1x4x4x32xbf16> to vector<1x4x4x32xbf16>
    %117 = vector.shape_cast %116 : vector<1x4x4x32xbf16> to vector<16x32xbf16>
    %118 = tpu.concatenate %93, %96, %99, %102, %105, %108, %111, %114, %117 in 1 : vector<16x32xbf16>, vector<16x32xbf16>, vector<16x32xbf16>, vector<16x32xbf16>, vector<16x32xbf16>, vector<16x32xbf16>, vector<16x32xbf16>, vector<16x32xbf16>, vector<16x32xbf16> -> vector<16x288xbf16>
    %cst_8 = arith.constant dense<0.000000e+00> : vector<16x128xf32>
    %119 = tpu.matmul %118, %1, %cst_8 {dimension_numbers = #tpu.dot_dimension_numbers<[1], [0], [0], [1], [0, 0, 1, 1], [], []>} : vector<16x288xbf16>, vector<288x128xbf16>, vector<16x128xf32> -> vector<16x128xf32>
    %120 = arith.maximumf %90, %119 : vector<16x128xf32>
    %c0_9 = arith.constant 0 : index
    %c0_10 = arith.constant 0 : index
    %121 = vector.load %arg3[%c0_9, %c0_10] : memref<1x128xf32, #tpu.memory_space<vmem>>, vector<1x128xf32>
    %122 = vector.broadcast %121 : vector<1x128xf32> to vector<16x128xf32>
    %123 = arith.addf %120, %122 : vector<16x128xf32>
    %cst_11 = arith.constant 0.000000e+00 : f32
    %124 = vector.broadcast %cst_11 : f32 to vector<16x128xf32>
    %125 = arith.maximumf %123, %124 : vector<16x128xf32>
    %126 = arith.truncf %125 : vector<16x128xf32> to vector<16x128xbf16>
    %c0_12 = arith.constant 0 : index
    %c0_13 = arith.constant 0 : index
    %127 = vector.load %arg4[%c0_12, %c0_13] : memref<16x128xbf16, #tpu.memory_space<vmem>>, vector<16x128xbf16>
    tpu.vector_store %arg4[%c0_12, %c0_13], %126 {strides = array<i32>} : memref<16x128xbf16, #tpu.memory_space<vmem>>, vector<16x128xbf16>,
    %cst_14 = arith.constant dense<0.000000e+00> : vector<128xf32>
    %128 = vector.multi_reduction <add>, %125, %cst_14 [0] : vector<16x128xf32> to vector<128xf32>
    %129 = vector.shape_cast %128 : vector<128xf32> to vector<1x128xf32>
    %130 = vector.shape_cast %129 : vector<1x128xf32> to vector<1x1x128xf32>
    %c0_15 = arith.constant 0 : index
    %c0_16 = arith.constant 0 : index
    %c0_17 = arith.constant 0 : index
    %131 = vector.load %arg5[%c0_15, %c0_16, %c0_17] : memref<1x1x128xf32, #tpu.memory_space<vmem>>, vector<1x1x128xf32>
    tpu.vector_store %arg5[%c0_15, %c0_16, %c0_17], %130 {strides = array<i32>} : memref<1x1x128xf32, #tpu.memory_space<vmem>>, vector<1x1x128xf32>,
    %132 = arith.mulf %125, %125 : vector<16x128xf32>
    %cst_18 = arith.constant dense<0.000000e+00> : vector<128xf32>
    %133 = vector.multi_reduction <add>, %132, %cst_18 [0] : vector<16x128xf32> to vector<128xf32>
    %134 = vector.shape_cast %133 : vector<128xf32> to vector<1x128xf32>
    %135 = vector.shape_cast %134 : vector<1x128xf32> to vector<1x1x128xf32>
    %c0_19 = arith.constant 0 : index
    %c0_20 = arith.constant 0 : index
    %c0_21 = arith.constant 0 : index
    %136 = vector.load %arg6[%c0_19, %c0_20, %c0_21] : memref<1x1x128xf32, #tpu.memory_space<vmem>>, vector<1x1x128xf32>
    tpu.vector_store %arg6[%c0_19, %c0_20, %c0_21], %135 {strides = array<i32>} : memref<1x1x128xf32, #tpu.memory_space<vmem>>, vector<1x1x128xf32>,
    return
  }
  func.func @transform_0(%arg0: i32) -> (i32, i32, i32, i32, i32) {
    %c0_i32 = arith.constant 0 : i32
    %c0_i32_0 = arith.constant 0 : i32
    %c0_i32_1 = arith.constant 0 : i32
    %c0_i32_2 = arith.constant 0 : i32
    %c0_i32_3 = arith.constant 0 : i32
    return %arg0, %c0_i32, %c0_i32_0, %c0_i32_1, %c0_i32_2 : i32, i32, i32, i32, i32
  }
  func.func @transform_1(%arg0: i32) -> (i32, i32) {
    %c0_i32 = arith.constant 0 : i32
    %c0_i32_0 = arith.constant 0 : i32
    %c0_i32_1 = arith.constant 0 : i32
    return %c0_i32, %c0_i32_0 : i32, i32
  }
  func.func @transform_2(%arg0: i32) -> (i32, i32) {
    %c0_i32 = arith.constant 0 : i32
    %c0_i32_0 = arith.constant 0 : i32
    %c0_i32_1 = arith.constant 0 : i32
    return %c0_i32, %c0_i32_0 : i32, i32
  }
  func.func @transform_3(%arg0: i32) -> (i32, i32) {
    %c0_i32 = arith.constant 0 : i32
    %c0_i32_0 = arith.constant 0 : i32
    return %arg0, %c0_i32 : i32, i32
  }
  func.func @transform_4(%arg0: i32) -> (i32, i32, i32) {
    %c0_i32 = arith.constant 0 : i32
    %c0_i32_0 = arith.constant 0 : i32
    %c0_i32_1 = arith.constant 0 : i32
    return %arg0, %c0_i32, %c0_i32_0 : i32, i32, i32
  }
  func.func @transform_5(%arg0: i32) -> (i32, i32, i32) {
    %c0_i32 = arith.constant 0 : i32
    %c0_i32_0 = arith.constant 0 : i32
    %c0_i32_1 = arith.constant 0 : i32
    return %arg0, %c0_i32, %c0_i32_0 : i32, i32, i32
  }
}

module attributes {stable_mosaic.version = 11 : i64} {
  func.func @bn_apply_kernel(%arg0: i32, %arg1: memref<32x128xbf16, #tpu.memory_space<vmem>>, %arg2: memref<1x64xf32, #tpu.memory_space<vmem>>, %arg3: memref<1x64xf32, #tpu.memory_space<vmem>>, %arg4: memref<32x64xbf16, #tpu.memory_space<vmem>>) attributes {dimension_semantics = [#tpu.dimension_semantics<parallel>], iteration_bounds = array<i64: 1>, scalar_prefetch = 0 : i64, scratch_operands = 0 : i64, tpu.core_type = #tpu.core_type<tc>, window_params = [{transform_indices = @transform_0, window_bounds = array<i64: 32, 128>}, {pipeline_mode = #tpu.pipeline_mode<synchronous>, transform_indices = @transform_1, window_bounds = array<i64: 1, 64>}, {pipeline_mode = #tpu.pipeline_mode<synchronous>, transform_indices = @transform_2, window_bounds = array<i64: 1, 64>}, {transform_indices = @transform_3, window_bounds = array<i64: 32, 64>}]} {
    %c0 = arith.constant 0 : index
    %c0_0 = arith.constant 0 : index
    %0 = vector.load %arg1[%c0, %c0_0] : memref<32x128xbf16, #tpu.memory_space<vmem>>, vector<32x128xbf16>
    %1 = vector.extract_strided_slice %0 {offsets = [0, 0], sizes = [32, 64], strides = [1, 1]} : vector<32x128xbf16> to vector<32x64xbf16>
    %2 = arith.extf %1 : vector<32x64xbf16> to vector<32x64xf32>
    %c0_1 = arith.constant 0 : index
    %c0_2 = arith.constant 0 : index
    %3 = vector.load %arg2[%c0_1, %c0_2] : memref<1x64xf32, #tpu.memory_space<vmem>>, vector<1x64xf32>
    %4 = vector.broadcast %3 : vector<1x64xf32> to vector<32x64xf32>
    %5 = arith.mulf %2, %4 : vector<32x64xf32>
    %c0_3 = arith.constant 0 : index
    %c0_4 = arith.constant 0 : index
    %6 = vector.load %arg3[%c0_3, %c0_4] : memref<1x64xf32, #tpu.memory_space<vmem>>, vector<1x64xf32>
    %7 = vector.broadcast %6 : vector<1x64xf32> to vector<32x64xf32>
    %8 = arith.addf %5, %7 : vector<32x64xf32>
    %9 = arith.truncf %8 : vector<32x64xf32> to vector<32x64xbf16>
    %c0_5 = arith.constant 0 : index
    %c0_6 = arith.constant 0 : index
    %10 = vector.load %arg4[%c0_5, %c0_6] : memref<32x64xbf16, #tpu.memory_space<vmem>>, vector<32x64xbf16>
    tpu.vector_store %arg4[%c0_5, %c0_6], %9 {strides = array<i32>} : memref<32x64xbf16, #tpu.memory_space<vmem>>, vector<32x64xbf16>,
    return
  }
  func.func @transform_0(%arg0: i32) -> (i32, i32) {
    %c0_i32 = arith.constant 0 : i32
    %c0_i32_0 = arith.constant 0 : i32
    return %arg0, %c0_i32 : i32, i32
  }
  func.func @transform_1(%arg0: i32) -> (i32, i32) {
    %c0_i32 = arith.constant 0 : i32
    %c0_i32_0 = arith.constant 0 : i32
    %c0_i32_1 = arith.constant 0 : i32
    return %c0_i32, %c0_i32_0 : i32, i32
  }
  func.func @transform_2(%arg0: i32) -> (i32, i32) {
    %c0_i32 = arith.constant 0 : i32
    %c0_i32_0 = arith.constant 0 : i32
    %c0_i32_1 = arith.constant 0 : i32
    return %c0_i32, %c0_i32_0 : i32, i32
  }
  func.func @transform_3(%arg0: i32) -> (i32, i32) {
    %c0_i32 = arith.constant 0 : i32
    %c0_i32_0 = arith.constant 0 : i32
    return %arg0, %c0_i32 : i32, i32
  }
}

module attributes {stable_mosaic.version = 11 : i64} {
  func.func @conv_pool_stats_kernel(%arg0: i32, %arg1: memref<2x4x3x3x64xbf16, #tpu.memory_space<vmem>>, %arg2: memref<576x128xbf16, #tpu.memory_space<vmem>>, %arg3: memref<1x128xf32, #tpu.memory_space<vmem>>, %arg4: memref<8x128xbf16, #tpu.memory_space<vmem>>, %arg5: memref<1x1x128xf32, #tpu.memory_space<vmem>>, %arg6: memref<1x1x128xf32, #tpu.memory_space<vmem>>) attributes {dimension_semantics = [#tpu.dimension_semantics<parallel>], iteration_bounds = array<i64: 1>, scalar_prefetch = 0 : i64, scratch_operands = 0 : i64, tpu.core_type = #tpu.core_type<tc>, window_params = [{transform_indices = @transform_0, window_bounds = array<i64: 2, 4, 3, 3, 64>}, {pipeline_mode = #tpu.pipeline_mode<synchronous>, transform_indices = @transform_1, window_bounds = array<i64: 576, 128>}, {pipeline_mode = #tpu.pipeline_mode<synchronous>, transform_indices = @transform_2, window_bounds = array<i64: 1, 128>}, {transform_indices = @transform_3, window_bounds = array<i64: 8, 128>}, {transform_indices = @transform_4, window_bounds = array<i64: 1, 1, 128>}, {transform_indices = @transform_5, window_bounds = array<i64: 1, 1, 128>}]} {
    %c0 = arith.constant 0 : index
    %c0_0 = arith.constant 0 : index
    %c0_1 = arith.constant 0 : index
    %c0_2 = arith.constant 0 : index
    %c0_3 = arith.constant 0 : index
    %0 = vector.load %arg1[%c0, %c0_0, %c0_1, %c0_2, %c0_3] : memref<2x4x3x3x64xbf16, #tpu.memory_space<vmem>>, vector<2x4x3x3x64xbf16>
    %c0_4 = arith.constant 0 : index
    %c0_5 = arith.constant 0 : index
    %1 = vector.load %arg2[%c0_4, %c0_5] : memref<576x128xbf16, #tpu.memory_space<vmem>>, vector<576x128xbf16>
    %2 = vector.extract_strided_slice %0 {offsets = [0, 0, 0, 0, 0], sizes = [2, 1, 2, 2, 64], strides = [1, 1, 1, 1, 1]} : vector<2x4x3x3x64xbf16> to vector<2x1x2x2x64xbf16>
    %3 = vector.shape_cast %2 : vector<2x1x2x2x64xbf16> to vector<2x2x2x64xbf16>
    %4 = vector.shape_cast %3 : vector<2x2x2x64xbf16> to vector<8x64xbf16>
    %5 = vector.extract_strided_slice %0 {offsets = [0, 1, 0, 0, 0], sizes = [2, 1, 2, 2, 64], strides = [1, 1, 1, 1, 1]} : vector<2x4x3x3x64xbf16> to vector<2x1x2x2x64xbf16>
    %6 = vector.shape_cast %5 : vector<2x1x2x2x64xbf16> to vector<2x2x2x64xbf16>
    %7 = vector.shape_cast %6 : vector<2x2x2x64xbf16> to vector<8x64xbf16>
    %8 = vector.extract_strided_slice %0 {offsets = [0, 0, 0, 1, 0], sizes = [2, 1, 2, 2, 64], strides = [1, 1, 1, 1, 1]} : vector<2x4x3x3x64xbf16> to vector<2x1x2x2x64xbf16>
    %9 = vector.shape_cast %8 : vector<2x1x2x2x64xbf16> to vector<2x2x2x64xbf16>
    %10 = vector.shape_cast %9 : vector<2x2x2x64xbf16> to vector<8x64xbf16>
    %11 = vector.extract_strided_slice %0 {offsets = [0, 2, 0, 0, 0], sizes = [2, 1, 2, 2, 64], strides = [1, 1, 1, 1, 1]} : vector<2x4x3x3x64xbf16> to vector<2x1x2x2x64xbf16>
    %12 = vector.shape_cast %11 : vector<2x1x2x2x64xbf16> to vector<2x2x2x64xbf16>
    %13 = vector.shape_cast %12 : vector<2x2x2x64xbf16> to vector<8x64xbf16>
    %14 = vector.extract_strided_slice %0 {offsets = [0, 3, 0, 0, 0], sizes = [2, 1, 2, 2, 64], strides = [1, 1, 1, 1, 1]} : vector<2x4x3x3x64xbf16> to vector<2x1x2x2x64xbf16>
    %15 = vector.shape_cast %14 : vector<2x1x2x2x64xbf16> to vector<2x2x2x64xbf16>
    %16 = vector.shape_cast %15 : vector<2x2x2x64xbf16> to vector<8x64xbf16>
    %17 = vector.extract_strided_slice %0 {offsets = [0, 2, 0, 1, 0], sizes = [2, 1, 2, 2, 64], strides = [1, 1, 1, 1, 1]} : vector<2x4x3x3x64xbf16> to vector<2x1x2x2x64xbf16>
    %18 = vector.shape_cast %17 : vector<2x1x2x2x64xbf16> to vector<2x2x2x64xbf16>
    %19 = vector.shape_cast %18 : vector<2x2x2x64xbf16> to vector<8x64xbf16>
    %20 = vector.extract_strided_slice %0 {offsets = [0, 0, 1, 0, 0], sizes = [2, 1, 2, 2, 64], strides = [1, 1, 1, 1, 1]} : vector<2x4x3x3x64xbf16> to vector<2x1x2x2x64xbf16>
    %21 = vector.shape_cast %20 : vector<2x1x2x2x64xbf16> to vector<2x2x2x64xbf16>
    %22 = vector.shape_cast %21 : vector<2x2x2x64xbf16> to vector<8x64xbf16>
    %23 = vector.extract_strided_slice %0 {offsets = [0, 1, 1, 0, 0], sizes = [2, 1, 2, 2, 64], strides = [1, 1, 1, 1, 1]} : vector<2x4x3x3x64xbf16> to vector<2x1x2x2x64xbf16>
    %24 = vector.shape_cast %23 : vector<2x1x2x2x64xbf16> to vector<2x2x2x64xbf16>
    %25 = vector.shape_cast %24 : vector<2x2x2x64xbf16> to vector<8x64xbf16>
    %26 = vector.extract_strided_slice %0 {offsets = [0, 0, 1, 1, 0], sizes = [2, 1, 2, 2, 64], strides = [1, 1, 1, 1, 1]} : vector<2x4x3x3x64xbf16> to vector<2x1x2x2x64xbf16>
    %27 = vector.shape_cast %26 : vector<2x1x2x2x64xbf16> to vector<2x2x2x64xbf16>
    %28 = vector.shape_cast %27 : vector<2x2x2x64xbf16> to vector<8x64xbf16>
    %29 = tpu.concatenate %4, %7, %10, %13, %16, %19, %22, %25, %28 in 1 : vector<8x64xbf16>, vector<8x64xbf16>, vector<8x64xbf16>, vector<8x64xbf16>, vector<8x64xbf16>, vector<8x64xbf16>, vector<8x64xbf16>, vector<8x64xbf16>, vector<8x64xbf16> -> vector<8x576xbf16>
    %cst = arith.constant dense<0.000000e+00> : vector<8x128xf32>
    %30 = tpu.matmul %29, %1, %cst {dimension_numbers = #tpu.dot_dimension_numbers<[1], [0], [0], [1], [0, 0, 1, 1], [], []>} : vector<8x576xbf16>, vector<576x128xbf16>, vector<8x128xf32> -> vector<8x128xf32>
    %31 = vector.extract_strided_slice %0 {offsets = [0, 1, 0, 0, 0], sizes = [2, 1, 2, 2, 64], strides = [1, 1, 1, 1, 1]} : vector<2x4x3x3x64xbf16> to vector<2x1x2x2x64xbf16>
    %32 = vector.shape_cast %31 : vector<2x1x2x2x64xbf16> to vector<2x2x2x64xbf16>
    %33 = vector.shape_cast %32 : vector<2x2x2x64xbf16> to vector<8x64xbf16>
    %34 = vector.extract_strided_slice %0 {offsets = [0, 0, 0, 1, 0], sizes = [2, 1, 2, 2, 64], strides = [1, 1, 1, 1, 1]} : vector<2x4x3x3x64xbf16> to vector<2x1x2x2x64xbf16>
    %35 = vector.shape_cast %34 : vector<2x1x2x2x64xbf16> to vector<2x2x2x64xbf16>
    %36 = vector.shape_cast %35 : vector<2x2x2x64xbf16> to vector<8x64xbf16>
    %37 = vector.extract_strided_slice %0 {offsets = [0, 1, 0, 1, 0], sizes = [2, 1, 2, 2, 64], strides = [1, 1, 1, 1, 1]} : vector<2x4x3x3x64xbf16> to vector<2x1x2x2x64xbf16>
    %38 = vector.shape_cast %37 : vector<2x1x2x2x64xbf16> to vector<2x2x2x64xbf16>
    %39 = vector.shape_cast %38 : vector<2x2x2x64xbf16> to vector<8x64xbf16>
    %40 = vector.extract_strided_slice %0 {offsets = [0, 3, 0, 0, 0], sizes = [2, 1, 2, 2, 64], strides = [1, 1, 1, 1, 1]} : vector<2x4x3x3x64xbf16> to vector<2x1x2x2x64xbf16>
    %41 = vector.shape_cast %40 : vector<2x1x2x2x64xbf16> to vector<2x2x2x64xbf16>
    %42 = vector.shape_cast %41 : vector<2x2x2x64xbf16> to vector<8x64xbf16>
    %43 = vector.extract_strided_slice %0 {offsets = [0, 2, 0, 1, 0], sizes = [2, 1, 2, 2, 64], strides = [1, 1, 1, 1, 1]} : vector<2x4x3x3x64xbf16> to vector<2x1x2x2x64xbf16>
    %44 = vector.shape_cast %43 : vector<2x1x2x2x64xbf16> to vector<2x2x2x64xbf16>
    %45 = vector.shape_cast %44 : vector<2x2x2x64xbf16> to vector<8x64xbf16>
    %46 = vector.extract_strided_slice %0 {offsets = [0, 3, 0, 1, 0], sizes = [2, 1, 2, 2, 64], strides = [1, 1, 1, 1, 1]} : vector<2x4x3x3x64xbf16> to vector<2x1x2x2x64xbf16>
    %47 = vector.shape_cast %46 : vector<2x1x2x2x64xbf16> to vector<2x2x2x64xbf16>
    %48 = vector.shape_cast %47 : vector<2x2x2x64xbf16> to vector<8x64xbf16>
    %49 = vector.extract_strided_slice %0 {offsets = [0, 1, 1, 0, 0], sizes = [2, 1, 2, 2, 64], strides = [1, 1, 1, 1, 1]} : vector<2x4x3x3x64xbf16> to vector<2x1x2x2x64xbf16>
    %50 = vector.shape_cast %49 : vector<2x1x2x2x64xbf16> to vector<2x2x2x64xbf16>
    %51 = vector.shape_cast %50 : vector<2x2x2x64xbf16> to vector<8x64xbf16>
    %52 = vector.extract_strided_slice %0 {offsets = [0, 0, 1, 1, 0], sizes = [2, 1, 2, 2, 64], strides = [1, 1, 1, 1, 1]} : vector<2x4x3x3x64xbf16> to vector<2x1x2x2x64xbf16>
    %53 = vector.shape_cast %52 : vector<2x1x2x2x64xbf16> to vector<2x2x2x64xbf16>
    %54 = vector.shape_cast %53 : vector<2x2x2x64xbf16> to vector<8x64xbf16>
    %55 = vector.extract_strided_slice %0 {offsets = [0, 1, 1, 1, 0], sizes = [2, 1, 2, 2, 64], strides = [1, 1, 1, 1, 1]} : vector<2x4x3x3x64xbf16> to vector<2x1x2x2x64xbf16>
    %56 = vector.shape_cast %55 : vector<2x1x2x2x64xbf16> to vector<2x2x2x64xbf16>
    %57 = vector.shape_cast %56 : vector<2x2x2x64xbf16> to vector<8x64xbf16>
    %58 = tpu.concatenate %33, %36, %39, %42, %45, %48, %51, %54, %57 in 1 : vector<8x64xbf16>, vector<8x64xbf16>, vector<8x64xbf16>, vector<8x64xbf16>, vector<8x64xbf16>, vector<8x64xbf16>, vector<8x64xbf16>, vector<8x64xbf16>, vector<8x64xbf16> -> vector<8x576xbf16>
    %cst_6 = arith.constant dense<0.000000e+00> : vector<8x128xf32>
    %59 = tpu.matmul %58, %1, %cst_6 {dimension_numbers = #tpu.dot_dimension_numbers<[1], [0], [0], [1], [0, 0, 1, 1], [], []>} : vector<8x576xbf16>, vector<576x128xbf16>, vector<8x128xf32> -> vector<8x128xf32>
    %60 = arith.maximumf %30, %59 : vector<8x128xf32>
    %61 = vector.extract_strided_slice %0 {offsets = [0, 2, 0, 0, 0], sizes = [2, 1, 2, 2, 64], strides = [1, 1, 1, 1, 1]} : vector<2x4x3x3x64xbf16> to vector<2x1x2x2x64xbf16>
    %62 = vector.shape_cast %61 : vector<2x1x2x2x64xbf16> to vector<2x2x2x64xbf16>
    %63 = vector.shape_cast %62 : vector<2x2x2x64xbf16> to vector<8x64xbf16>
    %64 = vector.extract_strided_slice %0 {offsets = [0, 3, 0, 0, 0], sizes = [2, 1, 2, 2, 64], strides = [1, 1, 1, 1, 1]} : vector<2x4x3x3x64xbf16> to vector<2x1x2x2x64xbf16>
    %65 = vector.shape_cast %64 : vector<2x1x2x2x64xbf16> to vector<2x2x2x64xbf16>
    %66 = vector.shape_cast %65 : vector<2x2x2x64xbf16> to vector<8x64xbf16>
    %67 = vector.extract_strided_slice %0 {offsets = [0, 2, 0, 1, 0], sizes = [2, 1, 2, 2, 64], strides = [1, 1, 1, 1, 1]} : vector<2x4x3x3x64xbf16> to vector<2x1x2x2x64xbf16>
    %68 = vector.shape_cast %67 : vector<2x1x2x2x64xbf16> to vector<2x2x2x64xbf16>
    %69 = vector.shape_cast %68 : vector<2x2x2x64xbf16> to vector<8x64xbf16>
    %70 = vector.extract_strided_slice %0 {offsets = [0, 0, 1, 0, 0], sizes = [2, 1, 2, 2, 64], strides = [1, 1, 1, 1, 1]} : vector<2x4x3x3x64xbf16> to vector<2x1x2x2x64xbf16>
    %71 = vector.shape_cast %70 : vector<2x1x2x2x64xbf16> to vector<2x2x2x64xbf16>
    %72 = vector.shape_cast %71 : vector<2x2x2x64xbf16> to vector<8x64xbf16>
    %73 = vector.extract_strided_slice %0 {offsets = [0, 1, 1, 0, 0], sizes = [2, 1, 2, 2, 64], strides = [1, 1, 1, 1, 1]} : vector<2x4x3x3x64xbf16> to vector<2x1x2x2x64xbf16>
    %74 = vector.shape_cast %73 : vector<2x1x2x2x64xbf16> to vector<2x2x2x64xbf16>
    %75 = vector.shape_cast %74 : vector<2x2x2x64xbf16> to vector<8x64xbf16>
    %76 = vector.extract_strided_slice %0 {offsets = [0, 0, 1, 1, 0], sizes = [2, 1, 2, 2, 64], strides = [1, 1, 1, 1, 1]} : vector<2x4x3x3x64xbf16> to vector<2x1x2x2x64xbf16>
    %77 = vector.shape_cast %76 : vector<2x1x2x2x64xbf16> to vector<2x2x2x64xbf16>
    %78 = vector.shape_cast %77 : vector<2x2x2x64xbf16> to vector<8x64xbf16>
    %79 = vector.extract_strided_slice %0 {offsets = [0, 2, 1, 0, 0], sizes = [2, 1, 2, 2, 64], strides = [1, 1, 1, 1, 1]} : vector<2x4x3x3x64xbf16> to vector<2x1x2x2x64xbf16>
    %80 = vector.shape_cast %79 : vector<2x1x2x2x64xbf16> to vector<2x2x2x64xbf16>
    %81 = vector.shape_cast %80 : vector<2x2x2x64xbf16> to vector<8x64xbf16>
    %82 = vector.extract_strided_slice %0 {offsets = [0, 3, 1, 0, 0], sizes = [2, 1, 2, 2, 64], strides = [1, 1, 1, 1, 1]} : vector<2x4x3x3x64xbf16> to vector<2x1x2x2x64xbf16>
    %83 = vector.shape_cast %82 : vector<2x1x2x2x64xbf16> to vector<2x2x2x64xbf16>
    %84 = vector.shape_cast %83 : vector<2x2x2x64xbf16> to vector<8x64xbf16>
    %85 = vector.extract_strided_slice %0 {offsets = [0, 2, 1, 1, 0], sizes = [2, 1, 2, 2, 64], strides = [1, 1, 1, 1, 1]} : vector<2x4x3x3x64xbf16> to vector<2x1x2x2x64xbf16>
    %86 = vector.shape_cast %85 : vector<2x1x2x2x64xbf16> to vector<2x2x2x64xbf16>
    %87 = vector.shape_cast %86 : vector<2x2x2x64xbf16> to vector<8x64xbf16>
    %88 = tpu.concatenate %63, %66, %69, %72, %75, %78, %81, %84, %87 in 1 : vector<8x64xbf16>, vector<8x64xbf16>, vector<8x64xbf16>, vector<8x64xbf16>, vector<8x64xbf16>, vector<8x64xbf16>, vector<8x64xbf16>, vector<8x64xbf16>, vector<8x64xbf16> -> vector<8x576xbf16>
    %cst_7 = arith.constant dense<0.000000e+00> : vector<8x128xf32>
    %89 = tpu.matmul %88, %1, %cst_7 {dimension_numbers = #tpu.dot_dimension_numbers<[1], [0], [0], [1], [0, 0, 1, 1], [], []>} : vector<8x576xbf16>, vector<576x128xbf16>, vector<8x128xf32> -> vector<8x128xf32>
    %90 = arith.maximumf %60, %89 : vector<8x128xf32>
    %91 = vector.extract_strided_slice %0 {offsets = [0, 3, 0, 0, 0], sizes = [2, 1, 2, 2, 64], strides = [1, 1, 1, 1, 1]} : vector<2x4x3x3x64xbf16> to vector<2x1x2x2x64xbf16>
    %92 = vector.shape_cast %91 : vector<2x1x2x2x64xbf16> to vector<2x2x2x64xbf16>
    %93 = vector.shape_cast %92 : vector<2x2x2x64xbf16> to vector<8x64xbf16>
    %94 = vector.extract_strided_slice %0 {offsets = [0, 2, 0, 1, 0], sizes = [2, 1, 2, 2, 64], strides = [1, 1, 1, 1, 1]} : vector<2x4x3x3x64xbf16> to vector<2x1x2x2x64xbf16>
    %95 = vector.shape_cast %94 : vector<2x1x2x2x64xbf16> to vector<2x2x2x64xbf16>
    %96 = vector.shape_cast %95 : vector<2x2x2x64xbf16> to vector<8x64xbf16>
    %97 = vector.extract_strided_slice %0 {offsets = [0, 3, 0, 1, 0], sizes = [2, 1, 2, 2, 64], strides = [1, 1, 1, 1, 1]} : vector<2x4x3x3x64xbf16> to vector<2x1x2x2x64xbf16>
    %98 = vector.shape_cast %97 : vector<2x1x2x2x64xbf16> to vector<2x2x2x64xbf16>
    %99 = vector.shape_cast %98 : vector<2x2x2x64xbf16> to vector<8x64xbf16>
    %100 = vector.extract_strided_slice %0 {offsets = [0, 1, 1, 0, 0], sizes = [2, 1, 2, 2, 64], strides = [1, 1, 1, 1, 1]} : vector<2x4x3x3x64xbf16> to vector<2x1x2x2x64xbf16>
    %101 = vector.shape_cast %100 : vector<2x1x2x2x64xbf16> to vector<2x2x2x64xbf16>
    %102 = vector.shape_cast %101 : vector<2x2x2x64xbf16> to vector<8x64xbf16>
    %103 = vector.extract_strided_slice %0 {offsets = [0, 0, 1, 1, 0], sizes = [2, 1, 2, 2, 64], strides = [1, 1, 1, 1, 1]} : vector<2x4x3x3x64xbf16> to vector<2x1x2x2x64xbf16>
    %104 = vector.shape_cast %103 : vector<2x1x2x2x64xbf16> to vector<2x2x2x64xbf16>
    %105 = vector.shape_cast %104 : vector<2x2x2x64xbf16> to vector<8x64xbf16>
    %106 = vector.extract_strided_slice %0 {offsets = [0, 1, 1, 1, 0], sizes = [2, 1, 2, 2, 64], strides = [1, 1, 1, 1, 1]} : vector<2x4x3x3x64xbf16> to vector<2x1x2x2x64xbf16>
    %107 = vector.shape_cast %106 : vector<2x1x2x2x64xbf16> to vector<2x2x2x64xbf16>
    %108 = vector.shape_cast %107 : vector<2x2x2x64xbf16> to vector<8x64xbf16>
    %109 = vector.extract_strided_slice %0 {offsets = [0, 3, 1, 0, 0], sizes = [2, 1, 2, 2, 64], strides = [1, 1, 1, 1, 1]} : vector<2x4x3x3x64xbf16> to vector<2x1x2x2x64xbf16>
    %110 = vector.shape_cast %109 : vector<2x1x2x2x64xbf16> to vector<2x2x2x64xbf16>
    %111 = vector.shape_cast %110 : vector<2x2x2x64xbf16> to vector<8x64xbf16>
    %112 = vector.extract_strided_slice %0 {offsets = [0, 2, 1, 1, 0], sizes = [2, 1, 2, 2, 64], strides = [1, 1, 1, 1, 1]} : vector<2x4x3x3x64xbf16> to vector<2x1x2x2x64xbf16>
    %113 = vector.shape_cast %112 : vector<2x1x2x2x64xbf16> to vector<2x2x2x64xbf16>
    %114 = vector.shape_cast %113 : vector<2x2x2x64xbf16> to vector<8x64xbf16>
    %115 = vector.extract_strided_slice %0 {offsets = [0, 3, 1, 1, 0], sizes = [2, 1, 2, 2, 64], strides = [1, 1, 1, 1, 1]} : vector<2x4x3x3x64xbf16> to vector<2x1x2x2x64xbf16>
    %116 = vector.shape_cast %115 : vector<2x1x2x2x64xbf16> to vector<2x2x2x64xbf16>
    %117 = vector.shape_cast %116 : vector<2x2x2x64xbf16> to vector<8x64xbf16>
    %118 = tpu.concatenate %93, %96, %99, %102, %105, %108, %111, %114, %117 in 1 : vector<8x64xbf16>, vector<8x64xbf16>, vector<8x64xbf16>, vector<8x64xbf16>, vector<8x64xbf16>, vector<8x64xbf16>, vector<8x64xbf16>, vector<8x64xbf16>, vector<8x64xbf16> -> vector<8x576xbf16>
    %cst_8 = arith.constant dense<0.000000e+00> : vector<8x128xf32>
    %119 = tpu.matmul %118, %1, %cst_8 {dimension_numbers = #tpu.dot_dimension_numbers<[1], [0], [0], [1], [0, 0, 1, 1], [], []>} : vector<8x576xbf16>, vector<576x128xbf16>, vector<8x128xf32> -> vector<8x128xf32>
    %120 = arith.maximumf %90, %119 : vector<8x128xf32>
    %c0_9 = arith.constant 0 : index
    %c0_10 = arith.constant 0 : index
    %121 = vector.load %arg3[%c0_9, %c0_10] : memref<1x128xf32, #tpu.memory_space<vmem>>, vector<1x128xf32>
    %122 = vector.broadcast %121 : vector<1x128xf32> to vector<8x128xf32>
    %123 = arith.addf %120, %122 : vector<8x128xf32>
    %cst_11 = arith.constant 0.000000e+00 : f32
    %124 = vector.broadcast %cst_11 : f32 to vector<8x128xf32>
    %125 = arith.maximumf %123, %124 : vector<8x128xf32>
    %126 = arith.truncf %125 : vector<8x128xf32> to vector<8x128xbf16>
    %c0_12 = arith.constant 0 : index
    %c0_13 = arith.constant 0 : index
    %127 = vector.load %arg4[%c0_12, %c0_13] : memref<8x128xbf16, #tpu.memory_space<vmem>>, vector<8x128xbf16>
    tpu.vector_store %arg4[%c0_12, %c0_13], %126 {strides = array<i32>} : memref<8x128xbf16, #tpu.memory_space<vmem>>, vector<8x128xbf16>,
    %cst_14 = arith.constant dense<0.000000e+00> : vector<128xf32>
    %128 = vector.multi_reduction <add>, %125, %cst_14 [0] : vector<8x128xf32> to vector<128xf32>
    %129 = vector.shape_cast %128 : vector<128xf32> to vector<1x128xf32>
    %130 = vector.shape_cast %129 : vector<1x128xf32> to vector<1x1x128xf32>
    %c0_15 = arith.constant 0 : index
    %c0_16 = arith.constant 0 : index
    %c0_17 = arith.constant 0 : index
    %131 = vector.load %arg5[%c0_15, %c0_16, %c0_17] : memref<1x1x128xf32, #tpu.memory_space<vmem>>, vector<1x1x128xf32>
    tpu.vector_store %arg5[%c0_15, %c0_16, %c0_17], %130 {strides = array<i32>} : memref<1x1x128xf32, #tpu.memory_space<vmem>>, vector<1x1x128xf32>,
    %132 = arith.mulf %125, %125 : vector<8x128xf32>
    %cst_18 = arith.constant dense<0.000000e+00> : vector<128xf32>
    %133 = vector.multi_reduction <add>, %132, %cst_18 [0] : vector<8x128xf32> to vector<128xf32>
    %134 = vector.shape_cast %133 : vector<128xf32> to vector<1x128xf32>
    %135 = vector.shape_cast %134 : vector<1x128xf32> to vector<1x1x128xf32>
    %c0_19 = arith.constant 0 : index
    %c0_20 = arith.constant 0 : index
    %c0_21 = arith.constant 0 : index
    %136 = vector.load %arg6[%c0_19, %c0_20, %c0_21] : memref<1x1x128xf32, #tpu.memory_space<vmem>>, vector<1x1x128xf32>
    tpu.vector_store %arg6[%c0_19, %c0_20, %c0_21], %135 {strides = array<i32>} : memref<1x1x128xf32, #tpu.memory_space<vmem>>, vector<1x1x128xf32>,
    return
  }
  func.func @transform_0(%arg0: i32) -> (i32, i32, i32, i32, i32) {
    %c0_i32 = arith.constant 0 : i32
    %c0_i32_0 = arith.constant 0 : i32
    %c0_i32_1 = arith.constant 0 : i32
    %c0_i32_2 = arith.constant 0 : i32
    %c0_i32_3 = arith.constant 0 : i32
    return %arg0, %c0_i32, %c0_i32_0, %c0_i32_1, %c0_i32_2 : i32, i32, i32, i32, i32
  }
  func.func @transform_1(%arg0: i32) -> (i32, i32) {
    %c0_i32 = arith.constant 0 : i32
    %c0_i32_0 = arith.constant 0 : i32
    %c0_i32_1 = arith.constant 0 : i32
    return %c0_i32, %c0_i32_0 : i32, i32
  }
  func.func @transform_2(%arg0: i32) -> (i32, i32) {
    %c0_i32 = arith.constant 0 : i32
    %c0_i32_0 = arith.constant 0 : i32
    %c0_i32_1 = arith.constant 0 : i32
    return %c0_i32, %c0_i32_0 : i32, i32
  }
  func.func @transform_3(%arg0: i32) -> (i32, i32) {
    %c0_i32 = arith.constant 0 : i32
    %c0_i32_0 = arith.constant 0 : i32
    return %arg0, %c0_i32 : i32, i32
  }
  func.func @transform_4(%arg0: i32) -> (i32, i32, i32) {
    %c0_i32 = arith.constant 0 : i32
    %c0_i32_0 = arith.constant 0 : i32
    %c0_i32_1 = arith.constant 0 : i32
    return %arg0, %c0_i32, %c0_i32_0 : i32, i32, i32
  }
  func.func @transform_5(%arg0: i32) -> (i32, i32, i32) {
    %c0_i32 = arith.constant 0 : i32
    %c0_i32_0 = arith.constant 0 : i32
    %c0_i32_1 = arith.constant 0 : i32
    return %arg0, %c0_i32, %c0_i32_0 : i32, i32, i32
  }
}

module attributes {stable_mosaic.version = 11 : i64} {
  func.func @bn_apply_kernel(%arg0: i32, %arg1: memref<8x128xbf16, #tpu.memory_space<vmem>>, %arg2: memref<1x128xf32, #tpu.memory_space<vmem>>, %arg3: memref<1x128xf32, #tpu.memory_space<vmem>>, %arg4: memref<8x128xf32, #tpu.memory_space<vmem>>) attributes {dimension_semantics = [#tpu.dimension_semantics<parallel>], iteration_bounds = array<i64: 1>, scalar_prefetch = 0 : i64, scratch_operands = 0 : i64, tpu.core_type = #tpu.core_type<tc>, window_params = [{transform_indices = @transform_0, window_bounds = array<i64: 8, 128>}, {pipeline_mode = #tpu.pipeline_mode<synchronous>, transform_indices = @transform_1, window_bounds = array<i64: 1, 128>}, {pipeline_mode = #tpu.pipeline_mode<synchronous>, transform_indices = @transform_2, window_bounds = array<i64: 1, 128>}, {transform_indices = @transform_3, window_bounds = array<i64: 8, 128>}]} {
    %c0 = arith.constant 0 : index
    %c0_0 = arith.constant 0 : index
    %0 = vector.load %arg1[%c0, %c0_0] : memref<8x128xbf16, #tpu.memory_space<vmem>>, vector<8x128xbf16>
    %1 = arith.extf %0 : vector<8x128xbf16> to vector<8x128xf32>
    %c0_1 = arith.constant 0 : index
    %c0_2 = arith.constant 0 : index
    %2 = vector.load %arg2[%c0_1, %c0_2] : memref<1x128xf32, #tpu.memory_space<vmem>>, vector<1x128xf32>
    %3 = vector.broadcast %2 : vector<1x128xf32> to vector<8x128xf32>
    %4 = arith.mulf %1, %3 : vector<8x128xf32>
    %c0_3 = arith.constant 0 : index
    %c0_4 = arith.constant 0 : index
    %5 = vector.load %arg3[%c0_3, %c0_4] : memref<1x128xf32, #tpu.memory_space<vmem>>, vector<1x128xf32>
    %6 = vector.broadcast %5 : vector<1x128xf32> to vector<8x128xf32>
    %7 = arith.addf %4, %6 : vector<8x128xf32>
    %c0_5 = arith.constant 0 : index
    %c0_6 = arith.constant 0 : index
    %8 = vector.load %arg4[%c0_5, %c0_6] : memref<8x128xf32, #tpu.memory_space<vmem>>, vector<8x128xf32>
    tpu.vector_store %arg4[%c0_5, %c0_6], %7 {strides = array<i32>} : memref<8x128xf32, #tpu.memory_space<vmem>>, vector<8x128xf32>,
    return
  }
  func.func @transform_0(%arg0: i32) -> (i32, i32) {
    %c0_i32 = arith.constant 0 : i32
    %c0_i32_0 = arith.constant 0 : i32
    return %arg0, %c0_i32 : i32, i32
  }
  func.func @transform_1(%arg0: i32) -> (i32, i32) {
    %c0_i32 = arith.constant 0 : i32
    %c0_i32_0 = arith.constant 0 : i32
    %c0_i32_1 = arith.constant 0 : i32
    return %c0_i32, %c0_i32_0 : i32, i32
  }
  func.func @transform_2(%arg0: i32) -> (i32, i32) {
    %c0_i32 = arith.constant 0 : i32
    %c0_i32_0 = arith.constant 0 : i32
    %c0_i32_1 = arith.constant 0 : i32
    return %c0_i32, %c0_i32_0 : i32, i32
  }
  func.func @transform_3(%arg0: i32) -> (i32, i32) {
    %c0_i32 = arith.constant 0 : i32
    %c0_i32_0 = arith.constant 0 : i32
    return %arg0, %c0_i32 : i32, i32
  }
}

</mosaic_0001>

<bundles_post_ra>
// kernel: cnn_extractor_2d.7
= control target key start
LH: loop header
LB: loop body
LE: loop exit
PB: predicated region body
PF: predicated region fallthrough
CT: control target
= control target key end

     0   :  { %vm156_vm0 = vcmask 257024   ;;  %s400_s0 = inlined_call_operand.vmem [shape: bf16[128,128], index: 0, kind: input, shape index: {}]   ;;  %s401_s1 = inlined_call_operand.vmem [shape: f32[1,32], index: 1, kind: input, shape index: {}]   ;;  %s402_s2 = inlined_call_operand.vmem [shape: f32[1,32], index: 2, kind: input, shape index: {}]   ;;  %s403_s3 = inlined_call_operand.vmem [shape: bf16[128,32], index: 3, kind: output, shape index: {}]  }
   0x1   :  { %v212_v0 = vld [vmem:[%s400_s0] sm:$0xff]   ;;  %v243_v4 = vld [vmem:[%s400_s0 + $0x8] sm:$0xff]   ;;  %v244_v5 = vld [vmem:[%s400_s0 + $0x10] sm:$0xff]  }
   0x2   :  { %v276_v1 = vld [vmem:[%s401_s1] ss:$0 sm:$0xff]  ;;  %v213_v2 = vunpack.c.l.bf16 %v212_v0  ;;  %v214_v3 = vunpack.c.h.bf16 %v212_v0  ;;  %v245_v6 = vld [vmem:[%s400_s0 + $0x18] sm:$0xff]   ;;  %v217_v8 = vunpack.c.l.bf16 %v243_v4  ;;  %v218_v9 = vunpack.c.h.bf16 %v243_v4  ;;  %v247_v33 = vld [vmem:[%s400_s0 + $0x28] sm:$0xff]  }
   0x3   :  { %v290_v7 = vld [vmem:[%s402_s2] ss:$0 sm:$0xff]  ;;  %v221_v10 = vunpack.c.l.bf16 %v244_v5  ;;  %v222_v11 = vunpack.c.h.bf16 %v244_v5  ;;  %v225_v14 = vunpack.c.l.bf16 %v245_v6  ;;  %v226_v15 = vunpack.c.h.bf16 %v245_v6  ;;  %v248_v34 = vld [vmem:[%s400_s0 + $0x30] sm:$0xff]   ;;  %v249_v39 = vld [vmem:[%s400_s0 + $0x38] sm:$0xff]  }
   0x4   :  { %v53_v12 = vmul.f32 %v213_v2, %v276_v1  ;;  %v54_v13 = vmul.f32 %v214_v3, %v276_v1  ;;  %v55_v16 = vmul.f32 %v217_v8, %v276_v1  ;;  %v56_v17 = vmul.f32 %v218_v9, %v276_v1  ;;  %v246_v28 = vld [vmem:[%s400_s0 + $0x20] sm:$0xff]  }
   0x5   :  { %v57_v18 = vmul.f32 %v221_v10, %v276_v1  ;;  %v58_v19 = vmul.f32 %v222_v11, %v276_v1  ;;  %v59_v22 = vmul.f32 %v225_v14, %v276_v1  ;;  %v60_v23 = vmul.f32 %v226_v15, %v276_v1 }
   0x6   :  { %v76_v20 = vadd.f32 %v290_v7, %v53_v12  ;;  %v77_v21 = vadd.f32 %v290_v7, %v54_v13  ;;  %v78_v24 = vadd.f32 %v290_v7, %v55_v16  ;;  %v79_v25 = vadd.f32 %v290_v7, %v56_v17 }
   0x7   :  { %v80_v26 = vadd.f32 %v290_v7, %v57_v18  ;;  %v81_v27 = vadd.f32 %v290_v7, %v58_v19  ;;  %v82_v31 = vadd.f32 %v290_v7, %v59_v22  ;;  %v83_v32 = vadd.f32 %v290_v7, %v60_v23 }
   0x8   :  { %v195_v29 = vpack.c.bf16 %v76_v20, %v76_v20  ;;  %v196_v30 = vpack.c.bf16 %v77_v21, %v77_v21  ;;  %v197_v35 = vpack.c.bf16 %v78_v24, %v78_v24  ;;  %v198_v36 = vpack.c.bf16 %v79_v25, %v79_v25 }
   0x9   :  { %v199_v37 = vpack.c.bf16 %v80_v26, %v80_v26  ;;  %v200_v38 = vpack.c.bf16 %v81_v27, %v81_v27  ;;  %v201_v40 = vpack.c.bf16 %v82_v31, %v82_v31  ;;  %v202_v41 = vpack.c.bf16 %v83_v32, %v83_v32 }
   0xa   :  { %157 = vst.msk [vmem:[%s403_s3] sm:$0xf] %vm156_vm0, %v195_v29  ;;  %158 = vst.msk [vmem:[%s403_s3 + $0x4] sm:$0xf] %vm156_vm0, %v196_v30  ;;  %v229_v42 = vunpack.c.l.bf16 %v246_v28  ;;  %v230_v43 = vunpack.c.h.bf16 %v246_v28  ;;  %v233_v44 = vunpack.c.l.bf16 %v247_v33  ;;  %v234_v45 = vunpack.c.h.bf16 %v247_v33 }
   0xb   :  { %159 = vst.msk [vmem:[%s403_s3 + $0x8] sm:$0xf] %vm156_vm0, %v197_v35  ;;  %160 = vst.msk [vmem:[%s403_s3 + $0xc] sm:$0xf] %vm156_vm0, %v198_v36  ;;  %v237_v46 = vunpack.c.l.bf16 %v248_v34  ;;  %v238_v47 = vunpack.c.h.bf16 %v248_v34  ;;  %v241_v50 = vunpack.c.l.bf16 %v249_v39  ;;  %v242_v51 = vunpack.c.h.bf16 %v249_v39 }
   0xc   :  { %161 = vst.msk [vmem:[%s403_s3 + $0x10] sm:$0xf] %vm156_vm0, %v199_v37  ;;  %162 = vst.msk [vmem:[%s403_s3 + $0x14] sm:$0xf] %vm156_vm0, %v200_v38  ;;  %v61_v48 = vmul.f32 %v229_v42, %v276_v1  ;;  %v62_v49 = vmul.f32 %v230_v43, %v276_v1  ;;  %v63_v52 = vmul.f32 %v233_v44, %v276_v1 }
   0xd   :  { %163 = vst.msk [vmem:[%s403_s3 + $0x18] sm:$0xf] %vm156_vm0, %v201_v40  ;;  %164 = vst.msk [vmem:[%s403_s3 + $0x1c] sm:$0xf] %vm156_vm0, %v202_v41  ;;  %v64_v53 = vmul.f32 %v234_v45, %v276_v1  ;;  %v65_v54 = vmul.f32 %v237_v46, %v276_v1  ;;  %v66_v55 = vmul.f32 %v238_v47, %v276_v1 }
   0xe   :  { %v84_v56 = vadd.f32 %v290_v7, %v61_v48  ;;  %v85_v57 = vadd.f32 %v290_v7, %v62_v49  ;;  %v67_v58 = vmul.f32 %v241_v50, %v276_v1  ;;  %v68_v59 = vmul.f32 %v242_v51, %v276_v1 }
   0xf   :  { %v86_v60 = vadd.f32 %v290_v7, %v63_v52  ;;  %v87_v61 = vadd.f32 %v290_v7, %v64_v53  ;;  %v88_v62 = vadd.f32 %v290_v7, %v65_v54  ;;  %v89_v63 = vadd.f32 %v290_v7, %v66_v55 }
  0x10   :  { %v203_v0 = vpack.c.bf16 %v84_v56, %v84_v56  ;;  %v204_v2 = vpack.c.bf16 %v85_v57, %v85_v57  ;;  %v90_v3 = vadd.f32 %v290_v7, %v67_v58  ;;  %v91_v4 = vadd.f32 %v290_v7, %v68_v59 }
  0x11   :  { %v205_v5 = vpack.c.bf16 %v86_v60, %v86_v60  ;;  %v206_v6 = vpack.c.bf16 %v87_v61, %v87_v61  ;;  %v207_v8 = vpack.c.bf16 %v88_v62, %v88_v62  ;;  %v208_v9 = vpack.c.bf16 %v89_v63, %v89_v63 }
  0x12   :  { %165 = vst.msk [vmem:[%s403_s3 + $0x20] sm:$0xf] %vm156_vm0, %v203_v0  ;;  %166 = vst.msk [vmem:[%s403_s3 + $0x24] sm:$0xf] %vm156_vm0, %v204_v2  ;;  %v209_v1 = vpack.c.bf16 %v90_v3, %v90_v3  ;;  %v210_v10 = vpack.c.bf16 %v91_v4, %v91_v4 }
  0x13   :  { %167 = vst.msk [vmem:[%s403_s3 + $0x28] sm:$0xf] %vm156_vm0, %v205_v5  ;;  %168 = vst.msk [vmem:[%s403_s3 + $0x2c] sm:$0xf] %vm156_vm0, %v206_v6 }
  0x14   :  { %169 = vst.msk [vmem:[%s403_s3 + $0x30] sm:$0xf] %vm156_vm0, %v207_v8  ;;  %170 = vst.msk [vmem:[%s403_s3 + $0x34] sm:$0xf] %vm156_vm0, %v208_v9 }
  0x15   :  { %171 = vst.msk [vmem:[%s403_s3 + $0x38] sm:$0xf] %vm156_vm0, %v209_v1  ;;  %172 = vst.msk [vmem:[%s403_s3 + $0x3c] sm:$0xf] %vm156_vm0, %v210_v10 }

// kernel: cnn_extractor_2d.9
= control target key start
LH: loop header
LB: loop body
LE: loop exit
PB: predicated region body
PF: predicated region fallthrough
CT: control target
= control target key end

     0   :  { %vm60_vm0 = vcmask 519168   ;;  %s132_s0 = inlined_call_operand.vmem [shape: bf16[32,128], index: 0, kind: input, shape index: {}]   ;;  %s133_s1 = inlined_call_operand.vmem [shape: f32[1,64], index: 1, kind: input, shape index: {}]   ;;  %s134_s2 = inlined_call_operand.vmem [shape: f32[1,64], index: 2, kind: input, shape index: {}]   ;;  %s135_s3 = inlined_call_operand.vmem [shape: bf16[32,64], index: 3, kind: output, shape index: {}]  }
   0x1   :  { %v80_v0 = vld [vmem:[%s132_s0] sm:$0xff]   ;;  %v87_v4 = vld [vmem:[%s132_s0 + $0x8] sm:$0xff]  }
   0x2   :  { %v69_v1 = vld [vmem:[%s133_s1] ss:$0 sm:$0xff]  ;;  %v81_v2 = vunpack.c.l.bf16 %v80_v0  ;;  %v82_v3 = vunpack.c.h.bf16 %v80_v0  ;;  %v85_v6 = vunpack.c.l.bf16 %v87_v4  ;;  %v86_v7 = vunpack.c.h.bf16 %v87_v4 }
   0x3   :  { %v70_v5 = vld [vmem:[%s134_s2] ss:$0 sm:$0xff] }
   0x4   :  { %v29_v8 = vmul.f32 %v81_v2, %v69_v1  ;;  %v30_v9 = vmul.f32 %v82_v3, %v69_v1  ;;  %v31_v10 = vmul.f32 %v85_v6, %v69_v1  ;;  %v32_v11 = vmul.f32 %v86_v7, %v69_v1 }
   0x6   :  { %v40_v12 = vadd.f32 %v70_v5, %v29_v8  ;;  %v41_v13 = vadd.f32 %v70_v5, %v30_v9  ;;  %v42_v14 = vadd.f32 %v70_v5, %v31_v10  ;;  %v43_v15 = vadd.f32 %v70_v5, %v32_v11 }
   0x8   :  { %v75_v16 = vpack.c.bf16 %v40_v12, %v40_v12  ;;  %v76_v17 = vpack.c.bf16 %v41_v13, %v41_v13  ;;  %v77_v18 = vpack.c.bf16 %v42_v14, %v42_v14  ;;  %v78_v19 = vpack.c.bf16 %v43_v15, %v43_v15 }
   0xa   :  { %61 = vst.msk [vmem:[%s135_s3] sm:$0xf] %vm60_vm0, %v75_v16  ;;  %62 = vst.msk [vmem:[%s135_s3 + $0x4] sm:$0xf] %vm60_vm0, %v76_v17 }
   0xb   :  { %63 = vst.msk [vmem:[%s135_s3 + $0x8] sm:$0xf] %vm60_vm0, %v77_v18  ;;  %64 = vst.msk [vmem:[%s135_s3 + $0xc] sm:$0xf] %vm60_vm0, %v78_v19 }

// kernel: cnn_extractor_2d.6
= control target key start
LH: loop header
LB: loop body
LE: loop exit
PB: predicated region body
PF: predicated region fallthrough
CT: control target
= control target key end

     0   :  { %s2403_s18 = smov 0   ;;  %s3538_s0 = inlined_call_operand.vmem [shape: bf16[2,4,9,9,4], index: 0, kind: input, shape index: {}]   ;;  %s3539_s1 = inlined_call_operand.vmem [shape: bf16[36,128], index: 1, kind: input, shape index: {}]   ;;  %s3540_s2 = inlined_call_operand.vmem [shape: f32[1,128], index: 2, kind: input, shape index: {}]   ;;  %s3541_s3 = inlined_call_operand.vmem [shape: bf16[128,128], index: 3, kind: output, shape index: {0}]   ;;  %s3542_s4 = inlined_call_operand.vmem [shape: f32[2,1,128], index: 4, kind: output, shape index: {1}]   ;;  %s3543_s5 = inlined_call_operand.vmem [shape: f32[2,1,128], index: 5, kind: output, shape index: {2}]  }
   0x1 LB: > { %s2409_s19 = sadd.s32 4294967295, %s2363_s18   ;;  %p2081_p0 = scmp.ge.s32.totalorder %s2363_s18, 1  ;;  %s2363_s18 = sphi %s2403_s18, %s16_s18  }
   0x2   : > { %p192_p1 = scmp.lt.s32.totalorder %s2363_s18, 3 }
   0x4   : > { %p193_p2 = pnand %p2081_p0, %p192_p1 }
   0x6   : > { %196 = sbr.rel (%p193_p2) target bundleno = 629 (0x275), region = 32 }
   0xb   : > { %p226_p3 = scmp.lt.s32.totalorder %s2409_s19, 1  ;;  %vm321_vm0 = vsmask.f32 3328  ;;  %s2365_s25 = smov 4   ;;  %vm322_vm1 = vsmask.f32 7440 }
   0xc   : > { %s2366_s26 = smov 16   ;;  %s2367_s27 = smov 12   ;;  %vm2499_vm2 = vmor %vm321_vm0, %vm322_vm1  ;;  %v3597_v50 = vmov 0  ;;  %vm847_vm3 = vcmask 1041408   ;;  %vm747_vm4 = vcmask 31744   ;;  %vm760_vm5 = vcmask 64512  }
   0xd   : > { %s2415_s20 = scalar_select %p226_p3, %s2409_s19, 1  ;;  %v3598_v50 = vsel %vm2499_vm2, 4294967295, %v3597_v50  ;;  %vm769_vm6 = vcmask 97280   ;;  %vm778_vm7 = vcmask 130048   ;;  %vm787_vm8 = vcmask 162816  }
   0xe   : > { %3599 = vst [vmem:[#allocation6_spill] sm:$0xff] %v3598_v50  ;;  %s2368_s28 = smov 8   ;;  %s2369_s29 = smov 20   ;;  %vm796_vm9 = vcmask 195584   ;;  %vm805_vm10 = vcmask 228352   ;;  %vm814_vm11 = vcmask 261120  }
   0xf   : > { %s2298_s21 = smul.u32 288, %s2415_s20  ;;  %s2370_s30 = smov 24   ;;  %vm838_vm12 = vcmask 293888  }
  0x10   : > { %s2371_s6 = smov 28   ;;  %s2372_s7 = smov 32  }
  0x11   : > { %s2421_s24 = scalar_lea.vmem %s3538_s0, %s2298_s21  ;;  %s2083_s14 = sshll.u32 %s2409_s19, 3 }
  0x12   : > { %v262_v0 = vld [vmem:[%s2421_s24 + $0x48] sm:$0xf]  ;;  %v2425_v1 = vld [vmem:[%s2421_s24 + $0x50] sm:$0xf]  ;;  %v2428_v2 = vld [vmem:[%s2421_s24 + $0x58] sm:$0xf] }
  0x13   : > { %v2431_v3 = vcombine.low %v262_v0, %v2425_v1  ;;  %v2434_v4 = vld [vmem:[%s2421_s24 + $0x60] sm:$0xf]  ;;  %v917_v5 = vshrl.u32 %v262_v0, 16  ;;  %v2437_v6 = vld [vmem:[%s2421_s24 + $0xd8] sm:$0xf]  ;;  %v920_v7 = vshll.u32 %v262_v0, 16 }
  0x14   : > { %v931_v8 = vshrl.u32 %v2425_v1, 16  ;;  %v2444_v9 = vcombine.low %v2428_v2, %v2434_v4  ;;  %v2447_v10 = vld [vmem:[%s2421_s24 + $0xe0] sm:$0xf]  ;;  %v934_v11 = vshll.u32 %v2425_v1, 16  ;;  %v280_v13 = vld [vmem:[%s2421_s24 + $0x90] sm:$0xf] }
  0x15   : > { %3593 = vst [vmem:[#allocation2_spill] sm:$0xff] %v2431_v3  ;;  %602 = vrot.lane.b32.xlu0 %v2431_v3, %s2365_s25  ;;  %v2452_v12 = vcombine.low %v2437_v6, %v2447_v10  ;;  %v945_v14 = vshrl.u32 %v2428_v2, 16  ;;  %v2457_v15 = vld [vmem:[%s2421_s24 + $0x98] sm:$0xf]  ;;  %v437_v16 = vshrl.u32 %v280_v13, 16  ;;  %v440_v17 = vshll.u32 %v280_v13, 16 }
  0x16   : > { %3594 = vst [vmem:[#allocation3_spill] sm:$0xff] %v2444_v9  ;;  %v2459_v18 = vrot.slane %v917_v5, 4  ;;  %v948_v19 = vshll.u32 %v2428_v2, 16  ;;  %v244_v20 = vld [vmem:[%s2421_s24] sm:$0xf]  ;;  %v922_v22 = vrot.slane %v920_v7, 5  ;;  %v2471_v24 = vcombine.low %v280_v13, %v2457_v15 }
  0x17   : > { %3595 = vst [vmem:[#allocation4_spill] sm:$0xff] %v2452_v12  ;;  %678 = vrot.lane.b32.xlu1 %v2452_v12, %s2366_s26  ;;  %v245_v21 = vld [vmem:[%s2421_s24 + $0x4] sm:$0x1]  ;;  %v2466_v23 = vrot.slane %v931_v8, 4  ;;  %v2474_v25 = vld [vmem:[%s2421_s24 + $0x8] sm:$0xf] }
  0x18   : > { %3596 = vst [vmem:[#allocation5_spill] sm:$0xff] %v2471_v24  ;;  %v325_v26 = vshrl.u32 %v244_v20, 16  ;;  %v2476_v27 = vrot.slane %v934_v11, 5  ;;  %v2478_v28 = vrot.slane %v437_v16, 4  ;;  %v247_v29 = vld [vmem:[%s2421_s24 + $0xc] sm:$0x1]  ;;  %v923_v44 = vor.u32 %v922_v22, %v2459_v18 }
  0x19   : > { %604 = vrot.lane.b32.xlu0 %v2444_v9, %s2365_s25  ;;  %v328_v30 = vshll.u32 %v244_v20, 16  ;;  %v334_v31 = vshll.u32 %v245_v21, 16  ;;  %v442_v32 = vrot.slane %v440_v17, 5  ;;  %v339_v34 = vshrl.u32 %v2474_v25, 16  ;;  %v284_v38 = vld [vmem:[%s2421_s24 + $0xa0] sm:$0xf] }
  0x1a   : > { %v327_v33 = vrot.slane %v325_v26, 4  ;;  %v342_v35 = vshll.u32 %v2474_v25, 16  ;;  %v348_v37 = vshll.u32 %v247_v29, 16  ;;  %v2485_v39 = vld [vmem:[%s2421_s24 + $0xa8] sm:$0xf]  ;;  %v959_v40 = vshrl.u32 %v2434_v4, 16 }
  0x1b   : > { %v330_v36 = vrot.slane %v328_v30, 5  ;;  %v962_v41 = vshll.u32 %v2434_v4, 16  ;;  %v341_v42 = vrot.slane %v339_v34, 4  ;;  %v451_v45 = vshrl.u32 %v2457_v15, 16  ;;  %v2494_v48 = vld [vmem:[%s2421_s24 + $0x10] sm:$0xf] }
  0x1c   : > { %v344_v43 = vrot.slane %v342_v35, 5  ;;  %v336_v47 = vrot.slane %v334_v31, 5  ;;  %v454_v49 = vshll.u32 %v2457_v15, 16  ;;  %v350_v52 = vrot.slane %v348_v37, 5  ;;  %v249_v54 = vld [vmem:[%s2421_s24 + $0x14] sm:$0x1] }
  0x1d   : > { %650 = vrot.lane.b32.xlu0 %v2471_v24, %s2367_s27  ;;  %v331_v46 = vor.u32 %v330_v36, %v327_v33  ;;  %v2504_v53 = vcombine.low %v284_v38, %v2485_v39  ;;  %v2508_v55 = vld [vmem:[%s2421_s24 + $0x18] sm:$0xf]  ;;  %v443_v56 = vor.u32 %v442_v32, %v2478_v28  ;;  %v465_v58 = vshrl.u32 %v284_v38, 16  ;;  %v251_v59 = vld [vmem:[%s2421_s24 + $0x1c] sm:$0x1]  ;;  %p232_p4 = scmp.lt.s32.totalorder %s2083_s14, 15 }
  0x1e   : > { %v345_v51 = vor.u32 %v344_v43, %v341_v42  ;;  %3601 = vst [vmem:[#allocation8_spill] sm:$0xff] %v2508_v55  ;;  %v937_v60 = vor.u32 %v2476_v27, %v2466_v23  ;;  %v468_v62 = vshll.u32 %v284_v38, 16  ;;  %v353_v63 = vshrl.u32 %v2494_v48, 16  ;;  %v263_v18 = vld [vmem:[%s2421_s24 + $0x4c] sm:$0x1] }
  0x1f   : > { %3600 = vst [vmem:[#allocation7_spill] sm:$0xff] %v2504_v53  ;;  %v332_v57 = vrot.slane %v331_v46, 4  ;;  %v356_v0 = vshll.u32 %v2494_v48, 16  ;;  %v362_v7 = vshll.u32 %v249_v54, 16  ;;  %v367_v8 = vshrl.u32 %v2508_v55, 16  ;;  %s3683_s14 = smov (!%p232_p4, %s2083_s14), 15 }
  0x20   : > { %v346_v61 = vrot.slane %v345_v51, 4  ;;  %v370_v11 = vshll.u32 %v2508_v55, 16  ;;  %v355_v15 = vrot.slane %v353_v63, 4  ;;  %v376_v17 = vshll.u32 %v251_v59, 16  ;;  %v265_v30 = vld [vmem:[%s2421_s24 + $0x54] sm:$0x1] }
  0x21   : > { %652 = vrot.lane.b32.xlu0 %v2504_v53, %s2367_s27  ;;  %v337_v5 = vsel %vm2499_vm2, %v332_v57, %v336_v47  ;;  %v358_v16 = vrot.slane %v356_v0, 5  ;;  %v479_v21 = vshrl.u32 %v2485_v39, 16  ;;  %v369_v22 = vrot.slane %v367_v8, 4  ;;  %v267_v46 = vld [vmem:[%s2421_s24 + $0x5c] sm:$0x1]  ;;  %s2084_s17 = sshll.u32 %s3683_s14, 2 }
  0x22   : > { %v2524_v13 = vsel %vm2499_vm2, %v346_v61, %v350_v52  ;;  %v372_v23 = vrot.slane %v370_v11, 5  ;;  %v2531_v26 = vrot.slane %v923_v44, 4  ;;  %v453_v27 = vrot.slane %v451_v45, 4  ;;  %v269_v51 = vld [vmem:[%s2421_s24 + $0x64] sm:$0x1]  ;;  %s3520_s22 = scalar_lea.vmem %s3541_s3, %s2084_s17 }
  0x23   : > { %v2528_v20 = vcombine.low %v337_v5, %v2524_v13  ;;  %v359_v28 = vor.u32 %v358_v16, %v355_v15  ;;  %v364_v29 = vrot.slane %v362_v7, 5  ;;  %v456_v31 = vrot.slane %v454_v49, 5  ;;  %v2557_v57 = vld [vmem:[%s2421_s24 + $0xf0] sm:$0xf]  ;;  %v281_v63 = vld [vmem:[%s2421_s24 + $0x94] sm:$0x1] }
  0x24   : > { %v373_v32 = vor.u32 %v372_v23, %v369_v22  ;;  %v378_v33 = vrot.slane %v376_v17, 5  ;;  %v926_v34 = vshll.u32 %v263_v18, 16  ;;  %v2536_v35 = vrot.slane %v443_v56, 4  ;;  %v2554_v56 = vld [vmem:[%s2421_s24 + $0xe8] sm:$0xf]  ;;  %3603 = vst [vmem:[#allocation10_spill] sm:$0xff] %v2557_v57 }
  0x25   : > { %622 = vrot.lane.b32.xlu1 %v2528_v20, %s2368_s28  ;;  %v467_v36 = vrot.slane %v465_v58, 4  ;;  %v470_v37 = vrot.slane %v468_v62, 5  ;;  %v360_v38 = vrot.slane %v359_v28, 4  ;;  %v481_v42 = vrot.slane %v479_v21, 4  ;;  %3602 = vst [vmem:[#allocation9_spill] sm:$0xff] %v2554_v56 }
  0x26   : > { %v482_v43 = vshll.u32 %v2485_v39, 16  ;;  %v374_v44 = vrot.slane %v373_v32, 4  ;;  %v940_v45 = vshll.u32 %v265_v30, 16  ;;  %v928_v49 = vrot.slane %v926_v34, 5  ;;  %v283_v11 = vld [vmem:[%s2421_s24 + $0x9c] sm:$0x1] }
  0x27   : > { %v2542_v47 = vsel %vm2499_vm2, %v360_v38, %v364_v29  ;;  %v947_v52 = vrot.slane %v945_v14, 4  ;;  %v950_v54 = vrot.slane %v948_v19, 5  ;;  %v938_v58 = vrot.slane %v937_v60, 4  ;;  %v287_v23 = vld [vmem:[%s2421_s24 + $0xac] sm:$0x1] }
  0x28   : > { %v2551_v39 = vsel %vm2499_vm2, %v374_v44, %v378_v33  ;;  %v942_v59 = vrot.slane %v940_v45, 5  ;;  %v954_v14 = vshll.u32 %v267_v46, 16  ;;  %v457_v0 = vor.u32 %v456_v31, %v453_v27 }
  0x29   : > { %v2094_v61 = vcombine.low %v2542_v47, %v2551_v39  ;;  %v951_v62 = vor.u32 %v950_v54, %v947_v52  ;;  %v484_v5 = vrot.slane %v482_v43, 5  ;;  %v961_v19 = vrot.slane %v959_v40, 4  ;;  %v285_v40 = vld [vmem:[%s2421_s24 + $0xa4] sm:$0x1] }
  0x2a   : > { %v964_v7 = vrot.slane %v962_v41, 5  ;;  %v968_v8 = vshll.u32 %v269_v51, 16  ;;  %v2571_v60 = vcombine.low %v2554_v56, %v2557_v57  ;;  %v929_v15 = vsel %vm2499_vm2, %v2531_v26, %v928_v49 }
  0x2b   : > { %624 = vrot.lane.b32.xlu1 %v2094_v61, %s2368_s28  ;;  %1156 = vrot.lane.b32.xlu0 %v2094_v61, %s2365_s25  ;;  %v952_v16 = vrot.slane %v951_v62, 4  ;;  %v956_v17 = vrot.slane %v954_v14, 5  ;;  %v2579_v41 = vsel %vm2499_vm2, %v938_v58, %v942_v59  ;;  %v446_v22 = vshll.u32 %v281_v63, 16 }
  0x2c   : > { %3604 = vst [vmem:[#allocation11_spill] sm:$0xff] %v2571_v60  ;;  %v965_v18 = vor.u32 %v964_v7, %v961_v19  ;;  %v970_v21 = vrot.slane %v968_v8, 5  ;;  %v458_v28 = vrot.slane %v457_v0, 4  ;;  %v460_v29 = vshll.u32 %v283_v11, 16  ;;  %v299_v11 = vld [vmem:[%s2421_s24 + $0xdc] sm:$0x1] }
  0x2d   : > { %v2584_v27 = vsel %vm2499_vm2, %v952_v16, %v956_v17  ;;  %v471_v30 = vor.u32 %v470_v37, %v467_v36  ;;  %v448_v26 = vrot.slane %v446_v22, 5  ;;  %v474_v32 = vshll.u32 %v285_v40, 16  ;;  %v303_v40 = vld [vmem:[%s2421_s24 + $0xec] sm:$0x1] }
  0x2e   : > { %v966_v31 = vrot.slane %v965_v18, 4  ;;  %v485_v33 = vor.u32 %v484_v5, %v481_v42  ;;  %v2128_v34 = vcombine.low %v929_v15, %v2579_v41  ;;  %v462_v38 = vrot.slane %v460_v29, 5  ;;  %v2628_v5 = vld [vmem:[%s2421_s24 + $0x20] sm:$0xf]  ;;  %v301_v15 = vld [vmem:[%s2421_s24 + $0xe4] sm:$0x1] }
  0x2f   : > { %1154 = vrot.lane.b32.xlu1 %v2528_v20, %s2365_s25  ;;  %680 = vrot.lane.b32.xlu0 %v2571_v60, %s2366_s26  ;;  %v472_v43 = vrot.slane %v471_v30, 4  ;;  %v488_v44 = vshll.u32 %v287_v23, 16  ;;  %v449_v36 = vsel %vm2499_vm2, %v2536_v35, %v448_v26  ;;  %v476_v37 = vrot.slane %v474_v32, 5  ;;  %3607 = vst [vmem:[#allocation14_spill] sm:$0xff] %v2628_v5  ;;  %v305_v18 = vld [vmem:[%s2421_s24 + $0xf4] sm:$0x1] }
  0x30   : > { %v2593_v45 = vsel %vm2499_vm2, %v966_v31, %v970_v21  ;;  %v486_v42 = vrot.slane %v485_v33, 4  ;;  %v2602_v46 = vsel %vm2499_vm2, %v458_v28, %v462_v38  ;;  %v1029_v51 = vshrl.u32 %v2437_v6, 16 }
  0x31   : > { %v2129_v20 = vcombine.low %v2584_v27, %v2593_v45  ;;  %v490_v49 = vrot.slane %v488_v44, 5  ;;  %v1032_v52 = vshll.u32 %v2437_v6, 16  ;;  %v2608_v54 = vsel %vm2499_vm2, %v472_v43, %v476_v37  ;;  %v253_v37 = vld [vmem:[%s2421_s24 + $0x24] sm:$0x1] }
  0x32   : > { %v2613_v35 = vcombine.low %v449_v36, %v2602_v46  ;;  %v1043_v59 = vshrl.u32 %v2447_v10, 16  ;;  %v1046_v61 = vshll.u32 %v2447_v10, 16  ;;  %v1057_v62 = vshrl.u32 %v2554_v56, 16  ;;  %v2655_v36 = vld [vmem:[%s2421_s24 + $0x28] sm:$0xf] }
  0x33   : > { %1174 = vrot.lane.b32.xlu1 %v2128_v34, %s2368_s28  ;;  %1176 = vrot.lane.b32.xlu0 %v2129_v20, %s2368_s28  ;;  %v2617_v58 = vsel %vm2499_vm2, %v486_v42, %v490_v49  ;;  %v1060_v14 = vshll.u32 %v2554_v56, 16  ;;  %v1031_v63 = vrot.slane %v1029_v51, 4  ;;  %v1034_v0 = vrot.slane %v1032_v52, 5  ;;  %v2663_v52 = vld [vmem:[%s2421_s24 + $0x68] sm:$0xf] }
  0x34   : > { %3605 = vst [vmem:[#allocation12_spill] sm:$0xff] %v2613_v35  ;;  %v2622_v6 = vcombine.low %v2608_v54, %v2617_v58  ;;  %v1045_v19 = vrot.slane %v1043_v59, 4  ;;  %v1048_v7 = vrot.slane %v1046_v61, 5  ;;  %v1071_v10 = vshrl.u32 %v2557_v57, 16 }
  0x35   : > { %v1074_v8 = vshll.u32 %v2557_v57, 16  ;;  %v1059_v16 = vrot.slane %v1057_v62, 4  ;;  %v1062_v17 = vrot.slane %v1060_v14, 5  ;;  %v381_v23 = vshrl.u32 %v2628_v5, 16 }
  0x36   : > { %3606 = vst [vmem:[#allocation13_spill] sm:$0xff] %v2622_v6  ;;  %v1073_v21 = vrot.slane %v1071_v10, 4  ;;  %v384_v28 = vshll.u32 %v2628_v5, 16  ;;  %v2644_v29 = vcombine.low %v2474_v25, %v2494_v48  ;;  %v2648_v30 = vcombine.low %v2508_v55, %v2628_v5  ;;  %v273_v5 = vld [vmem:[%s2421_s24 + $0x74] sm:$0x1] }
  0x37   : > { %698 = vrot.lane.b32.xlu1 %v2613_v35, %s2369_s29  ;;  %700 = vrot.lane.b32.xlu0 %v2622_v6, %s2369_s29  ;;  %v1076_v22 = vrot.slane %v1074_v8, 5  ;;  %v1035_v31 = vor.u32 %v1034_v0, %v1031_v63  ;;  %v1038_v26 = vshll.u32 %v299_v11, 16  ;;  %v1049_v32 = vor.u32 %v1048_v7, %v1045_v19  ;;  %v2668_v19 = vld [vmem:[%s2421_s24 + $0x30] sm:$0xf]  ;;  %v2675_v8 = vld [vmem:[%s2421_s24 + $0x38] sm:$0xf] }
  0x38   : > { %3608 = vst [vmem:[#allocation15_spill] sm:$0xff] %v2644_v29  ;;  %3609 = vst [vmem:[#allocation16_spill] sm:$0xff] %v2648_v30  ;;  %v1052_v33 = vshll.u32 %v301_v15, 16  ;;  %v1063_v34 = vor.u32 %v1062_v17, %v1059_v16  ;;  %v1066_v38 = vshll.u32 %v303_v40, 16  ;;  %v1080_v25 = vshll.u32 %v305_v18, 16 }
  0x39   : > { %v1077_v43 = vor.u32 %v1076_v22, %v1073_v21  ;;  %v383_v48 = vrot.slane %v381_v23, 4  ;;  %v386_v44 = vrot.slane %v384_v28, 5  ;;  %v1036_v42 = vrot.slane %v1035_v31, 4  ;;  %v255_v28 = vld [vmem:[%s2421_s24 + $0x2c] sm:$0x1] }
  0x3a   : > { %v1040_v20 = vrot.slane %v1038_v26, 5  ;;  %v1050_v49 = vrot.slane %v1049_v32, 4  ;;  %v1054_v51 = vrot.slane %v1052_v33, 5  ;;  %v1064_v59 = vrot.slane %v1063_v34, 4  ;;  %v2716_v34 = vld [vmem:[%s2421_s24 + $0x70] sm:$0xf] }
  0x3b   : > { %1182 = vrot.lane.b32.xlu1 %v2452_v12, %s2367_s27  ;;  %1184 = vrot.lane.b32.xlu0 %v2571_v60, %s2367_s27  ;;  %v1068_v61 = vrot.slane %v1066_v38, 5  ;;  %v1078_v62 = vrot.slane %v1077_v43, 4  ;;  %v1082_v14 = vrot.slane %v1080_v25, 5  ;;  %v395_v63 = vshrl.u32 %v2655_v36, 16 }
  0x3c   : > { %v398_v0 = vshll.u32 %v2655_v36, 16  ;;  %v387_v7 = vor.u32 %v386_v44, %v383_v48  ;;  %v2672_v10 = vcombine.low %v2425_v1, %v2428_v2  ;;  %v390_v11 = vshll.u32 %v253_v37, 16  ;;  %v257_v44 = vld [vmem:[%s2421_s24 + $0x34] sm:$0x1] }
  0x3d   : > { %v2683_v15 = vcombine.low %v2434_v4, %v2663_v52  ;;  %v1041_v16 = vsel %vm2499_vm2, %v1036_v42, %v1040_v20  ;;  %v2689_v1 = vsel %vm2499_vm2, %v1050_v49, %v1054_v51  ;;  %v2693_v2 = vsel %vm2499_vm2, %v1064_v59, %v1068_v61  ;;  %v259_v20 = vld [vmem:[%s2421_s24 + $0x3c] sm:$0x1]  ;;  %v2735_v61 = vld [vmem:[%s2421_s24 + $0x78] sm:$0xf] }
  0x3e   : > { %3610 = vst [vmem:[#allocation17_spill] sm:$0xff] %v2672_v10  ;;  %v2697_v17 = vsel %vm2499_vm2, %v1078_v62, %v1082_v14  ;;  %v409_v40 = vshrl.u32 %v2668_v19, 16  ;;  %v412_v4 = vshll.u32 %v2668_v19, 16  ;;  %v397_v18 = vrot.slane %v395_v63, 4  ;;  %v2738_v63 = vld [vmem:[%s2421_s24 + $0x80] sm:$0xf] }
  0x3f   : > { %712 = vrot.lane.b32.xlu1 %v2644_v29, %s2370_s30  ;;  %714 = vrot.lane.b32.xlu0 %v2648_v30, %s2370_s30  ;;  %3611 = vst [vmem:[#allocation18_spill] sm:$0xff] %v2683_v15  ;;  %v400_v21 = vrot.slane %v398_v0, 5  ;;  %v423_v22 = vshrl.u32 %v2675_v8, 16  ;;  %v426_v23 = vshll.u32 %v2675_v8, 16  ;;  %v2709_v31 = vcombine.low %v1041_v16, %v2689_v1 }
  0x40   : > { %v2713_v26 = vcombine.low %v2693_v2, %v2697_v17  ;;  %v388_v32 = vrot.slane %v387_v7, 4  ;;  %v392_v33 = vrot.slane %v390_v11, 5  ;;  %v411_v38 = vrot.slane %v409_v40, 4 }
  0x41   : > { %3612 = vst [vmem:[#allocation19_spill] sm:$0xff] %v2709_v31  ;;  %v414_v43 = vrot.slane %v412_v4, 5  ;;  %v401_v25 = vor.u32 %v400_v21, %v397_v18  ;;  %v404_v48 = vshll.u32 %v255_v28, 16  ;;  %v425_v37 = vrot.slane %v423_v22, 4 }
  0x42   : > { %3613 = vst [vmem:[#allocation20_spill] sm:$0xff] %v2713_v26  ;;  %v428_v42 = vrot.slane %v426_v23, 5  ;;  %v2722_v49 = vcombine.low %v2524_v13, %v2542_v47  ;;  %v2730_v51 = vcombine.low %v2663_v52, %v2716_v34  ;;  %v393_v59 = vsel %vm2499_vm2, %v388_v32, %v392_v33  ;;  %v2759_v32 = vld [vmem:[%s2421_s24 + $0xb0] sm:$0xf] }
  0x43   : > { %1190 = vrot.lane.b32.xlu1 %v2613_v35, %s2366_s26  ;;  %1192 = vrot.lane.b32.xlu0 %v2622_v6, %s2366_s26  ;;  %v415_v62 = vor.u32 %v414_v43, %v411_v38  ;;  %v418_v14 = vshll.u32 %v257_v44, 16  ;;  %v402_v13 = vrot.slane %v401_v25, 4  ;;  %v406_v47 = vrot.slane %v404_v48, 5  ;;  %3619 = vst [vmem:[#allocation26_spill] sm:$0xff] %v2759_v32  ;;  %v2764_v43 = vld [vmem:[%s2421_s24 + $0xb8] sm:$0xf] }
  0x44   : > { %3614 = vst [vmem:[#allocation21_spill] sm:$0xff] %v2722_v49  ;;  %3615 = vst [vmem:[#allocation22_spill] sm:$0xff] %v2730_v51  ;;  %v429_v0 = vor.u32 %v428_v42, %v425_v37  ;;  %v432_v7 = vshll.u32 %v259_v20, 16  ;;  %v2741_v11 = vcombine.low %v2551_v39, %v393_v59  ;;  %v987_v16 = vshrl.u32 %v2716_v34, 16 }
  0x45   : > { %v990_v40 = vshll.u32 %v2716_v34, 16  ;;  %v2751_v4 = vcombine.low %v2735_v61, %v2738_v63  ;;  %v416_v18 = vrot.slane %v415_v62, 4  ;;  %v420_v21 = vrot.slane %v418_v14, 5  ;;  %v271_v62 = vld [vmem:[%s2421_s24 + $0x6c] sm:$0x1] }
  0x46   : > { %3616 = vst [vmem:[#allocation23_spill] sm:$0xff] %v2741_v11  ;;  %v1001_v39 = vshrl.u32 %v2735_v61, 16  ;;  %v2756_v22 = vsel %vm2499_vm2, %v402_v13, %v406_v47  ;;  %v430_v23 = vrot.slane %v429_v0, 4  ;;  %v434_v28 = vrot.slane %v432_v7, 5  ;;  %v2790_v0 = vld [vmem:[%s2421_s24 + $0xc0] sm:$0xf] }
  0x47   : > { %726 = vrot.lane.b32.xlu1 %v2672_v10, %s2371_s6  ;;  %728 = vrot.lane.b32.xlu0 %v2683_v15, %s2371_s6  ;;  %3617 = vst [vmem:[#allocation24_spill] sm:$0xff] %v2751_v4  ;;  %3618 = vst [vmem:[#allocation25_spill] sm:$0xff] %v2756_v22  ;;  %v1004_v33 = vshll.u32 %v2735_v61, 16  ;;  %v1015_v38 = vshrl.u32 %v2738_v63, 16  ;;  %v973_v25 = vshrl.u32 %v2663_v52, 16  ;;  %v976_v48 = vshll.u32 %v2663_v52, 16 }
  0x48   : > { %v1018_v44 = vshll.u32 %v2738_v63, 16  ;;  %v2775_v37 = vcombine.low %v2579_v41, %v2584_v27  ;;  %v493_v42 = vshrl.u32 %v2759_v32, 16  ;;  %v496_v20 = vshll.u32 %v2759_v32, 16  ;;  %3621 = vst [vmem:[#allocation28_spill] sm:$0xff] %v2790_v0  ;;  %v2793_v41 = vld [vmem:[%s2421_s24 + $0xc8] sm:$0xf] }
  0x49   : > { %v2781_v14 = vcombine.low %v393_v59, %v2756_v22  ;;  %v2785_v52 = vsel %vm2499_vm2, %v416_v18, %v420_v21  ;;  %v507_v13 = vshrl.u32 %v2764_v43, 16  ;;  %v510_v47 = vshll.u32 %v2764_v43, 16  ;;  %3622 = vst [vmem:[#allocation29_spill] sm:$0xff] %v2793_v41 }
  0x4a   : > { %3620 = vst [vmem:[#allocation27_spill] sm:$0xff] %v2785_v52  ;;  %v2797_v27 = vsel %vm2499_vm2, %v430_v23, %v434_v28  ;;  %v521_v59 = vshrl.u32 %v2790_v0, 16  ;;  %v524_v7 = vshll.u32 %v2790_v0, 16  ;;  %v535_v18 = vshrl.u32 %v2793_v41, 16  ;;  %v3650_v50 = vld [vmem:[#allocation26_spill] sm:$0xff] }
  0x4b   : > { %1210 = vrot.lane.b32.xlu1 %v2709_v31, %s2369_s29  ;;  %1212 = vrot.lane.b32.xlu0 %v2713_v26, %s2369_s29  ;;  %3623 = vst [vmem:[#allocation30_spill] sm:$0xff] %v2797_v27  ;;  %v538_v21 = vshll.u32 %v2793_v41, 16  ;;  %v975_v53 = vrot.slane %v973_v25, 4  ;;  %v978_v24 = vrot.slane %v976_v48, 5  ;;  %v2807_v23 = vrot.slane %v493_v42, 4 }
  0x4c   : > { %v2809_v28 = vrot.slane %v496_v20, 5  ;;  %v989_v9 = vrot.slane %v987_v16, 4  ;;  %v992_v3 = vrot.slane %v990_v40, 5  ;;  %v2814_v25 = vcombine.low %v2785_v52, %v2797_v27  ;;  %v275_v42 = vld [vmem:[%s2421_s24 + $0x7c] sm:$0x1] }
  0x4d   : > { %v2816_v48 = vrot.slane %v507_v13, 4  ;;  %v2825_v20 = vrot.slane %v521_v59, 4  ;;  %v2827_v16 = vrot.slane %v524_v7, 5  ;;  %v2829_v40 = vrot.slane %v535_v18, 4  ;;  %v2836_v13 = vld [vmem:[%s2421_s24 + $0xf8] sm:$0xf] }
  0x4e   : > { %v2833_v57 = vcombine.low %v2790_v0, %v2793_v41  ;;  %v2839_v56 = vrot.slane %v538_v21, 5  ;;  %v979_v55 = vor.u32 %v978_v24, %v975_v53  ;;  %v2842_v26 = vld [vmem:[%s2421_s24 + $0x100] sm:$0xf]  ;;  %v996_v59 = vshll.u32 %v273_v5, 16  ;;  %v307_v31 = vld [vmem:[%s2421_s24 + $0xfc] sm:$0x1] }
  0x4f   : > { %739 = vrot.lane.b32.xlu1 %v2722_v49, %s2372_s7  ;;  %606 = vrot.lane.b32.xlu0 %v2730_v51, %s2365_s25  ;;  %v982_v51 = vshll.u32 %v271_v62, 16  ;;  %v2818_v62 = vrot.slane %v510_v47, 5  ;;  %v277_v47 = vld [vmem:[%s2421_s24 + $0x84] sm:$0x1]  ;;  %v2850_v7 = vld [vmem:[%s2421_s24 + $0x108] sm:$0xf]  ;;  %v993_v18 = vor.u32 %v992_v3, %v989_v9 }
  0x50   : > { %3625 = vst [vmem:[#allocation32_spill] sm:$0xff] %v2833_v57  ;;  %v1003_v41 = vrot.slane %v1001_v39, 4  ;;  %v1010_v21 = vshll.u32 %v275_v42, 16  ;;  %v1020_v24 = vrot.slane %v1018_v44, 5  ;;  %v309_v53 = vld [vmem:[%s2421_s24 + $0x104] sm:$0x1] }
  0x51   : > { %v1088_v5 = vshll.u32 %v2836_v13, 16  ;;  %v1024_v30 = vshll.u32 %v277_v47, 16  ;;  %v1094_v6 = vshll.u32 %v307_v31, 16  ;;  %v1102_v29 = vshll.u32 %v2842_v26, 16 }
  0x52   : > { %v980_v35 = vrot.slane %v979_v55, 4  ;;  %v1113_v9 = vshrl.u32 %v2850_v7, 16  ;;  %v1108_v31 = vshll.u32 %v309_v53, 16  ;;  %v994_v52 = vrot.slane %v993_v18, 4 }
  0x53   : > { %1218 = vrot.lane.b32.xlu1 %v2672_v10, %s2370_s30  ;;  %1220 = vrot.lane.b32.xlu0 %v2683_v15, %s2370_s30  ;;  %v1006_v15 = vrot.slane %v1004_v33, 5  ;;  %v1017_v10 = vrot.slane %v1015_v38, 4  ;;  %v1090_v3 = vrot.slane %v1088_v5, 5  ;;  %v1104_v33 = vrot.slane %v1102_v29, 5  ;;  %v289_v29 = vld [vmem:[%s2421_s24 + $0xb4] sm:$0x1] }
  0x54   : > { %v1116_v38 = vshll.u32 %v2850_v7, 16  ;;  %v1096_v42 = vrot.slane %v1094_v6, 5  ;;  %v1115_v55 = vrot.slane %v1113_v9, 4  ;;  %v295_v9 = vld [vmem:[%s2421_s24 + $0xcc] sm:$0x1] }
  0x55   : > { %v1007_v5 = vor.u32 %v1006_v15, %v1003_v41  ;;  %v1110_v15 = vrot.slane %v1108_v31, 5 }
  0x56   : > { %v1118_v27 = vrot.slane %v1116_v38, 5 }
  0x57   : > { %741 = vrot.lane.b32.xlu1 %v2741_v11, %s2372_s7  ;;  %608 = vrot.lane.b32.xlu0 %v2751_v4, %s2365_s25  ;;  %v2822_v4 = vcombine.low %v2759_v32, %v2764_v43  ;;  %v984_v32 = vrot.slane %v982_v51, 5  ;;  %v1085_v51 = vshrl.u32 %v2836_v13, 16 }
  0x59   : > { %3624 = vst [vmem:[#allocation31_spill] sm:$0xff] %v2822_v4  ;;  %v1087_v60 = vrot.slane %v1085_v51, 4  ;;  %v998_v51 = vrot.slane %v996_v59, 5  ;;  %v2866_v22 = vsel %vm2499_vm2, %v980_v35, %v984_v32  ;;  %v1012_v59 = vrot.slane %v1010_v21, 5  ;;  %v293_v32 = vld [vmem:[%s2421_s24 + $0xc4] sm:$0x1] }
  0x5a   : > { %v1026_v35 = vrot.slane %v1024_v30, 5  ;;  %v2889_v30 = vld [vmem:[%s2421_s24 + $0x110] sm:$0xf] }
  0x5b   : > { %1226 = vrot.lane.b32.xlu1 %v2722_v49, %s2371_s6  ;;  %1228 = vrot.lane.b32.xlu0 %v2741_v11, %s2371_s6  ;;  %v1099_v49 = vshrl.u32 %v2842_v26, 16  ;;  %v311_v11 = vld [vmem:[%s2421_s24 + $0x10c] sm:$0x1]  ;;  %v1091_v44 = vor.u32 %v1090_v3, %v1087_v60  ;;  %v291_v60 = vld [vmem:[%s2421_s24 + $0xbc] sm:$0x1]  ;;  %v502_v3 = vshll.u32 %v289_v29, 16 }
  0x5c   : > { %v1122_v47 = vshll.u32 %v311_v11, 16  ;;  %v1119_v11 = vor.u32 %v1118_v27, %v1115_v55  ;;  %v2886_v27 = vcombine.low %v2593_v45, %v2866_v22  ;;  %3626 = vst [vmem:[#allocation33_spill] sm:$0xff] %v2889_v30 }
  0x5d   : > { %v1101_v39 = vrot.slane %v1099_v49, 4  ;;  %v1021_v49 = vor.u32 %v1020_v24, %v1017_v10  ;;  %v1092_v53 = vrot.slane %v1091_v44, 4  ;;  %v499_v10 = vor.u32 %v2809_v28, %v2807_v23 }
  0x5e   : > { %v1124_v41 = vrot.slane %v1122_v47, 5  ;;  %v1008_v24 = vrot.slane %v1007_v5, 4  ;;  %v513_v23 = vor.u32 %v2818_v62, %v2816_v48  ;;  %v516_v28 = vshll.u32 %v291_v60, 16  ;;  %v2941_v60 = vld [vmem:[%s3539_s1 + $0x8] sm:$0xff]  }
  0x5f   : > { %626 = vrot.lane.b32.xlu1 %v2781_v14, %s2368_s28  ;;  %628 = vrot.lane.b32.xlu0 %v2814_v25, %s2368_s28  ;;  %v1105_v12 = vor.u32 %v1104_v33, %v1101_v39  ;;  %v2879_v18 = vsel %vm2499_vm2, %v1092_v53, %v1096_v42  ;;  %v1022_v21 = vrot.slane %v1021_v49, 4  ;;  %v527_v39 = vor.u32 %v2827_v16, %v2825_v20 }
  0x60   : > { %v530_v33 = vshll.u32 %v293_v32, 16  ;;  %v541_v48 = vor.u32 %v2839_v56, %v2829_v40  ;;  %v544_v62 = vshll.u32 %v295_v9, 16  ;;  %v2913_v44 = vcombine.low %v2836_v13, %v2842_v26  ;;  %v2337_v56 = vld [vmem:[%s3539_s1 + $0x10] ss:$0 sps:$4 sm:$0x33]  }
  0x61   : > { %v1106_v6 = vrot.slane %v1105_v12, 4  ;;  %v1120_v12 = vrot.slane %v1119_v11, 4  ;;  %v2917_v20 = vcombine.low %v2850_v7, %v2889_v30  ;;  %v2921_v16 = vsel %vm2499_vm2, %v994_v52, %v998_v51  ;;  %2294 = vmatprep.subr.msk.bf16.mxu0 %vm847_vm3, %v2337_v56  ;;  %2295 = vmatprep.subr.msk.bf16.mxu1 %vm847_vm3, %v2337_v56 }
  0x62   : > { %v2928_v40 = vsel %vm2499_vm2, %v1008_v24, %v1012_v59  ;;  %v500_v42 = vrot.slane %v499_v10, 4  ;;  %v504_v55 = vrot.slane %v502_v3, 5  ;;  %v514_v47 = vrot.slane %v513_v23, 4  ;;  %v2978_v10 = vld [vmem:[%s3539_s1] sm:$0xff]  }
  0x63   : > { %1239 = vrot.lane.b32.xlu1 %v2775_v37, %s2372_s7  ;;  %1158 = vrot.lane.b32.xlu0 %v2781_v14, %s2365_s25  ;;  %v2901_v45 = vsel %vm2499_vm2, %v1106_v6, %v1110_v15  ;;  %v2905_v31 = vsel %vm2499_vm2, %v1120_v12, %v1124_v41  ;;  %v2936_v52 = vsel %vm2499_vm2, %v1022_v21, %v1026_v35  ;;  %v518_v51 = vrot.slane %v516_v28, 5  ;;  %v260_v12 = vld [vmem:[%s2421_s24 + $0x40] sm:$0xf]  ;;  %v3644_v14 = vld [vmem:[#allocation17_spill] sm:$0xff] }
  0x64   : > { %3627 = vst [vmem:[#allocation34_spill] sm:$0xff] %v2901_v45  ;;  %3628 = vst [vmem:[#allocation35_spill] sm:$0xff] %v2905_v31  ;;  %v528_v5 = vrot.slane %v527_v39, 4  ;;  %v532_v49 = vrot.slane %v530_v33, 5  ;;  %v542_v29 = vrot.slane %v541_v48, 4  ;;  %v546_v53 = vrot.slane %v544_v62, 5 }
  0x65   : > { %v2945_v6 = vsel %vm847_vm3, %v2337_v56, 0  ;;  %v2131_v15 = vcombine.low %v2928_v40, %v2936_v52  ;;  %v505_v11 = vsel %vm2499_vm2, %v500_v42, %v504_v55  ;;  %v2962_v41 = vsel %vm2499_vm2, %v514_v47, %v518_v51  ;;  %v313_v33 = vld [vmem:[%s2421_s24 + $0x114] sm:$0x1]  ;;  %v3645_v3 = vld [vmem:[#allocation18_spill] sm:$0xff] }
  0x66   : > { %2239 = vmatpush3.bf16.msra.mxu0 %v2945_v6  ;;  %2253 = vmatpush3.bf16.msra.mxu1 %v2945_v6  ;;  %v2972_v35 = vsel %vm2499_vm2, %v542_v29, %v546_v53  ;;  %v2982_v32 = vcombine.low %v2602_v46, %v2608_v54  ;;  %v2986_v24 = vcombine.low %v2617_v58, %v505_v11  ;;  %v1127_v58 = vshrl.u32 %v2889_v30, 16  ;;  %v278_v53 = vld [vmem:[%s2421_s24 + $0x88] sm:$0xf] }
  0x67   : > { %654 = vrot.lane.b32.xlu1 %v2822_v4, %s2367_s27  ;;  %656 = vrot.lane.b32.xlu0 %v2833_v57, %s2367_s27  ;;  %3629 = vst [vmem:[#allocation36_spill] sm:$0xff] %v2972_v35  ;;  %v2995_v46 = vcombine.low %v505_v11, %v2962_v41  ;;  %v1130_v9 = vshll.u32 %v2889_v30, 16  ;;  %v549_v21 = vshrl.u32 %v260_v12, 16  ;;  %v552_v23 = vshll.u32 %v260_v12, 16  ;;  %v2350_v4 = vld [vmem:[%s2421_s24] sm:$0xf] }
  0x68   : > { %2240 = vmatprep.subr.bf16.mxu0 %v2941_v60  ;;  %2254 = vmatprep.subr.bf16.mxu1 %v2941_v60  ;;  %v1129_v28 = vrot.slane %v1127_v58, 4  ;;  %v3021_v48 = vcombine.low %v2655_v36, %v2668_v19  ;;  %v3024_v62 = vcombine.low %v2675_v8, %v260_v12  ;;  %v1136_v51 = vshll.u32 %v313_v33, 16  ;;  %v3633_v33 = vld [vmem:[#allocation25_spill] sm:$0xff]  ;;  %v2355_v30 = vld [vmem:[%s2421_s24 + $0x10] sm:$0xf] }
  0x69   : > { %v1132_v39 = vrot.slane %v1130_v9, 5  ;;  %v551_v42 = vrot.slane %v549_v21, 4  ;;  %v554_v55 = vrot.slane %v552_v23, 5  ;;  %v3040_v11 = vcombine.low %v2716_v34, %v2735_v61 }
  0x6a   : > { %2241 = vmatpush3.bf16.msra.mxu0 %v2941_v60  ;;  %2255 = vmatpush3.bf16.msra.mxu1 %v2941_v60  ;;  %v3043_v58 = vcombine.low %v2738_v63, %v278_v53  ;;  %v3061_v34 = vcombine.low %v2879_v18, %v2901_v45 }
  0x6b   : > { %1241 = vrot.lane.b32.xlu1 %v2886_v27, %s2372_s7  ;;  %1160 = vrot.lane.b32.xlu0 %v2814_v25, %s2365_s25  ;;  %v2130_v25 = vcombine.low %v2866_v22, %v2921_v16  ;;  %v2966_v22 = vsel %vm2499_vm2, %v528_v5, %v532_v49  ;;  %v1133_v47 = vor.u32 %v1132_v39, %v1129_v28  ;;  %v1141_v39 = vshrl.u32 %v278_v53, 16 }
  0x6c   : > { %v2999_v54 = vcombine.low %v2966_v22, %v2972_v35  ;;  %2242 = vmatprep.subr.bf16.mxu0 %v2978_v10  ;;  %2256 = vmatprep.subr.bf16.mxu1 %v2978_v10  ;;  %v555_v49 = vor.u32 %v554_v55, %v551_v42  ;;  %v3053_v28 = vcombine.low %v2842_v26, %v2850_v7  ;;  %v1144_v26 = vshll.u32 %v278_v53, 16  ;;  %v3632_v7 = vld [vmem:[#allocation27_spill] sm:$0xff]  ;;  %v3634_v55 = vld [vmem:[#allocation30_spill] sm:$0xff] }
  0x6d   : > { %v3071_v42 = vcombine.low %v3633_v33, %v3632_v7  ;;  %v3085_v53 = vcombine.low %v2962_v41, %v2966_v22  ;;  %v3636_v7 = vld [vmem:[#allocation4_spill] sm:$0xff]  ;;  %v3637_v33 = vld [vmem:[#allocation11_spill] sm:$0xff] }
  0x6e   : > { %2243 = vmatpush3.bf16.msra.mxu0 %v2978_v10  ;;  %2257 = vmatpush3.bf16.msra.mxu1 %v2978_v10  ;;  %v556_v9 = vrot.slane %v555_v49, 4  ;;  %3631 = vst [vmem:[#allocation38_spill] sm:$0xff] %v3053_v28  ;;  %v1146_v49 = vrot.slane %v1144_v26, 5 }
  0x6f   : > { %682 = vrot.lane.b32.xlu1 %v2913_v44, %s2366_s26  ;;  %684 = vrot.lane.b32.xlu0 %v2917_v20, %s2366_s26  ;;  %3635 = vst [vmem:[#allocation27_spill] sm:$0xff] %v3085_v53 }
  0x70   : > { %2296 = vmatprep.subr.msk.bf16.mxu0 %vm847_vm3, %v2337_v56  ;;  %2297 = vmatprep.subr.msk.bf16.mxu1 %vm847_vm3, %v2337_v56  ;;  %v261_v56 = vld [vmem:[%s2421_s24 + $0x44] sm:$0x1] }
  0x71   : > { %v558_v29 = vshll.u32 %v261_v56, 16  ;;  %v1143_v56 = vrot.slane %v1141_v39, 4 }
  0x73   : > { %1178 = vrot.lane.b32.xlu1 %v2130_v25, %s2368_s28  ;;  %1180 = vrot.lane.b32.xlu0 %v2131_v15, %s2368_s28  ;;  %v1134_v25 = vrot.slane %v1133_v47, 4  ;;  %v1138_v15 = vrot.slane %v1136_v51, 5  ;;  %v560_v12 = vrot.slane %v558_v29, 5  ;;  %v279_v29 = vld [vmem:[%s2421_s24 + $0x8c] sm:$0x1] }
  0x75   : > { %v3047_v21 = vsel %vm2499_vm2, %v1134_v25, %v1138_v15  ;;  %v561_v63 = vsel %vm2499_vm2, %v556_v9, %v560_v12  ;;  %v1147_v25 = vor.u32 %v1146_v49, %v1143_v56  ;;  %v1150_v15 = vshll.u32 %v279_v29, 16 }
  0x76   : > { %3630 = vst [vmem:[#allocation37_spill] sm:$0xff] %v3047_v21  ;;  %v3065_v61 = vcombine.low %v2905_v31, %v3047_v21  ;;  %v3074_v47 = vcombine.low %v3634_v55, %v561_v63  ;;  %v3111_v55 = vcombine.low %v2921_v16, %v2928_v40  ;;  %v3640_v16 = vld [vmem:[#allocation12_spill] sm:$0xff]  ;;  %v3641_v40 = vld [vmem:[#allocation15_spill] sm:$0xff] }
  0x77   : > { %702 = vrot.lane.b32.xlu1 %v2995_v46, %s2369_s29  ;;  %704 = vrot.lane.b32.xlu0 %v2999_v54, %s2369_s29  ;;  %v1148_v63 = vrot.slane %v1147_v25, 4  ;;  %v1152_v41 = vrot.slane %v1150_v15, 5 }
  0x78   : > { %3638 = vst [vmem:[#allocation25_spill] sm:$0xff] %v3111_v55 }
  0x79   : > { %v1153_v26 = vsel %vm2499_vm2, %v1148_v63, %v1152_v41  ;;  %v3642_v41 = vld [vmem:[#allocation13_spill] sm:$0xff] }
  0x7a   : > { %v3114_v56 = vcombine.low %v2936_v52, %v1153_v26  ;;  %v3643_v26 = vld [vmem:[#allocation16_spill] sm:$0xff] }
  0x7b   : > { %1186 = vrot.lane.b32.xlu1 %v2913_v44, %s2367_s27  ;;  %1188 = vrot.lane.b32.xlu0 %v2917_v20, %s2367_s27 }
  0x7c   : > { %3639 = vst [vmem:[#allocation30_spill] sm:$0xff] %v3114_v56 }
  0x7f   : > { %716 = vrot.lane.b32.xlu1 %v3021_v48, %s2370_s30  ;;  %718 = vrot.lane.b32.xlu0 %v3024_v62, %s2370_s30 }
  0x83   : > { %1194 = vrot.lane.b32.xlu1 %v2995_v46, %s2366_s26  ;;  %1196 = vrot.lane.b32.xlu0 %v2999_v54, %s2366_s26 }
  0x87   : > { %v3049_v23 = vpop.permute.xlu0 %602  ;;  %730 = vrot.lane.b32.xlu1 %v3040_v11, %s2371_s6  ;;  %732 = vrot.lane.b32.xlu0 %v3043_v58, %s2371_s6 }
  0x89   : > { %v3091_v9 = vpop.permute.xlu1 %678 }
  0x8b   : > { %1214 = vrot.lane.b32.xlu1 %v3061_v34, %s2369_s29  ;;  %1216 = vrot.lane.b32.xlu0 %v3065_v61, %s2369_s29  ;;  %v3080_v51 = vpop.permute.xlu0 %604 }
  0x8f   : > { %743 = vrot.lane.b32.xlu1 %v3071_v42, %s2372_s7  ;;  %745 = vrot.lane.b32.xlu0 %v3074_v47, %s2372_s7  ;;  %v651_v12 = vpop.permute.xlu0 %650 }
  0x93   : > { %1222 = vrot.lane.b32.xlu1 %v3040_v11, %s2370_s30  ;;  %1230 = vrot.lane.b32.xlu0 %v3071_v42, %s2371_s6  ;;  %v3101_v39 = vpop.permute.xlu0 %652 }
  0x97   : > { %1224 = vrot.lane.b32.xlu1 %v3043_v58, %s2370_s30  ;;  %v623_v22 = vpop.permute.xlu1 %622  ;;  %1232 = vrot.lane.b32.xlu0 %v3074_v47, %s2371_s6 }
  0x9b   : > { %1410 = vrot.lane.b32.xlu1 %v3636_v7, %s2365_s25  ;;  %1412 = vrot.lane.b32.xlu0 %v3637_v33, %s2365_s25  ;;  %v2351_v33 = vld [vmem:[%s2421_s24 + $0x8] sm:$0xf] }
  0x9c   : > { %v2085_v7 = vcombine.low %v2350_v4, %v2351_v33  ;;  %v3648_v4 = vld [vmem:[#allocation21_spill] sm:$0xff]  ;;  %v3649_v33 = vld [vmem:[#allocation23_spill] sm:$0xff] }
  0x9d   : > { %v3116_v49 = vpop.permute.xlu1 %624  ;;  %v3118_v29 = vpop.permute.xlu0 %1156 }
  0x9e   : > { %v750_v45 = vsel %vm747_vm4, %v2085_v7, %v3049_v23  ;;  %v2352_v23 = vld [vmem:[%s2421_s24 + $0x98] sm:$0xf]  ;;  %v2353_v7 = vld [vmem:[%s2421_s24 + $0xa0] sm:$0xf] }
  0x9f   : > { %1243 = vrot.lane.b32.xlu1 %v3111_v55, %s2372_s7  ;;  %1245 = vrot.lane.b32.xlu0 %v3114_v56, %s2372_s7  ;;  %v2144_v56 = vcombine.low %v2352_v23, %v2353_v7  ;;  %v2354_v55 = vld [vmem:[%s2421_s24 + $0xa8] sm:$0xf] }
  0xa0   : > { %v2145_v28 = vcombine.low %v2354_v55, %v3650_v50 }
  0xa1   : > { %v3124_v25 = vpop.permute.xlu1 %1154  ;;  %v3126_v15 = vpop.permute.xlu0 %680 }
  0xa3   : > { %1418 = vrot.lane.b32.xlu1 %v3640_v16, %s2368_s28  ;;  %1426 = vrot.lane.b32.xlu0 %v3641_v40, %s2367_s27 }
  0xa5   : > { %v3132_v52 = vpop.permute.xlu1 %1174  ;;  %v3134_v63 = vpop.permute.xlu0 %1176 }
  0xa7   : > { %1420 = vrot.lane.b32.xlu1 %v3642_v41, %s2368_s28  ;;  %1428 = vrot.lane.b32.xlu0 %v3643_v26, %s2367_s27 }
  0xa9   : > { %v699_v38 = vpop.permute.xlu1 %698  ;;  %v3140_v5 = vpop.permute.xlu0 %700 }
  0xab   : > { %1654 = vrot.lane.b32.xlu1 %v3640_v16, %s2365_s25  ;;  %1656 = vrot.lane.b32.xlu0 %v3642_v41, %s2365_s25  ;;  %v3646_v16 = vld [vmem:[#allocation19_spill] sm:$0xff]  ;;  %v3647_v41 = vld [vmem:[#allocation20_spill] sm:$0xff] }
  0xad   : > { %v3146_v40 = vpop.permute.xlu1 %1182  ;;  %v3148_v59 = vpop.permute.xlu0 %1184 }
  0xaf   : > { %1434 = vrot.lane.b32.xlu1 %v3644_v14, %s2366_s26  ;;  %1436 = vrot.lane.b32.xlu0 %v3645_v3, %s2366_s26 }
  0xb1   : > { %v713_v26 = vpop.permute.xlu1 %712  ;;  %v715_v57 = vpop.permute.xlu0 %714 }
  0xb3   : > { %1662 = vrot.lane.b32.xlu1 %v3646_v16, %s2368_s28  ;;  %1664 = vrot.lane.b32.xlu0 %v3647_v41, %s2368_s28  ;;  %v762_v16 = vsel %vm760_vm5, %v750_v45, %v623_v22  ;;  %v3651_v45 = vld [vmem:[#allocation8_spill] sm:$0xff] }
  0xb4   : > { %v771_v35 = vsel %vm769_vm6, %v762_v16, %v651_v12  ;;  %v2086_v22 = vcombine.low %v2355_v30, %v3651_v45 }
  0xb5   : > { %v3160_v21 = vpop.permute.xlu1 %1190  ;;  %v3162_v31 = vpop.permute.xlu0 %1192 }
  0xb6   : > { %v753_v30 = vsel %vm747_vm4, %v2086_v22, %v3080_v51  ;;  %v3653_v51 = vld [vmem:[#allocation10_spill] sm:$0xff] }
  0xb7   : > { %1442 = vrot.lane.b32.xlu1 %v3648_v4, %s2369_s29  ;;  %1444 = vrot.lane.b32.xlu0 %v3649_v33, %s2369_s29 }
  0xb9   : > { %v727_v41 = vpop.permute.xlu1 %726  ;;  %v729_v53 = vpop.permute.xlu0 %728 }
  0xbb   : > { %1670 = vrot.lane.b32.xlu1 %v3644_v14, %s2367_s27  ;;  %1672 = vrot.lane.b32.xlu0 %v3645_v3, %s2367_s27  ;;  %v780_v14 = vsel %vm778_vm7, %v771_v35, %v3091_v9  ;;  %v764_v35 = vsel %vm760_vm5, %v753_v30, %v3116_v49  ;;  %v3652_v9 = vld [vmem:[#allocation9_spill] sm:$0xff] }
  0xbc   : > { %v789_v3 = vsel %vm787_vm8, %v780_v14, %v699_v38 }
  0xbd   : > { %v1211_v0 = vpop.permute.xlu1 %1210  ;;  %v3182_v12 = vpop.permute.xlu0 %1212  ;;  %v798_v50 = vsel %vm796_vm9, %v789_v3, %v713_v26  ;;  %v2149_v26 = vcombine.low %v3653_v51, %v2836_v13 }
  0xbe   : > { %v807_v55 = vsel %vm805_vm10, %v798_v50, %v727_v41  ;;  %v773_v41 = vsel %vm769_vm6, %v764_v35, %v3101_v39 }
  0xbf   : > { %1456 = vrot.lane.b32.xlu1 %v2144_v56, %s2370_s30  ;;  %1458 = vrot.lane.b32.xlu0 %v2145_v28, %s2370_s30  ;;  %v2356_v28 = vld [vmem:[%s2421_s24 + $0xe0] sm:$0xf]  ;;  %v782_v45 = vsel %vm778_vm7, %v773_v41, %v3126_v15 }
  0xc0   : > { %v2148_v56 = vcombine.low %v2356_v28, %v3652_v9 }
  0xc1   : > { %v740_v16 = vpop.permute.xlu1 %739  ;;  %v3193_v23 = vpop.permute.xlu0 %606 }
  0xc2   : > { %v816_v38 = vsel %vm814_vm11, %v807_v55, %v740_v16 }
  0xc3   : > { %1678 = vrot.lane.b32.xlu1 %v3648_v4, %s2366_s26  ;;  %2244 = vmatprep.mubr.msk.bf16.mxu0 %vm838_vm12, %v816_v38  ;;  %v791_v4 = vsel %vm787_vm8, %v782_v45, %v3140_v5  ;;  %v3655_v38 = vld [vmem:[#allocation3_spill] sm:$0xff]  ;;  %v296_v45 = vld [vmem:[%s2421_s24 + $0xd0] sm:$0xf] }
  0xc4   : > { %1680 = vrot.lane.b32.xlu0 %v3649_v33, %s2366_s26  ;;  %v800_v22 = vsel %vm796_vm9, %v791_v4, %v715_v57 }
  0xc5   : > { %v1219_v49 = vpop.permute.xlu1 %1218  ;;  %v1221_v7 = vpop.permute.xlu0 %1220  ;;  %v809_v33 = vsel %vm805_vm10, %v800_v22, %v729_v53  ;;  %v3654_v53 = vld [vmem:[#allocation2_spill] sm:$0xff] }
  0xc6   : > { %v1249_v15 = vsel %vm747_vm4, %v3654_v53, %v3124_v25 }
  0xc7   : > { %1470 = vrot.lane.b32.xlu1 %v2148_v56, %s2371_s6 }
  0xc8   : > { %1472 = vrot.lane.b32.xlu0 %v2149_v26, %s2371_s6 }
  0xc9   : > { %v742_v13 = vpop.permute.xlu1 %741  ;;  %v3217_v14 = vpop.permute.xlu0 %608 }
  0xca   : > { %v818_v39 = vsel %vm814_vm11, %v809_v33, %v742_v13  ;;  %v1400_v33 = vshll.u32 %v296_v45, 16  ;;  %v3659_v13 = vcombine.low %v2668_v19, %v2675_v8 }
  0xcb   : > { %1686 = vrot.lane.b32.xlu1 %v2775_v37, %s2369_s29  ;;  %2245 = vmatmul.mubr.msk.bf16.vlgmr.msra.gmra.mxu0 %vm838_vm12, %v818_v39  ;;  %v1260_v37 = vsel %vm760_vm5, %v1249_v15, %v3132_v52 }
  0xcc   : > { %1688 = vrot.lane.b32.xlu0 %v2886_v27, %s2369_s29  ;;  %2267 = vmatpush3.bf16.msra.mxu0 %v2945_v6  ;;  %v1268_v27 = vsel %vm769_vm6, %v1260_v37, %v3146_v40 }
  0xcd   : > { %v1227_v57 = vpop.permute.xlu1 %1226  ;;  %v1229_v5 = vpop.permute.xlu0 %1228  ;;  %2268 = vmatprep.subr.bf16.mxu0 %v2941_v60  ;;  %v1276_v25 = vsel %vm778_vm7, %v1268_v27, %v3160_v21  ;;  %v1252_v21 = vsel %vm747_vm4, %v3655_v38, %v3118_v29 }
  0xce   : > { %v1284_v30 = vsel %vm787_vm8, %v1276_v25, %v1211_v0  ;;  %v1262_v0 = vsel %vm760_vm5, %v1252_v21, %v3134_v63  ;;  %v3661_v25 = vld [vmem:[#allocation28_spill] sm:$0xff] }
  0xcf   : > { %1483 = vrot.lane.b32.xlu1 %v2982_v32, %s2372_s7  ;;  %v1292_v52 = vsel %vm796_vm9, %v1284_v30, %v1219_v49  ;;  %v1270_v28 = vsel %vm769_vm6, %v1262_v0, %v3148_v59  ;;  %v3662_v30 = vcombine.low %v2764_v43, %v3661_v25 }
  0xd0   : > { %1414 = vrot.lane.b32.xlu0 %v2913_v44, %s2365_s25  ;;  %2269 = vmatpush3.bf16.msra.mxu0 %v2941_v60  ;;  %v1300_v40 = vsel %vm805_vm10, %v1292_v52, %v1227_v57  ;;  %v1278_v51 = vsel %vm778_vm7, %v1270_v28, %v3162_v31 }
  0xd1   : > { %v3239_v3 = vpop.permute.xlu1 %626  ;;  %v3241_v50 = vpop.permute.xlu0 %628  ;;  %2270 = vmatprep.subr.bf16.mxu0 %v2978_v10  ;;  %v1286_v29 = vsel %vm787_vm8, %v1278_v51, %v3182_v12  ;;  %v3663_v51 = vld [vmem:[#allocation33_spill] sm:$0xff] }
  0xd3   : > { %1694 = vrot.lane.b32.xlu1 %v2148_v56, %s2370_s30 }
  0xd4   : > { %1696 = vrot.lane.b32.xlu0 %v2149_v26, %s2370_s30  ;;  %2271 = vmatpush3.bf16.msra.mxu0 %v2978_v10  ;;  %v1294_v26 = vsel %vm796_vm9, %v1286_v29, %v1221_v7 }
  0xd5   : > { %v1240_v55 = vpop.permute.xlu1 %1239  ;;  %v3252_v16 = vpop.permute.xlu0 %1158  ;;  %v1302_v63 = vsel %vm805_vm10, %v1294_v26, %v1229_v5  ;;  %v3660_v5 = vld [vmem:[#allocation29_spill] sm:$0xff] }
  0xd6   : > { %v1308_v35 = vsel %vm814_vm11, %v1300_v40, %v1240_v55  ;;  %v314_v55 = vld [vmem:[%s2421_s24 + $0x118] sm:$0xf] }
  0xd7   : > { %1485 = vrot.lane.b32.xlu1 %v2986_v24, %s2372_s7  ;;  %2258 = vmatprep.mubr.msk.bf16.mxu1 %vm838_vm12, %v1308_v35  ;;  %v2151_v29 = vcombine.low %v3663_v51, %v314_v55 }
  0xd8   : > { %1416 = vrot.lane.b32.xlu0 %v2917_v20, %s2365_s25 }
  0xd9   : > { %v655_v9 = vpop.permute.xlu1 %654  ;;  %v657_v56 = vpop.permute.xlu0 %656 }
  0xdb   : > { %1702 = vrot.lane.b32.xlu1 %v2982_v32, %s2371_s6 }
  0xdc   : > { %1704 = vrot.lane.b32.xlu0 %v2986_v24, %s2371_s6  ;;  %v3656_v24 = vcombine.low %v2689_v1, %v2693_v2 }
  0xdd   : > { %v1242_v41 = vpop.permute.xlu1 %1241  ;;  %v3277_v59 = vpop.permute.xlu0 %1160 }
  0xde   : > { %v1310_v49 = vsel %vm814_vm11, %v1302_v63, %v1242_v41 }
  0xdf   : > { %1422 = vrot.lane.b32.xlu1 %v2995_v46, %s2368_s28  ;;  %2259 = vmatmul.mubr.msk.bf16.vlgmr.msra.gmra.mxu1 %vm838_vm12, %v1310_v49 }
  0xe0   : > { %1424 = vrot.lane.b32.xlu0 %v2999_v54, %s2368_s28  ;;  %2281 = vmatpush3.bf16.msra.mxu1 %v2945_v6 }
  0xe1   : > { %v683_v31 = vpop.permute.xlu1 %682  ;;  %v685_v32 = vpop.permute.xlu0 %684  ;;  %2282 = vmatprep.subr.bf16.mxu1 %v2941_v60 }
  0xe3   : > { %1715 = vrot.lane.b32.xlu1 %v3656_v24, %s2372_s7  ;;  %v1644_v24 = vshll.u32 %v314_v55, 16 }
  0xe4   : > { %1658 = vrot.lane.b32.xlu0 %v2995_v46, %s2365_s25  ;;  %2283 = vmatpush3.bf16.msra.mxu1 %v2941_v60  ;;  %v3657_v60 = vcombine.low %v2697_v17, %v2879_v18 }
  0xe5   : > { %v3294_v12 = vpop.permute.xlu1 %1178  ;;  %v3296_v7 = vpop.permute.xlu0 %1180  ;;  %2284 = vmatprep.subr.bf16.mxu1 %v2978_v10 }
  0xe7   : > { %1430 = vrot.lane.b32.xlu1 %v3021_v48, %s2367_s27 }
  0xe8   : > { %1432 = vrot.lane.b32.xlu0 %v3024_v62, %s2367_s27  ;;  %2285 = vmatpush3.bf16.msra.mxu1 %v2978_v10 }
  0xe9   : > { %v703_v1 = vpop.permute.xlu1 %702  ;;  %v705_v2 = vpop.permute.xlu0 %704 }
  0xeb   : > { %1717 = vrot.lane.b32.xlu1 %v3657_v60, %s2372_s7 }
  0xec   : > { %1660 = vrot.lane.b32.xlu0 %v2999_v54, %s2365_s25  ;;  %v3658_v54 = vld [vmem:[#allocation14_spill] sm:$0xff]  ;;  %s239_s25 = scalar_lea.vmem %s3542_s4, %s2415_s20 }
  0xed   : > { %v3310_v6 = vpop.permute.xlu1 %1186  ;;  %v3312_v46 = vpop.permute.xlu0 %1188  ;;  %v2087_v62 = vcombine.low %v3658_v54, %v2655_v36  ;;  %v759_v36 = vsel %vm747_vm4, %v3659_v13, %v3217_v14  ;;  %v3667_v54 = vld [vmem:[#allocation24_spill] sm:$0xff] }
  0xee   : > { %v768_v57 = vsel %vm760_vm5, %v759_v36, %v3241_v50 }
  0xef   : > { %1438 = vrot.lane.b32.xlu1 %v3040_v11, %s2366_s26  ;;  %v777_v19 = vsel %vm769_vm6, %v768_v57, %v657_v56 }
  0xf0   : > { %1440 = vrot.lane.b32.xlu0 %v3043_v58, %s2366_s26  ;;  %v786_v27 = vsel %vm778_vm7, %v777_v19, %v685_v32  ;;  %v3664_v32 = vld [vmem:[#allocation38_spill] sm:$0xff] }
  0xf1   : > { %v717_v10 = vpop.permute.xlu1 %716  ;;  %v719_v48 = vpop.permute.xlu0 %718 }
  0xf3   : > { %1666 = vrot.lane.b32.xlu1 %v3061_v34, %s2368_s28  ;;  %v1397_v34 = vshrl.u32 %v296_v45, 16 }
  0xf4   : > { %1668 = vrot.lane.b32.xlu0 %v3065_v61, %s2368_s28  ;;  %v756_v61 = vsel %vm747_vm4, %v2087_v62, %v3193_v23  ;;  %v2147_v23 = vcombine.low %v3660_v5, %v296_v45  ;;  %v1258_v62 = vsel %vm747_vm4, %v3667_v54, %v3277_v59  ;;  %v3668_v45 = vld [vmem:[#allocation25_spill] sm:$0xff]  ;;  %s242_s28 = scalar_lea.vmem %s3543_s5, %s2415_s20 }
  0xf5   : > { %v3322_v17 = vpop.permute.xlu1 %1194  ;;  %v3324_v18 = vpop.permute.xlu0 %1196  ;;  %v766_v39 = vsel %vm760_vm5, %v756_v61, %v3239_v3  ;;  %v1399_v15 = vrot.slane %v1397_v34, 4  ;;  %v297_v3 = vld [vmem:[%s2421_s24 + $0xd4] sm:$0x1]  ;;  %v1266_v34 = vsel %vm760_vm5, %v1258_v62, %v3296_v7 }
  0xf6   : > { %v775_v53 = vsel %vm769_vm6, %v766_v39, %v655_v9  ;;  %v1406_v9 = vshll.u32 %v297_v3, 16  ;;  %v3670_v61 = vld [vmem:[#allocation36_spill] sm:$0xff]  ;;  %v1274_v59 = vsel %vm769_vm6, %v1266_v34, %v3312_v46 }
  0xf7   : > { %1446 = vrot.lane.b32.xlu1 %v3071_v42, %s2369_s29  ;;  %v784_v37 = vsel %vm778_vm7, %v775_v53, %v683_v31  ;;  %v1641_v31 = vshrl.u32 %v314_v55, 16  ;;  %v1282_v7 = vsel %vm778_vm7, %v1274_v59, %v3324_v18  ;;  %v3671_v53 = vld [vmem:[#allocation27_spill] sm:$0xff] }
  0xf8   : > { %1448 = vrot.lane.b32.xlu0 %v3074_v47, %s2369_s29  ;;  %v793_v50 = vsel %vm787_vm8, %v784_v37, %v703_v1  ;;  %v1408_v49 = vrot.slane %v1406_v9, 5 }
  0xf9   : > { %v731_v4 = vpop.permute.xlu1 %730  ;;  %v733_v22 = vpop.permute.xlu0 %732  ;;  %v802_v52 = vsel %vm796_vm9, %v793_v50, %v717_v10  ;;  %v1643_v60 = vrot.slane %v1641_v31, 4  ;;  %v3666_v10 = vld [vmem:[#allocation22_spill] sm:$0xff] }
  0xfa   : > { %v811_v35 = vsel %vm805_vm10, %v802_v52, %v731_v4  ;;  %v1646_v4 = vrot.slane %v1644_v24, 5  ;;  %v3673_v52 = vld [vmem:[#allocation35_spill] sm:$0xff] }
  0xfb   : > { %1674 = vrot.lane.b32.xlu1 %v3040_v11, %s2367_s27  ;;  %v1402_v11 = vrot.slane %v1400_v33, 5  ;;  %v3669_v33 = vld [vmem:[#allocation30_spill] sm:$0xff] }
  0xfc   : > { %1676 = vrot.lane.b32.xlu0 %v3043_v58, %s2367_s27  ;;  %v795_v58 = vsel %vm787_vm8, %v786_v27, %v705_v2  ;;  %v1647_v19 = vor.u32 %v1646_v4, %v1643_v60  ;;  %v3676_v2 = vld [vmem:[#allocation5_spill] sm:$0xff] }
  0xfd   : > { %v1215_v8 = vpop.permute.xlu1 %1214  ;;  %v1217_v14 = vpop.permute.xlu0 %1216  ;;  %v804_v40 = vsel %vm796_vm9, %v795_v58, %v719_v48  ;;  %v1403_v28 = vor.u32 %v1402_v11, %v1399_v15  ;;  %v1255_v48 = vsel %vm747_vm4, %v3666_v10, %v3252_v16  ;;  %v315_v16 = vld [vmem:[%s2421_s24 + $0x11c] sm:$0x1] }
  0xfe   : > { %v813_v38 = vsel %vm805_vm10, %v804_v40, %v733_v22  ;;  %v1264_v22 = vsel %vm760_vm5, %v1255_v48, %v3294_v12  ;;  %v1648_v27 = vrot.slane %v1647_v19, 4 }
  0xff   : > { %1460 = vrot.lane.b32.xlu1 %v3662_v30, %s2370_s30  ;;  %v1404_v41 = vrot.slane %v1403_v28, 4  ;;  %v1272_v36 = vsel %vm769_vm6, %v1264_v22, %v3310_v6  ;;  %v1650_v6 = vshll.u32 %v315_v16, 16  ;;  %v3672_v30 = vld [vmem:[#allocation34_spill] sm:$0xff] }
 0x100   : > { %1462 = vrot.lane.b32.xlu0 %v2147_v23, %s2370_s30  ;;  %v1280_v12 = vsel %vm778_vm7, %v1272_v36, %v3322_v17  ;;  %v1290_v23 = vsel %vm787_vm8, %v1282_v7, %v1217_v14  ;;  %v3674_v40 = vcombine.low %v3672_v30, %v3673_v52 }
 0x101   : > { %v744_v21 = vpop.permute.xlu1 %743  ;;  %v746_v0 = vpop.permute.xlu0 %745  ;;  %v1288_v5 = vsel %vm787_vm8, %v1280_v12, %v1215_v8  ;;  %v1652_v3 = vrot.slane %v1650_v6, 5 }
 0x102   : > { %v820_v56 = vsel %vm814_vm11, %v811_v35, %v744_v21  ;;  %v822_v43 = vsel %vm814_vm11, %v813_v38, %v746_v0  ;;  %v3675_v38 = vld [vmem:[#allocation37_spill] sm:$0xff] }
 0x103   : > { %1682 = vrot.lane.b32.xlu1 %v3071_v42, %s2366_s26  ;;  %2248 = vmatprep.mubr.msk.bf16.mxu0 %vm838_vm12, %v820_v56  ;;  %v1653_v25 = vsel %vm2499_vm2, %v1648_v27, %v1652_v3 }
 0x104   : > { %1684 = vrot.lane.b32.xlu0 %v3074_v47, %s2366_s26  ;;  %2249 = vmatmul.mubr.msk.bf16.gmra.mxu0 %vm838_vm12, %v822_v43  ;;  %v1409_v47 = vsel %vm2499_vm2, %v1404_v41, %v1408_v49  ;;  %v2163_v21 = vcombine.low %v3675_v38, %v1653_v25 }
 0x105   : > { %v1223_v26 = vpop.permute.xlu1 %1222  ;;  %v1231_v63 = vpop.permute.xlu0 %1230  ;;  %v2155_v13 = vcombine.low %v3670_v61, %v1409_v47 }
 0x106   : > { %v1296_v15 = vsel %vm796_vm9, %v1288_v5, %v1223_v26 }
 0x107   : > { %1474 = vrot.lane.b32.xlu1 %v3664_v32, %s2371_s6  ;;  %v1304_v17 = vsel %vm805_vm10, %v1296_v15, %v1231_v63 }
 0x108   : > { %1476 = vrot.lane.b32.xlu0 %v2151_v29, %s2371_s6 }
 0x109   : > { %v1225_v42 = vpop.permute.xlu1 %1224  ;;  %v1233_v1 = vpop.permute.xlu0 %1232 }
 0x10a   : > { %v1298_v46 = vsel %vm796_vm9, %v1290_v23, %v1225_v42 }
 0x10b   : > { %1690 = vrot.lane.b32.xlu1 %v3668_v45, %s2369_s29  ;;  %v1306_v11 = vsel %vm805_vm10, %v1298_v46, %v1233_v1 }
 0x10c   : > { %1692 = vrot.lane.b32.xlu0 %v3669_v33, %s2369_s29 }
 0x10d   : > { %v1411_v39 = vpop.permute.xlu1 %1410  ;;  %v1413_v57 = vpop.permute.xlu0 %1412 }
 0x10e   : > { %v1493_v47 = vsel %vm747_vm4, %v3676_v2, %v1411_v39 }
 0x10f   : > { %1487 = vrot.lane.b32.xlu1 %v3671_v53, %s2372_s7 }
 0x110   : > { %1489 = vrot.lane.b32.xlu0 %v2155_v13, %s2372_s7 }
 0x111   : > { %v1244_v18 = vpop.permute.xlu1 %1243  ;;  %v1246_v37 = vpop.permute.xlu0 %1245 }
 0x112   : > { %v1312_v8 = vsel %vm814_vm11, %v1304_v17, %v1244_v18  ;;  %v1314_v14 = vsel %vm814_vm11, %v1306_v11, %v1246_v37  ;;  %v3678_v17 = vld [vmem:[#allocation4_spill] sm:$0xff] }
 0x113   : > { %1698 = vrot.lane.b32.xlu1 %v3664_v32, %s2370_s30  ;;  %2262 = vmatprep.mubr.msk.bf16.mxu1 %vm838_vm12, %v1312_v8 }
 0x114   : > { %1706 = vrot.lane.b32.xlu0 %v3671_v53, %s2371_s6  ;;  %2263 = vmatmul.mubr.msk.bf16.gmra.mxu1 %vm838_vm12, %v1314_v14 }
 0x115   : > { %v1419_v50 = vpop.permute.xlu1 %1418  ;;  %v1427_v58 = vpop.permute.xlu0 %1426 }
 0x116   : > { %v1504_v60 = vsel %vm760_vm5, %v1493_v47, %v1419_v50 }
 0x117   : > { %1700 = vrot.lane.b32.xlu1 %v2151_v29, %s2370_s30  ;;  %v1512_v10 = vsel %vm769_vm6, %v1504_v60, %v1427_v58 }
 0x118   : > { %1719 = vrot.lane.b32.xlu0 %v3674_v40, %s2372_s7  ;;  %v3679_v40 = vld [vmem:[#allocation11_spill] sm:$0xff] }
 0x119   : > { %v1421_v55 = vpop.permute.xlu1 %1420  ;;  %v1429_v35 = vpop.permute.xlu0 %1428 }
 0x11b   : > { %1708 = vrot.lane.b32.xlu1 %v2155_v13, %s2371_s6  ;;  %v3677_v13 = vld [vmem:[#allocation7_spill] sm:$0xff] }
 0x11c   : > { %v1496_v16 = vsel %vm747_vm4, %v3677_v13, %v1413_v57 }
 0x11d   : > { %v1655_v0 = vpop.permute.xlu1 %1654  ;;  %v1657_v28 = vpop.permute.xlu0 %1656  ;;  %v1506_v36 = vsel %vm760_vm5, %v1496_v16, %v1421_v55 }
 0x11e   : > { %v1514_v59 = vsel %vm769_vm6, %v1506_v36, %v1429_v35  ;;  %v1725_v11 = vsel %vm747_vm4, %v3678_v17, %v1655_v0  ;;  %v1728_v55 = vsel %vm747_vm4, %v3679_v40, %v1657_v28 }
 0x11f   : > { %1721 = vrot.lane.b32.xlu1 %v2163_v21, %s2372_s7 }
 0x121   : > { %v1435_v9 = vpop.permute.xlu1 %1434  ;;  %v1437_v56 = vpop.permute.xlu0 %1436 }
 0x122   : > { %v1520_v54 = vsel %vm778_vm7, %v1512_v10, %v1435_v9  ;;  %v1522_v12 = vsel %vm778_vm7, %v1514_v59, %v1437_v56 }
 0x125   : > { %v1663_v43 = vpop.permute.xlu1 %1662  ;;  %v1665_v51 = vpop.permute.xlu0 %1664 }
 0x126   : > { %v1736_v18 = vsel %vm760_vm5, %v1725_v11, %v1663_v43  ;;  %v1738_v35 = vsel %vm760_vm5, %v1728_v55, %v1665_v51 }
 0x129   : > { %v1443_v29 = vpop.permute.xlu1 %1442  ;;  %v1445_v26 = vpop.permute.xlu0 %1444 }
 0x12a   : > { %v1528_v45 = vsel %vm787_vm8, %v1520_v54, %v1443_v29  ;;  %v1530_v5 = vsel %vm787_vm8, %v1522_v12, %v1445_v26 }
 0x12d   : > { %v1671_v63 = vpop.permute.xlu1 %1670  ;;  %v1673_v41 = vpop.permute.xlu0 %1672 }
 0x12e   : > { %v1744_v37 = vsel %vm769_vm6, %v1736_v18, %v1671_v63  ;;  %v1746_v38 = vsel %vm769_vm6, %v1738_v35, %v1673_v41 }
 0x131   : > { %v1457_v49 = vpop.permute.xlu1 %1456  ;;  %v1459_v31 = vpop.permute.xlu0 %1458 }
 0x132   : > { %v1536_v4 = vsel %vm796_vm9, %v1528_v45, %v1457_v49  ;;  %v1538_v23 = vsel %vm796_vm9, %v1530_v5, %v1459_v31 }
 0x135   : > { %v1679_v32 = vpop.permute.xlu1 %1678 }
 0x136   : > { %v1681_v24 = vpop.permute.xlu0 %1680  ;;  %v1752_v14 = vsel %vm778_vm7, %v1744_v37, %v1679_v32 }
 0x137   : > { %v1754_v0 = vsel %vm778_vm7, %v1746_v38, %v1681_v24 }
 0x139   : > { %v1471_v42 = vpop.permute.xlu1 %1470 }
 0x13a   : > { %v1473_v1 = vpop.permute.xlu0 %1472  ;;  %v1544_v22 = vsel %vm805_vm10, %v1536_v4, %v1471_v42  ;;  %v3681_v4 = vld [vmem:[#allocation32_spill] sm:$0xff] }
 0x13b   : > { %v1546_v53 = vsel %vm805_vm10, %v1538_v23, %v1473_v1 }
 0x13d   : > { %v1687_v48 = vpop.permute.xlu1 %1686 }
 0x13e   : > { %v1689_v62 = vpop.permute.xlu0 %1688  ;;  %v1760_v3 = vsel %vm787_vm8, %v1752_v14, %v1687_v48 }
 0x13f   : > { %v1762_v56 = vsel %vm787_vm8, %v1754_v0, %v1689_v62  ;;  %v3680_v62 = vld [vmem:[#allocation31_spill] sm:$0xff] }
 0x141   : > { %v1484_v34 = vpop.permute.xlu1 %1483 }
 0x142   : > { %v1552_v33 = vsel %vm814_vm11, %v1544_v22, %v1484_v34  ;;  %v1415_v61 = vpop.permute.xlu0 %1414 }
 0x143   : > { %2272 = vmatprep.mubr.msk.bf16.mxu0 %vm838_vm12, %v1552_v33  ;;  %v1499_v45 = vsel %vm747_vm4, %v3680_v62, %v1415_v61 }
 0x145   : > { %v1695_v39 = vpop.permute.xlu1 %1694 }
 0x146   : > { %v1697_v7 = vpop.permute.xlu0 %1696  ;;  %v1768_v50 = vsel %vm796_vm9, %v1760_v3, %v1695_v39 }
 0x147   : > { %v1770_v43 = vsel %vm796_vm9, %v1762_v56, %v1697_v7 }
 0x149   : > { %v1486_v19 = vpop.permute.xlu1 %1485 }
 0x14a   : > { %v1554_v6 = vsel %vm814_vm11, %v1546_v53, %v1486_v19  ;;  %v1417_v57 = vpop.permute.xlu0 %1416 }
 0x14b   : > { %2273 = vmatmul.mubr.msk.bf16.vlgmr.msra.gmra.mxu0 %vm838_vm12, %v1554_v6  ;;  %v1502_v22 = vsel %vm747_vm4, %v3681_v4, %v1417_v57 }
 0x14d   : > { %v1703_v15 = vpop.permute.xlu1 %1702 }
 0x14e   : > { %v1705_v46 = vpop.permute.xlu0 %1704  ;;  %v1776_v58 = vsel %vm805_vm10, %v1768_v50, %v1703_v15 }
 0x14f   : > { %v1778_v29 = vsel %vm805_vm10, %v1770_v43, %v1705_v46 }
 0x151   : > { %v1423_v8 = vpop.permute.xlu1 %1422 }
 0x152   : > { %v1425_v27 = vpop.permute.xlu0 %1424  ;;  %v1508_v34 = vsel %vm760_vm5, %v1499_v45, %v1423_v8 }
 0x153   : > { %v1510_v33 = vsel %vm760_vm5, %v1502_v22, %v1425_v27 }
 0x155   : > { %v1716_v25 = vpop.permute.xlu1 %1715 }
 0x156   : > { %v1784_v30 = vsel %vm814_vm11, %v1776_v58, %v1716_v25  ;;  %v1659_v52 = vpop.permute.xlu0 %1658 }
 0x157   : > { %2286 = vmatprep.mubr.msk.bf16.mxu1 %vm838_vm12, %v1784_v30  ;;  %v1731_v17 = vsel %vm747_vm4, %v2913_v44, %v1659_v52 }
 0x159   : > { %v1431_v21 = vpop.permute.xlu1 %1430 }
 0x15a   : > { %v1433_v9 = vpop.permute.xlu0 %1432  ;;  %v1516_v13 = vsel %vm769_vm6, %v1508_v34, %v1431_v21 }
 0x15b   : > { %v1518_v36 = vsel %vm769_vm6, %v1510_v33, %v1433_v9 }
 0x15d   : > { %v1718_v26 = vpop.permute.xlu1 %1717 }
 0x15e   : > { %v1786_v63 = vsel %vm814_vm11, %v1778_v29, %v1718_v26  ;;  %v1661_v28 = vpop.permute.xlu0 %1660 }
 0x15f   : > { %2287 = vmatmul.mubr.msk.bf16.vlgmr.msra.gmra.mxu1 %vm838_vm12, %v1786_v63  ;;  %v1734_v44 = vsel %vm747_vm4, %v2917_v20, %v1661_v28 }
 0x161   : > { %v1439_v49 = vpop.permute.xlu1 %1438 }
 0x162   : > { %v1441_v51 = vpop.permute.xlu0 %1440  ;;  %v1524_v59 = vsel %vm778_vm7, %v1516_v13, %v1439_v49 }
 0x163   : > { %v1526_v12 = vsel %vm778_vm7, %v1518_v36, %v1441_v51 }
 0x165   : > { %v1667_v31 = vpop.permute.xlu1 %1666 }
 0x166   : > { %v1669_v41 = vpop.permute.xlu0 %1668  ;;  %v1740_v11 = vsel %vm760_vm5, %v1731_v17, %v1667_v31 }
 0x167   : > { %v1742_v52 = vsel %vm760_vm5, %v1734_v44, %v1669_v41 }
 0x169   : > { %v1447_v32 = vpop.permute.xlu1 %1446 }
 0x16a   : > { %v1449_v42 = vpop.permute.xlu0 %1448  ;;  %v1532_v7 = vsel %vm787_vm8, %v1524_v59, %v1447_v32 }
 0x16b   : > { %v1534_v61 = vsel %vm787_vm8, %v1526_v12, %v1449_v42 }
 0x16d   : > { %v1675_v24 = vpop.permute.xlu1 %1674 }
 0x16e   : > { %v1677_v1 = vpop.permute.xlu0 %1676  ;;  %v1748_v37 = vsel %vm769_vm6, %v1740_v11, %v1675_v24 }
 0x16f   : > { %v1750_v40 = vsel %vm769_vm6, %v1742_v52, %v1677_v1 }
 0x171   : > { %v1461_v2 = vpop.permute.xlu1 %1460 }
 0x172   : > { %v1463_v47 = vpop.permute.xlu0 %1462  ;;  %v1540_v5 = vsel %vm796_vm9, %v1532_v7, %v1461_v2 }
 0x173   : > { %v1542_v23 = vsel %vm796_vm9, %v1534_v61, %v1463_v47 }
 0x175   : > { %v1683_v60 = vpop.permute.xlu1 %1682 }
 0x176   : > { %v1685_v10 = vpop.permute.xlu0 %1684  ;;  %v1756_v14 = vsel %vm778_vm7, %v1748_v37, %v1683_v60 }
 0x177   : > { %v1758_v35 = vsel %vm778_vm7, %v1750_v40, %v1685_v10 }
 0x179   : > { %v1475_v48 = vpop.permute.xlu1 %1474 }
 0x17a   : > { %v1477_v54 = vpop.permute.xlu0 %1476  ;;  %v1548_v53 = vsel %vm805_vm10, %v1540_v5, %v1475_v48 }
 0x17b   : > { %v1550_v6 = vsel %vm805_vm10, %v1542_v23, %v1477_v54 }
 0x17d   : > { %v1691_v16 = vpop.permute.xlu1 %1690 }
 0x17e   : > { %v1693_v39 = vpop.permute.xlu0 %1692  ;;  %v1764_v27 = vsel %vm787_vm8, %v1756_v14, %v1691_v16  ;;  %v2168_v16 = vld [vmem:[%s3540_s2] ss:$0 sm:$0xff] }
 0x17f   : > { %v1766_v38 = vsel %vm787_vm8, %v1758_v35, %v1693_v39 }
 0x181   : > { %v1488_v19 = vpop.permute.xlu1 %1487 }
 0x182   : > { %v1556_v57 = vsel %vm814_vm11, %v1548_v53, %v1488_v19  ;;  %v1490_v15 = vpop.permute.xlu0 %1489 }
 0x183   : > { %2276 = vmatprep.mubr.msk.bf16.mxu0 %vm838_vm12, %v1556_v57  ;;  %v1558_v46 = vsel %vm814_vm11, %v1550_v6, %v1490_v15 }
 0x184   : > { %2277 = vmatmul.mubr.msk.bf16.gmra.mxu0 %vm838_vm12, %v1558_v46 }
 0x185   : > { %v1699_v18 = vpop.permute.xlu1 %1698 }
 0x186   : > { %v1707_v8 = vpop.permute.xlu0 %1706  ;;  %v1772_v3 = vsel %vm796_vm9, %v1764_v27, %v1699_v18 }
 0x187   : > { %v1780_v58 = vsel %vm805_vm10, %v1772_v3, %v1707_v8 }
 0x189   : > { %v1701_v50 = vpop.permute.xlu1 %1700 }
 0x18a   : > { %v1720_v25 = vpop.permute.xlu0 %1719  ;;  %v1774_v21 = vsel %vm796_vm9, %v1766_v38, %v1701_v50 }
 0x18b   : > { %v1788_v30 = vsel %vm814_vm11, %v1780_v58, %v1720_v25  ;;  %v2246_v56 = vpop.f32.mrf.mxu0 }
 0x18c   : > { %2290 = vmatprep.mubr.msk.bf16.mxu1 %vm838_vm12, %v1788_v30 }
 0x18d   : > { %v1709_v55 = vpop.permute.xlu1 %1708  ;;  %v885_v43 = vpop.f32.mrf.mxu0 }
 0x18e   : > { %v1782_v0 = vsel %vm805_vm10, %v1774_v21, %v1709_v55 }
 0x18f   : > { %v2247_v29 = vpop.f32.mrf.mxu0 }
 0x191   : > { %v1722_v9 = vpop.permute.xlu1 %1721  ;;  %v888_v63 = vpop.f32.mrf.mxu0 }
 0x192   : > { %v1790_v20 = vsel %vm814_vm11, %v1782_v0, %v1722_v9 }
 0x193   : > { %2291 = vmatmul.mubr.msk.bf16.gmra.mxu1 %vm838_vm12, %v1790_v20 }
 0x19f   : > { %v2260_v26 = vpop.f32.mrf.mxu1 }
 0x1a0   : > { %v1390_v10 = vmax.f32 %v2246_v56, %v2260_v26 }
 0x1a1   : > { %v1357_v28 = vpop.f32.mrf.mxu1 }
 0x1a2   : > { %v1388_v62 = vmax.f32 %v885_v43, %v1357_v28 }
 0x1a3   : > { %v2261_v51 = vpop.f32.mrf.mxu1 }
 0x1a4   : > { %v1391_v22 = vmax.f32 %v2247_v29, %v2261_v51 }
 0x1a5   : > { %v1360_v41 = vpop.f32.mrf.mxu1 }
 0x1a6   : > { %v1389_v59 = vmax.f32 %v888_v63, %v1360_v41 }
 0x1c4   : > { %v2250_v49 = vpop.f32.mrf.mxu0 }
 0x1c6   : > { %v901_v31 = vpop.f32.mrf.mxu0 }
 0x1c8   : > { %v2251_v32 = vpop.f32.mrf.mxu0 }
 0x1ca   : > { %v3511_v24 = vpop.f32.mrf.mxu0 }
 0x1d4   : > { %v2264_v42 = vpop.f32.mrf.mxu1 }
 0x1d5   : > { %v1394_v3 = vmax.f32 %v2250_v49, %v2264_v42 }
 0x1d6   : > { %v1373_v1 = vpop.f32.mrf.mxu1 }
 0x1d7   : > { %v1392_v58 = vmax.f32 %v901_v31, %v1373_v1 }
 0x1d8   : > { %v2265_v47 = vpop.f32.mrf.mxu1 }
 0x1d9   : > { %v1395_v40 = vmax.f32 %v2251_v32, %v2265_v47 }
 0x1da   : > { %v1376_v48 = vpop.f32.mrf.mxu1 }
 0x1db   : > { %v1393_v9 = vmax.f32 %v3511_v24, %v1376_v48 }
 0x20b   : > { %v2274_v2 = vpop.f32.mrf.mxu0 }
 0x20c   : > { %v1634_v45 = vmax.f32 %v1390_v10, %v2274_v2 }
 0x20d   : > { %v1601_v60 = vpop.f32.mrf.mxu0 }
 0x20e   : > { %v1632_v34 = vmax.f32 %v1388_v62, %v1601_v60 }
 0x20f   : > { %v2275_v54 = vpop.f32.mrf.mxu0 }
 0x210   : > { %v1635_v39 = vmax.f32 %v1391_v22, %v2275_v54 }
 0x211   : > { %v1604_v13 = vpop.f32.mrf.mxu0 }
 0x212   : > { %v1633_v61 = vmax.f32 %v1389_v59, %v1604_v13 }
 0x21f   : > { %v2288_v4 = vpop.f32.mrf.mxu1 }
 0x220   : > { %v1866_v33 = vmax.f32 %v1634_v45, %v2288_v4 }
 0x221   : > { %v1833_v36 = vpop.f32.mrf.mxu1 }
 0x222   : > { %v1864_v12 = vmax.f32 %v1632_v34, %v1833_v36  ;;  %v1881_v5 = vadd.f32 %v2168_v16, %v1866_v33 }
 0x223   : > { %v2289_v7 = vpop.f32.mrf.mxu1 }
 0x224   : > { %v1867_v23 = vmax.f32 %v1635_v39, %v2289_v7  ;;  %v1879_v19 = vadd.f32 %v2168_v16, %v1864_v12  ;;  %v1889_v15 = vmax.f32 %v1881_v5, 0.0 }
 0x225   : > { %v1836_v53 = vpop.f32.mrf.mxu1 }
 0x226   : > { %v1882_v6 = vadd.f32 %v2168_v16, %v1867_v23  ;;  %v1865_v57 = vmax.f32 %v1633_v61, %v1836_v53  ;;  %v1887_v11 = vmax.f32 %v1879_v19, 0.0  ;;  %v1951_v29 = vmul.f32 %v1889_v15, %v1889_v15 }
 0x228   : > { %v1890_v46 = vmax.f32 %v1882_v6, 0.0  ;;  %v1880_v17 = vadd.f32 %v2168_v16, %v1865_v57  ;;  %v1949_v55 = vmul.f32 %v1887_v11, %v1887_v11 }
 0x22a   : > { %v2195_v18 = vpack.c.bf16 %v1890_v46, %v1889_v15  ;;  %v1888_v37 = vmax.f32 %v1880_v17, 0.0  ;;  %v1952_v47 = vmul.f32 %v1890_v46, %v1890_v46 }
 0x22c   : > { %2207 = vst [vmem:[%s3520_s22 + $0x8] sm:$0xff] %v2195_v18   ;;  %v2190_v8 = vpack.c.bf16 %v1888_v37, %v1887_v11  ;;  %v1950_v25 = vmul.f32 %v1888_v37, %v1888_v37  ;;  %v1935_v30 = vadd.f32 %v1888_v37, %v1887_v11 }
 0x22e   : > { %2191 = vst [vmem:[%s3520_s22] sm:$0xff] %v2190_v8   ;;  %v1957_v20 = vadd.f32 %v1950_v25, %v1949_v55  ;;  %v1936_v26 = vadd.f32 %v1935_v30, %v1889_v15 }
 0x230   : > { %v1958_v32 = vadd.f32 %v1957_v20, %v1951_v29  ;;  %v1937_v60 = vadd.f32 %v1936_v26, %v1890_v46 }
 0x232   : > { %v1959_v45 = vadd.f32 %v1958_v32, %v1952_v47 }
 0x244   : > { %v2278_v14 = vpop.f32.mrf.mxu0 }
 0x245   : > { %v1638_v44 = vmax.f32 %v1394_v3, %v2278_v14 }
 0x246   : > { %v1617_v27 = vpop.f32.mrf.mxu0 }
 0x247   : > { %v1636_v35 = vmax.f32 %v1392_v58, %v1617_v27 }
 0x248   : > { %v2279_v50 = vpop.f32.mrf.mxu0 }
 0x249   : > { %v1639_v56 = vmax.f32 %v1395_v40, %v2279_v50 }
 0x24a   : > { %v1620_v21 = vpop.f32.mrf.mxu0 }
 0x24b   : > { %v1637_v28 = vmax.f32 %v1393_v9, %v1620_v21 }
 0x253   : > { %v2292_v52 = vpop.f32.mrf.mxu1 }
 0x254   : > { %v1870_v38 = vmax.f32 %v1638_v44, %v2292_v52 }
 0x255   : > { %v1849_v0 = vpop.f32.mrf.mxu1 }
 0x256   : > { %v1868_v43 = vmax.f32 %v1636_v35, %v1849_v0  ;;  %v1885_v49 = vadd.f32 %v2168_v16, %v1870_v38 }
 0x257   : > { %v2293_v63 = vpop.f32.mrf.mxu1 }
 0x258   : > { %v1883_v51 = vadd.f32 %v2168_v16, %v1868_v43  ;;  %v1871_v31 = vmax.f32 %v1639_v56, %v2293_v63  ;;  %v1893_v24 = vmax.f32 %v1885_v49, 0.0 }
 0x259   : > { %v1852_v41 = vpop.f32.mrf.mxu1 }
 0x25a   : > { %v1891_v42 = vmax.f32 %v1883_v51, 0.0  ;;  %v1886_v1 = vadd.f32 %v2168_v16, %v1871_v31  ;;  %v1869_v2 = vmax.f32 %v1637_v28, %v1852_v41  ;;  %v1955_v59 = vmul.f32 %v1893_v24, %v1893_v24 }
 0x25c   : > { %v1953_v10 = vmul.f32 %v1891_v42, %v1891_v42  ;;  %v1894_v48 = vmax.f32 %v1886_v1, 0.0  ;;  %v1884_v54 = vadd.f32 %v2168_v16, %v1869_v2  ;;  %v1938_v62 = vadd.f32 %v1937_v60, %v1891_v42 }
 0x25e   : > { %v2205_v4 = vpack.c.bf16 %v1894_v48, %v1893_v24  ;;  %v1892_v22 = vmax.f32 %v1884_v54, 0.0  ;;  %v1960_v34 = vadd.f32 %v1959_v45, %v1953_v10  ;;  %v1956_v7 = vmul.f32 %v1894_v48, %v1894_v48 }
 0x260   : > { %2209 = vst [vmem:[%s3520_s22 + $0x18] sm:$0xff] %v2205_v4   ;;  %v2200_v33 = vpack.c.bf16 %v1892_v22, %v1891_v42  ;;  %v1939_v13 = vadd.f32 %v1938_v62, %v1892_v22  ;;  %v1954_v36 = vmul.f32 %v1892_v22, %v1892_v22 }
 0x262   : > { %2208 = vst [vmem:[%s3520_s22 + $0x10] sm:$0xff] %v2200_v33   ;;  %v1940_v39 = vadd.f32 %v1939_v13, %v1893_v24  ;;  %v1961_v12 = vadd.f32 %v1960_v34, %v1954_v36 }
 0x264   : > { %v1941_v61 = vadd.f32 %v1940_v39, %v1894_v48  ;;  %v1962_v5 = vadd.f32 %v1961_v12, %v1955_v59 }
 0x266   : > { %v1942_v23 = vrot.slane %v1941_v61, 4  ;;  %v1963_v16 = vadd.f32 %v1962_v5, %v1956_v7 }
 0x268   : > { %v1943_v53 = vadd.f32 %v1942_v23, %v1941_v61  ;;  %v1964_v19 = vrot.slane %v1963_v16, 4 }
 0x26a   : > { %v1944_v6 = vrot.slane %v1943_v53, 2  ;;  %v1965_v57 = vadd.f32 %v1964_v19, %v1963_v16 }
 0x26c   : > { %v1945_v15 = vadd.f32 %v1944_v6, %v1943_v53  ;;  %v1966_v46 = vrot.slane %v1965_v57, 2 }
 0x26e   : > { %v1946_v17 = vrot.slane %v1945_v15, 1  ;;  %v1967_v11 = vadd.f32 %v1966_v46, %v1965_v57 }
 0x270   : > { %v1947_v18 = vadd.f32 %v1946_v17, %v1945_v15  ;;  %v1968_v37 = vrot.slane %v1967_v11, 1 }
 0x272   : > { %1948 = vst [vmem:[%s239_s25] sm:$0x1] %v1947_v18  ;;  %v1969_v8 = vadd.f32 %v1968_v37, %v1967_v11 }
 0x274   : > { %1970 = vst [vmem:[%s242_s28] sm:$0x1] %v1969_v8 }
 0x275 PF: > { %s16_s18 = sadd.s32 1, %s2363_s18  }
 0x276   : > { %p13_p5 = scmp.ge.s32.totalorder %s16_s18, 4  }
 0x278   :  { %15 = sbr.rel (!%p13_p5) target bundleno = 1 (0x1), region = 86 }

// kernel: cnn_extractor_2d.8
= control target key start
LH: loop header
LB: loop body
LE: loop exit
PB: predicated region body
PF: predicated region fallthrough
CT: control target
= control target key end

     0   :  { %s2013_s18 = smov 0   ;;  %s2705_s0 = inlined_call_operand.vmem [shape: bf16[2,4,5,5,32], index: 0, kind: input, shape index: {}]   ;;  %s2706_s1 = inlined_call_operand.vmem [shape: bf16[288,128], index: 1, kind: input, shape index: {}]   ;;  %s2707_s2 = inlined_call_operand.vmem [shape: f32[1,128], index: 2, kind: input, shape index: {}]   ;;  %s2708_s3 = inlined_call_operand.vmem [shape: bf16[32,128], index: 3, kind: output, shape index: {0}]   ;;  %s2709_s4 = inlined_call_operand.vmem [shape: f32[2,1,128], index: 4, kind: output, shape index: {1}]   ;;  %s2710_s5 = inlined_call_operand.vmem [shape: f32[2,1,128], index: 5, kind: output, shape index: {2}]  }
   0x1 LB: > { %s2019_s19 = sadd.s32 4294967295, %s1975_s18   ;;  %p1748_p0 = scmp.ge.s32.totalorder %s1975_s18, 1  ;;  %s1975_s18 = sphi %s2013_s18, %s16_s18  }
   0x2   : > { %p192_p1 = scmp.lt.s32.totalorder %s1975_s18, 3 }
   0x4   : > { %p193_p2 = pnand %p1748_p0, %p192_p1 }
   0x6   : > { %196 = sbr.rel (%p193_p2) target bundleno = 469 (0x1d5), region = 32 }
   0xb   : > { %p226_p3 = scmp.lt.s32.totalorder %s2019_s19, 1  ;;  %v307_v0 = vlaneseq  ;;  %v1977_v1 = vmov 1983009808   ;;  %v2030_v4 = vld [vmem:[%s2706_s1 + $0x88] sm:$0xff]   ;;  %v2711_v6 = vmov 0.0   ;;  %vm1979_vm0 = vmmov 0  }
   0xc   : > { %v305_v2 = vunpack.c.l.s4 %v1977_v1  ;;  %2747 = vst [vmem:[#allocation2_spill] sm:$0xff] %v2030_v4  ;;  %1886 = vmatprep.subr.bf16.mxu1 %v2711_v6  ;;  %1890 = vmatprep.mubr.msk.bf16.mxu1 %vm1979_vm0, %v2711_v6  ;;  %v2043_v8 = vld [vmem:[%s2706_s1 + $0x78] sm:$0xff]   ;;  %v2053_v9 = vld [vmem:[%s2706_s1 + $0x80] sm:$0xff]   ;;  %v2125_v41 = vld [vmem:[%s2706_s1 + $0x70] sm:$0xff]   ;;  %vm336_vm1 = vsmask.f32 1280 }
   0xd   : > { %s2025_s20 = scalar_select %p226_p3, %s2019_s19, 1  ;;  %v308_v3 = vshrl.u32 %v307_v0, 7  ;;  %1887 = vmatpush3.bf16.msra.mxu1 %v2030_v4  ;;  %2748 = vst [vmem:[#allocation3_spill] sm:$0xff] %v2043_v8  ;;  %2749 = vst [vmem:[#allocation4_spill] sm:$0xff] %v2053_v9  ;;  %1786 = vmatprep.subr.bf16.mxu0 %v2043_v8  ;;  %v2102_v31 = vld [vmem:[%s2706_s1 + $0x38] sm:$0xff]   ;;  %vm688_vm8 = vcmask 261120  }
   0xe   : > { %v306_v5 = vunpack.c.0.s8 %v305_v2  ;;  %1888 = vmatprep.subr.bf16.mxu1 %v2711_v6  ;;  %1787 = vmatpush3.bf16.msra.mxu0 %v2102_v31  ;;  %vm337_vm2 = vsmask.f32 3336  ;;  %s1980_s10 = smov 32   ;;  %vm339_vm3 = vsmask.f32 5392  ;;  %s1981_s17 = smov 64  }
   0xf   : > { %s1918_s23 = smul.u32 80, %s2025_s20  ;;  %1788 = vmatprep.subr.bf16.mxu0 %v2125_v41  ;;  %vm341_vm4 = vsmask.f32 7448  ;;  %vm2235_vm5 = vmor %vm336_vm1, %vm337_vm2  ;;  %s1982_s25 = smov 96   ;;  %vm692_vm9 = vcmask 523264   ;;  %vm695_vm10 = vcmask 785408  }
  0x10   : > { %v2037_v7 = vsub.s32 %v306_v5, %v308_v3  ;;  %vm340_vm6 = vmor %vm2235_vm5, %vm339_vm3  ;;  %s1750_s24 = sshll.u32 %s2019_s19, 1  ;;  %s239_s8 = scalar_lea.vmem %s2709_s4, %s2025_s20 }
  0x11   : > { %s2048_s28 = scalar_lea.vmem %s2705_s0, %s1918_s23  ;;  %1889 = vmatpush3.bf16.msra.mxu1 %v2053_v9  ;;  %vm2284_vm7 = vmor %vm340_vm6, %vm341_vm4  ;;  %p232_p4 = scmp.lt.s32.totalorder %s1750_s24, 3 }
  0x12   : > { %v249_v10 = vld [vmem:[%s2048_s28 + $0x14] sm:$0x7]  ;;  %v2057_v11 = vld [vmem:[%s2048_s28 + $0x18] sm:$0x7]  ;;  %v2060_v12 = vld [vmem:[%s2048_s28 + $0x1c] sm:$0x7]  ;;  %1811 = vmatprep.subr.bf16.mxu1 %v2043_v8  ;;  %s242_s12 = scalar_lea.vmem %s2710_s5, %s2025_s20 }
  0x13   : > { %v2064_v13 = vld [vmem:[%s2048_s28 + $0x20] sm:$0x7]  ;;  %v535_v14 = vcombine.low %v249_v10, %v2057_v11  ;;  %v906_v15 = vrot.slane %v249_v10, %v2037_v7  ;;  %v2070_v16 = vrot.slane %v2057_v11, %v2037_v7  ;;  %v2074_v17 = vrot.slane %v2060_v12, %v2037_v7  ;;  %v2077_v18 = vld [vmem:[%s2048_s28 + $0x8] sm:$0x7]  ;;  %v2097_v30 = vld [vmem:[%s2048_s28 + $0x4] sm:$0x7] }
  0x14   : > { %v536_v19 = vcombine.low %v2060_v12, %v2064_v13  ;;  %v2084_v20 = vrot.slane %v2064_v13, %v2037_v7  ;;  %v2088_v21 = vrot.slane %v2077_v18, %v2037_v7  ;;  %v2108_v34 = vld [vmem:[%s2048_s28 + $0xc] sm:$0x7]  ;;  %v632_v35 = vcombine.low %v2097_v30, %v2077_v18  ;;  %v248_v40 = vld [vmem:[%s2048_s28 + $0x10] sm:$0x7]  ;;  %v253_v58 = vld [vmem:[%s2048_s28 + $0x24] sm:$0x7] }
  0x15   : > { %v543_v22 = vrot.slane %v535_v14, %v2037_v7  ;;  %v907_v23 = vcombine.high %v906_v15, %v906_v15  ;;  %v933_v24 = vshrl.u32 %v906_v15, 16  ;;  %v936_v25 = vshll.u32 %v906_v15, 16  ;;  %2750 = vst [vmem:[#allocation5_spill] sm:$0xff] %v2108_v34  ;;  %v2159_v63 = vld [vmem:[%s2048_s28] sm:$0x7]  ;;  %s2801_s24 = smov (!%p232_p4, %s1750_s24), 3 }
  0x16   : > { %v550_v26 = vrot.slane %v536_v19, %v2037_v7  ;;  %v947_v27 = vshrl.u32 %v2070_v16, 16  ;;  %v950_v28 = vshll.u32 %v2070_v16, 16  ;;  %v961_v29 = vshrl.u32 %v2074_v17, 16  ;;  %v254_v0 = vld [vmem:[%s2048_s28 + $0x28] sm:$0x7]  ;;  %s1751_s19 = sshll.u32 %s2801_s24, 2 }
  0x17   : > { %v2104_v32 = vshll.u32 %v907_v23, 16  ;;  %v964_v33 = vshll.u32 %v2074_v17, 16  ;;  %v2114_v37 = vrot.slane %v933_v24, 6  ;;  %v2116_v38 = vrot.slane %v936_v25, 7  ;;  %v2171_v19 = vld [vmem:[%s2048_s28 + $0x2c] sm:$0x7]  ;;  %s235_s30 = scalar_lea.vmem %s2708_s3, %s1751_s19 }
  0x18   : > { %v2112_v36 = vcombine.low %v543_v22, %v550_v26  ;;  %v2118_v39 = vrot.slane %v947_v27, 6  ;;  %v2127_v42 = vrot.slane %v950_v28, 7  ;;  %v2129_v43 = vrot.slane %v961_v29, 6  ;;  %v2176_v22 = vld [vmem:[%s2706_s1 + $0x30] sm:$0xff]   ;;  %v2188_v27 = vld [vmem:[%s2706_s1 + $0x68] sm:$0xff]  }
  0x19   : > { %v975_v44 = vshrl.u32 %v2084_v20, 16  ;;  %v978_v45 = vshll.u32 %v2084_v20, 16  ;;  %v2137_v46 = vrot.slane %v2108_v34, %v2037_v7  ;;  %v372_v47 = vshrl.u32 %v2088_v21, 16  ;;  %1789 = vmatpush3.bf16.msra.mxu0 %v2176_v22 }
  0x1a   : > { %2751 = vst [vmem:[#allocation6_spill] sm:$0xff] %v2112_v36  ;;  %552 = vrot.lane.b32.xlu0 %v2112_v36, %s1980_s10  ;;  %v375_v48 = vshll.u32 %v2088_v21, 16  ;;  %v498_v49 = vrot.slane %v248_v40, %v2037_v7  ;;  %v2144_v51 = vrot.slane %v964_v33, 7  ;;  %v633_v53 = vcombine.low %v2108_v34, %v248_v40  ;;  %v2193_v40 = vld [vmem:[%s2048_s28 + $0x30] sm:$0x7]  ;;  %1790 = vmatprep.subr.bf16.mxu0 %v2188_v27 }
  0x1b   : > { %v2149_v54 = vrot.slane %v975_v44, 6  ;;  %v2151_v55 = vrot.slane %v978_v45, 7  ;;  %v2153_v56 = vrot.slane %v372_v47, 6  ;;  %v386_v57 = vshrl.u32 %v2137_v46, 16  ;;  %v2214_v47 = vld [vmem:[%s2706_s1 + $0x60] sm:$0xff]  }
  0x1c   : > { %v499_v59 = vcombine.high %v498_v49, %v498_v49  ;;  %v501_v60 = vshrl.u32 %v498_v49, 16  ;;  %v504_v61 = vshll.u32 %v498_v49, 16  ;;  %v640_v62 = vrot.slane %v632_v35, %v2037_v7  ;;  %2754 = vst [vmem:[#allocation9_spill] sm:$0xff] %v2214_v47 }
  0x1d   : > { %v2162_v1 = vrot.slane %v375_v48, 7  ;;  %v389_v2 = vshll.u32 %v2137_v46, 16  ;;  %v647_v3 = vrot.slane %v633_v53, %v2037_v7  ;;  %v318_v15 = vrot.slane %v2097_v30, %v2037_v7 }
  0x1e   : > { %v503_v5 = vrot.slane %v501_v60, 6  ;;  %v506_v10 = vrot.slane %v504_v61, 7  ;;  %v2166_v14 = vshll.u32 %v499_v59, 16  ;;  %v652_v25 = vcombine.low %v2057_v11, %v2060_v12  ;;  %v2199_v11 = vld [vmem:[%s2706_s1 + $0x28] sm:$0xff]   ;;  %v2224_v59 = vld [vmem:[%s2048_s28 + $0x34] sm:$0x7] }
  0x1f   : > { %v2178_v23 = vcombine.low %v640_v62, %v647_v3  ;;  %v653_v26 = vcombine.low %v2064_v13, %v253_v58  ;;  %v2190_v28 = vrot.slane %v386_v57, 6  ;;  %v358_v33 = vshrl.u32 %v318_v15, 16  ;;  %2753 = vst [vmem:[#allocation8_spill] sm:$0xff] %v2199_v11  ;;  %1791 = vmatpush3.bf16.msra.mxu0 %v2199_v11 }
  0x20   : > { %v507_v29 = vor.u32 %v506_v10, %v503_v5  ;;  %v361_v35 = vshll.u32 %v318_v15, 16  ;;  %v660_v12 = vrot.slane %v652_v25, %v2037_v7  ;;  %v2206_v44 = vrot.slane %v253_v58, %v2037_v7  ;;  %1792 = vmatprep.subr.bf16.mxu0 %v2214_v47 }
  0x21   : > { %2752 = vst [vmem:[#allocation7_spill] sm:$0xff] %v2178_v23  ;;  %649 = vrot.lane.b32.xlu1 %v2178_v23, %s1981_s17  ;;  %v667_v13 = vrot.slane %v653_v26, %v2037_v7  ;;  %v2209_v45 = vrot.slane %v254_v0, %v2037_v7  ;;  %v2216_v48 = vrot.slane %v389_v2, 7  ;;  %v310_v57 = vrot.slane %v2159_v63, %v2037_v7  ;;  %v2247_v26 = vld [vmem:[%s2706_s1 + $0x20] sm:$0xff]  }
  0x22   : > { %v2218_v49 = vrot.slane %v507_v29, 2  ;;  %v360_v58 = vrot.slane %v358_v33, 6  ;;  %v363_v60 = vrot.slane %v361_v35, 7  ;;  %v2231_v62 = vrot.slane %v2171_v19, %v2037_v7  ;;  %2758 = vst [vmem:[#allocation11_spill] sm:$0xff] %v2247_v26 }
  0x23   : > { %v2227_v61 = vcombine.low %v660_v12, %v667_v13  ;;  %v436_v5 = vshrl.u32 %v2209_v45, 16  ;;  %v439_v10 = vshll.u32 %v2209_v45, 16  ;;  %v573_v25 = vcombine.low %v254_v0, %v2171_v19  ;;  %v2262_v12 = vld [vmem:[%s2706_s1 + $0x58] sm:$0xff]   ;;  %1793 = vmatpush3.bf16.msra.mxu0 %v2247_v26 }
  0x24   : > { %v2254_v33 = vrot.slane %v2193_v40, %v2037_v7  ;;  %v574_v0 = vcombine.low %v2193_v40, %v2224_v59  ;;  %v311_v35 = vcombine.high %v310_v57, %v310_v57  ;;  %2759 = vst [vmem:[#allocation12_spill] sm:$0xff] %v2262_v12  ;;  %v319_v29 = vcombine.high %v318_v15, %v318_v15  ;;  %v2277_v15 = vld [vmem:[%s2706_s1 + $0x18] sm:$0xff]  }
  0x25   : > { %2755 = vst [vmem:[#allocation10_spill] sm:$0xff] %v2227_v61  ;;  %669 = vrot.lane.b32.xlu0 %v2227_v61, %s1982_s25  ;;  %v438_v13 = vrot.slane %v436_v5, 6  ;;  %v441_v52 = vrot.slane %v439_v10, 7  ;;  %v581_v24 = vrot.slane %v573_v25, %v2037_v7  ;;  %v327_v50 = vcombine.high %v2088_v21, %v2088_v21  ;;  %2760 = vst [vmem:[#allocation13_spill] sm:$0xff] %v2277_v15 }
  0x26   : > { %v588_v3 = vrot.slane %v574_v0, %v2037_v7  ;;  %v335_v6 = vcombine.high %v2137_v46, %v2137_v46  ;;  %v344_v53 = vshrl.u32 %v310_v57, 16  ;;  %v347_v36 = vshll.u32 %v310_v57, 16  ;;  %1794 = vmatprep.subr.bf16.mxu0 %v2262_v12 }
  0x27   : > { %v353_v8 = vshll.u32 %v311_v35, 16  ;;  %v364_v5 = vor.u32 %v363_v60, %v360_v58  ;;  %v367_v10 = vshll.u32 %v319_v29, 16  ;;  %v378_v57 = vor.u32 %v2162_v1, %v2153_v56  ;;  %v2303_v1 = vld [vmem:[%s2706_s1 + $0x10] sm:$0xff]   ;;  %1795 = vmatpush3.bf16.msra.mxu0 %v2277_v15 }
  0x28   : > { %v2279_v2 = vcombine.low %v581_v24, %v588_v3  ;;  %v346_v46 = vrot.slane %v344_v53, 6  ;;  %v381_v58 = vshll.u32 %v327_v50, 16  ;;  %v2294_v24 = vld [vmem:[%s2706_s1 + $0x50] sm:$0xff]   ;;  %v349_v60 = vrot.slane %v347_v36, 7  ;;  %2765 = vst [vmem:[#allocation16_spill] sm:$0xff] %v2303_v1 }
  0x29   : > { %1140 = vrot.lane.b32.xlu0 %v2227_v61, %s1981_s17  ;;  %2764 = vst [vmem:[#allocation15_spill] sm:$0xff] %v2294_v24  ;;  %v355_v3 = vrot.slane %v353_v8, 7  ;;  %v365_v25 = vrot.slane %v364_v5, 2  ;;  %v369_v29 = vrot.slane %v367_v10, 7  ;;  %v379_v0 = vrot.slane %v378_v57, 2  ;;  %1796 = vmatprep.subr.bf16.mxu0 %v2294_v24 }
  0x2a   : > { %2761 = vst [vmem:[#allocation14_spill] sm:$0xff] %v2279_v2  ;;  %590 = vrot.lane.b32.xlu1 %v2279_v2, %s1982_s25  ;;  %v383_v53 = vrot.slane %v381_v58, 7  ;;  %v392_v56 = vor.u32 %v2216_v48, %v2190_v28  ;;  %v395_v50 = vshll.u32 %v335_v6, 16  ;;  %v433_v36 = vrot.slane %v2224_v59, %v2037_v7  ;;  %v2370_v61 = vld [vmem:[%s2048_s28 + $0x40] sm:$0x7] }
  0x2b   : > { %v350_v8 = vor.u32 %v349_v60, %v346_v46  ;;  %v2309_v35 = vsel %vm2284_vm7, %v365_v25, %v369_v29  ;;  %v410_v5 = vcombine.high %v2209_v45, %v2209_v45  ;;  %v2766_v10 = vrot.slane %v2166_v14, 7  ;;  %v2329_v45 = vld [vmem:[%s2706_s1 + $0x48] sm:$0xff]   ;;  %1797 = vmatpush3.bf16.msra.mxu0 %v2303_v1 }
  0x2c   : > { %v2316_v6 = vsel %vm2284_vm7, %v379_v0, %v383_v53  ;;  %v393_v28 = vrot.slane %v392_v56, 2  ;;  %v397_v48 = vrot.slane %v395_v50, 7  ;;  %2767 = vst [vmem:[#allocation17_spill] sm:$0xff] %v2329_v45  ;;  %v418_v60 = vcombine.high %v2231_v62, %v2231_v62  ;;  %1798 = vmatprep.subr.bf16.mxu0 %v2329_v45 }
  0x2d   : > { %v2323_v46 = vsel %vm2284_vm7, %v2218_v49, %v2766_v10  ;;  %v351_v57 = vrot.slane %v350_v8, 2  ;;  %v426_v14 = vcombine.high %v2254_v33, %v2254_v33  ;;  %v442_v25 = vor.u32 %v441_v52, %v438_v13 }
  0x2e   : > { %v2339_v49 = vsel %vm2284_vm7, %v393_v28, %v397_v48  ;;  %v445_v29 = vshll.u32 %v410_v5, 16  ;;  %v450_v0 = vshrl.u32 %v2231_v62, 16  ;;  %v434_v50 = vcombine.high %v433_v36, %v433_v36  ;;  %v2351_v28 = vld [vmem:[%s2706_s1 + $0x8] sm:$0xff]  }
  0x2f   : > { %v356_v53 = vsel %vm2284_vm7, %v351_v57, %v355_v3  ;;  %v555_v56 = vcombine.low %v2316_v6, %v2339_v49  ;;  %v453_v8 = vshll.u32 %v2231_v62, 16  ;;  %2768 = vst [vmem:[#allocation18_spill] sm:$0xff] %v2351_v28  ;;  %v443_v13 = vrot.slane %v442_v25, 2  ;;  %v2358_v62 = vld [vmem:[%s2706_s1 + $0x40] sm:$0xff]   ;;  %1799 = vmatpush3.bf16.msra.mxu0 %v2351_v28 }
  0x30   : > { %v554_v52 = vcombine.low %v356_v53, %v2309_v35  ;;  %v447_v5 = vrot.slane %v445_v29, 7  ;;  %v452_v3 = vrot.slane %v450_v0, 6  ;;  %2769 = vst [vmem:[#allocation19_spill] sm:$0xff] %v2358_v62  ;;  %v459_v57 = vshll.u32 %v418_v60, 16  ;;  %v2367_v53 = vld [vmem:[%s2048_s28 + $0x3c] sm:$0x7]  ;;  %1800 = vmatprep.subr.bf16.mxu0 %v2358_v62 }
  0x31   : > { %v569_v48 = vrot.slane %v555_v56, %v2037_v7  ;;  %v455_v10 = vrot.slane %v453_v8, 7  ;;  %v464_v58 = vshrl.u32 %v2254_v33, 16  ;;  %v467_v29 = vshll.u32 %v2254_v33, 16  ;;  %v2373_v60 = vld [vmem:[%s2048_s28 + $0x44] sm:$0x7] }
  0x32   : > { %v562_v2 = vrot.slane %v554_v52, %v2037_v7  ;;  %v448_v25 = vsel %vm2284_vm7, %v443_v13, %v447_v5  ;;  %v473_v0 = vshll.u32 %v426_v14, 16  ;;  %v461_v4 = vrot.slane %v459_v57, 7  ;;  %v2377_v13 = vld [vmem:[%s2048_s28 + $0x48] sm:$0x7] }
  0x33   : > { %v456_v9 = vor.u32 %v455_v10, %v452_v3  ;;  %v466_v56 = vrot.slane %v464_v58, 6  ;;  %v478_v8 = vshrl.u32 %v433_v36, 16  ;;  %v469_v45 = vrot.slane %v467_v29, 7 }
  0x34   : > { %v570_v52 = vcombine.low %v562_v2, %v569_v48  ;;  %v475_v1 = vrot.slane %v473_v0, 7  ;;  %v481_v23 = vshll.u32 %v433_v36, 16  ;;  %v487_v5 = vshll.u32 %v434_v50, 16  ;;  %v2390_v48 = vld [vmem:[%s2706_s1] sm:$0xff]  }
  0x35   : > { %v457_v33 = vrot.slane %v456_v9, 2  ;;  %v480_v14 = vrot.slane %v478_v8, 6  ;;  %v994_v3 = vrot.slane %v2367_v53, %v2037_v7  ;;  %v470_v58 = vor.u32 %v469_v45, %v466_v56  ;;  %2770 = vst [vmem:[#allocation20_spill] sm:$0xff] %v2390_v48  ;;  %1801 = vmatpush3.bf16.msra.mxu0 %v2390_v48 }
  0x36   : > { %571 = vrot.lane.b32.xlu1 %v570_v52, %s1981_s17  ;;  %v483_v10 = vrot.slane %v481_v23, 7  ;;  %v1002_v2 = vrot.slane %v2370_v61, %v2037_v7  ;;  %v1010_v36 = vrot.slane %v2373_v60, %v2037_v7  ;;  %v489_v50 = vrot.slane %v487_v5, 7 }
  0x37   : > { %v2394_v9 = vsel %vm2284_vm7, %v457_v33, %v461_v4  ;;  %v995_v57 = vcombine.high %v994_v3, %v994_v3  ;;  %v1018_v23 = vrot.slane %v2377_v13, %v2037_v7  ;;  %v471_v45 = vrot.slane %v470_v58, 2 }
  0x38   : > { %2771 = vst [vmem:[#allocation21_spill] sm:$0xff] %v2394_v9  ;;  %v484_v29 = vor.u32 %v483_v10, %v480_v14  ;;  %v613_v0 = vcombine.low %v448_v25, %v2394_v9  ;;  %v1003_v56 = vcombine.high %v1002_v2, %v1002_v2  ;;  %v1011_v8 = vcombine.high %v1010_v36, %v1010_v36 }
  0x39   : > { %v1019_v62 = vcombine.high %v1018_v23, %v1018_v23  ;;  %v1021_v28 = vshrl.u32 %v994_v3, 16  ;;  %v1024_v24 = vshll.u32 %v994_v3, 16  ;;  %v2772_v15 = vmov 0.0  }
  0x3a   : > { %1894 = vmatprep.subr.bf16.mxu0 %v2772_v15  ;;  %v2403_v4 = vsel %vm2284_vm7, %v471_v45, %v475_v1  ;;  %v485_v33 = vrot.slane %v484_v29, 2  ;;  %v621_v5 = vrot.slane %v613_v0, %v2037_v7  ;;  %1098 = vrot.lane.b32.xlu1 %v570_v52, %s1980_s10  ;;  %v1030_v14 = vshll.u32 %v995_v57, 16 }
  0x3b   : > { %v1023_v25 = vrot.slane %v1021_v28, 6  ;;  %v1026_v58 = vrot.slane %v1024_v24, 7  ;;  %v1035_v10 = vshrl.u32 %v1002_v2, 16  ;;  %v1038_v48 = vshll.u32 %v1002_v2, 16 }
  0x3c   : > { %v2409_v9 = vsel %vm2284_vm7, %v485_v33, %v489_v50  ;;  %v1032_v3 = vrot.slane %v1030_v14, 7  ;;  %v1044_v15 = vshll.u32 %v1003_v56, 16  ;;  %v1049_v12 = vshrl.u32 %v1010_v36, 16 }
  0x3d   : > { %v614_v1 = vcombine.low %v2403_v4, %v2409_v9  ;;  %v1027_v45 = vor.u32 %v1026_v58, %v1023_v25  ;;  %v1037_v29 = vrot.slane %v1035_v10, 6  ;;  %v1040_v0 = vrot.slane %v1038_v48, 7 }
  0x3e   : > { %v1046_v26 = vrot.slane %v1044_v15, 7  ;;  %v1051_v52 = vrot.slane %v1049_v12, 6  ;;  %v1052_v57 = vshll.u32 %v1010_v36, 16  ;;  %v1058_v28 = vshll.u32 %v1011_v8, 16 }
  0x3f   : > { %v628_v24 = vrot.slane %v614_v1, %v2037_v7  ;;  %v1028_v2 = vrot.slane %v1027_v45, 2  ;;  %v1041_v47 = vor.u32 %v1040_v0, %v1037_v29  ;;  %v1063_v11 = vshrl.u32 %v1018_v23, 16 }
  0x40   : > { %v1054_v50 = vrot.slane %v1052_v57, 7  ;;  %v1060_v33 = vrot.slane %v1058_v28, 7  ;;  %v1066_v14 = vshll.u32 %v1018_v23, 16  ;;  %v1072_v56 = vshll.u32 %v1019_v62, 16 }
  0x41   : > { %v2414_v34 = vcombine.low %v621_v5, %v628_v24  ;;  %v1033_v25 = vsel %vm2284_vm7, %v1028_v2, %v1032_v3  ;;  %v1042_v58 = vrot.slane %v1041_v47, 2  ;;  %v1065_v48 = vrot.slane %v1063_v11, 6 }
  0x42   : > { %v1055_v15 = vor.u32 %v1054_v50, %v1051_v52  ;;  %v1068_v12 = vrot.slane %v1066_v14, 7  ;;  %v1074_v36 = vrot.slane %v1072_v56, 7  ;;  %v915_v8 = vcombine.high %v2070_v16, %v2070_v16 }
  0x43   : > { %630 = vrot.lane.b32.xlu0 %v2414_v34, %s1980_s10  ;;  %v2424_v23 = vsel %vm2284_vm7, %v1042_v58, %v1046_v26  ;;  %v923_v62 = vcombine.high %v2074_v17, %v2074_v17  ;;  %v931_v47 = vcombine.high %v2084_v20, %v2084_v20  ;;  %v939_v11 = vor.u32 %v2116_v38, %v2114_v37 }
  0x44   : > { %v1056_v5 = vrot.slane %v1055_v15, 2  ;;  %v1069_v10 = vor.u32 %v1068_v12, %v1065_v48  ;;  %v1121_v16 = vcombine.low %v1033_v25, %v2424_v23  ;;  %v953_v3 = vor.u32 %v2127_v42, %v2118_v39 }
  0x45   : > { %v940_v1 = vrot.slane %v939_v11, 2  ;;  %v956_v45 = vshll.u32 %v915_v8, 16  ;;  %v967_v26 = vor.u32 %v2144_v51, %v2129_v43  ;;  %v970_v29 = vshll.u32 %v923_v62, 16 }
  0x46   : > { %v672_v17 = vcombine.low %v2339_v49, %v2323_v46  ;;  %v2441_v20 = vsel %vm2284_vm7, %v1056_v5, %v1060_v33  ;;  %v1070_v37 = vrot.slane %v1069_v10, 2  ;;  %v954_v38 = vrot.slane %v953_v3, 2 }
  0x47   : > { %v1484_v0 = vcombine.low %v2424_v23, %v2441_v20  ;;  %v2773_v39 = vrot.slane %v2104_v32, 7  ;;  %v958_v52 = vrot.slane %v956_v45, 7  ;;  %v968_v43 = vrot.slane %v967_v26, 2 }
  0x48   : > { %v2451_v51 = vsel %vm2284_vm7, %v1070_v37, %v1074_v36  ;;  %v972_v46 = vrot.slane %v970_v29, 7  ;;  %v981_v49 = vor.u32 %v2151_v55, %v2149_v54  ;;  %v984_v57 = vshll.u32 %v931_v47, 16 }
  0x49   : > { %v945_v42 = vsel %vm2284_vm7, %v940_v1, %v2773_v39  ;;  %v1122_v28 = vcombine.low %v2441_v20, %v2451_v51  ;;  %v1129_v32 = vrot.slane %v1121_v16, %v2037_v7  ;;  %v2460_v24 = vsel %vm2284_vm7, %v954_v38, %v958_v52 }
  0x4a   : > { %v2774_v2 = vcombine.low %v2309_v35, %v2316_v6  ;;  %v2468_v33 = vsel %vm2284_vm7, %v968_v43, %v972_v46  ;;  %v982_v54 = vrot.slane %v981_v49, 2  ;;  %v986_v55 = vrot.slane %v984_v57, 7  ;;  %v258_v35 = vld [vmem:[%s2048_s28 + $0x38] sm:$0x7] }
  0x4b   : > { %v1100_v14 = vcombine.low %v945_v42, %v2460_v24  ;;  %v1136_v56 = vrot.slane %v1122_v28, %v2037_v7  ;;  %v686_v25 = vrot.slane %v672_v17, %v2037_v7  ;;  %v596_v58 = vcombine.low %v2367_v53, %v2370_v61  ;;  %v263_v17 = vld [vmem:[%s2048_s28 + $0x4c] sm:$0x7] }
  0x4c   : > { %v679_v50 = vrot.slane %v2774_v2, %v2037_v7  ;;  %v597_v48 = vcombine.low %v2373_v60, %v2377_v13  ;;  %v2775_v6 = vshrl.u32 %v2206_v44, 16  ;;  %v987_v12 = vsel %vm2284_vm7, %v982_v54, %v986_v55 }
  0x4d   : > { %v1271_v36 = vrot.slane %v258_v35, %v2037_v7  ;;  %v2776_v8 = vshll.u32 %v2206_v44, 16  ;;  %v2485_v47 = vcombine.low %v1129_v32, %v1136_v56  ;;  %v1101_v53 = vcombine.low %v2468_v33, %v987_v12 }
  0x4e   : > { %v1087_v15 = vrot.slane %v2775_v6, 6  ;;  %v1108_v11 = vrot.slane %v1100_v14, %v2037_v7  ;;  %v2489_v5 = vcombine.low %v679_v50, %v686_v25  ;;  %v1295_v3 = vcombine.low %v2171_v19, %v2193_v40  ;;  %v2778_v14 = vld [vmem:[#allocation5_spill] sm:$0xff] }
  0x4f   : > { %v1090_v62 = vrot.slane %v2776_v8, 7  ;;  %v1274_v10 = vshrl.u32 %v1271_v36, 16  ;;  %v1277_v16 = vshll.u32 %v1271_v36, 16  ;;  %1138 = vrot.lane.b32.xlu0 %v2485_v47, %s1980_s10  ;;  %v1115_v1 = vrot.slane %v1101_v53, %v2037_v7  ;;  %v2782_v53 = vld [vmem:[#allocation11_spill] sm:$0xff] }
  0x50   : > { %v604_v45 = vrot.slane %v596_v58, %v2037_v7  ;;  %v611_v26 = vrot.slane %v597_v48, %v2037_v7  ;;  %v1296_v29 = vcombine.low %v2224_v59, %v258_v35  ;;  %1891 = vmatmul.mubr.msk.bf16.vlgmr.msra.gmra.mxu1 %vm688_vm8, %v2489_v5  ;;  %v1315_v19 = vcombine.low %v2370_v61, %v2373_v60 }
  0x51   : > { %v1116_v37 = vcombine.low %v1108_v11, %v1115_v1  ;;  %v1276_v38 = vrot.slane %v1274_v10, 6  ;;  %v1279_v39 = vrot.slane %v1277_v16, 7  ;;  %1812 = vmatpush3.bf16.msra.mxu1 %v2102_v31  ;;  %v1316_v40 = vcombine.low %v2377_v13, %v263_v17  ;;  %v2783_v11 = vld [vmem:[#allocation12_spill] sm:$0xff]  ;;  %v2784_v16 = vld [vmem:[#allocation21_spill] sm:$0xff] }
  0x52   : > { %v1083_v42 = vcombine.high %v2206_v44, %v2206_v44  ;;  %v1091_v52 = vor.u32 %v1090_v62, %v1087_v15  ;;  %1813 = vmatprep.subr.bf16.mxu1 %v2125_v41  ;;  %v2512_v59 = vcombine.low %v604_v45, %v611_v26  ;;  %v1303_v43 = vrot.slane %v1295_v3, %v2037_v7  ;;  %v2780_v15 = vld [vmem:[#allocation8_spill] sm:$0xff] }
  0x53   : > { %1117 = vrot.lane.b32.xlu1 %v1116_v37, %s1981_s17  ;;  %1142 = vrot.lane.b32.xlu0 %v2489_v5, %s1982_s25  ;;  %v1310_v61 = vrot.slane %v1296_v29, %v2037_v7  ;;  %v1272_v13 = vcombine.high %v1271_v36, %v1271_v36  ;;  %v1323_v49 = vrot.slane %v1315_v19, %v2037_v7  ;;  %v2781_v36 = vld [vmem:[#allocation9_spill] sm:$0xff]  ;;  %v2786_v37 = vld [vmem:[#allocation15_spill] sm:$0xff] }
  0x54   : > { %v1092_v60 = vrot.slane %v1091_v52, 2  ;;  %v1094_v46 = vshll.u32 %v1083_v42, 16  ;;  %v1280_v44 = vor.u32 %v1279_v39, %v1276_v38  ;;  %v1330_v57 = vrot.slane %v1316_v40, %v2037_v7  ;;  %v2787_v38 = vld [vmem:[#allocation7_spill] sm:$0xff]  ;;  %v2788_v42 = vld [vmem:[#allocation16_spill] sm:$0xff] }
  0x55   : > { %1814 = vmatpush3.bf16.msra.mxu1 %v2176_v22  ;;  %v1283_v32 = vshll.u32 %v1272_v13, 16  ;;  %v2777_v2 = vcombine.low %v2159_v63, %v2097_v30  ;;  %v1311_v54 = vcombine.low %v1303_v43, %v1310_v61  ;;  %v1144_v55 = vcombine.low %v2460_v24, %v2468_v33 }
  0x56   : > { %v1096_v28 = vrot.slane %v1094_v46, 7  ;;  %1815 = vmatprep.subr.bf16.mxu1 %v2188_v27  ;;  %v2779_v56 = vcombine.low %v2077_v18, %v2778_v14  ;;  %v1460_v30 = vrot.slane %v263_v17, %v2037_v7  ;;  %v1281_v58 = vrot.slane %v1280_v44, 2  ;;  %v2785_v17 = vld [vmem:[#allocation13_spill] sm:$0xff]  ;;  %v2791_v46 = vld [vmem:[#allocation19_spill] sm:$0xff] }
  0x57   : > { %v2523_v50 = vrot.slane %v2777_v2, %v2037_v7  ;;  %1119 = vrot.lane.b32.xlu1 %v2512_v59, %s1982_s25  ;;  %1293 = vrot.lane.b32.xlu0 %v2489_v5, %s1980_s10  ;;  %v1285_v48 = vrot.slane %v1283_v32, 7  ;;  %v1331_v24 = vcombine.low %v1323_v49, %v1330_v57  ;;  %v1152_v18 = vrot.slane %v1144_v55, %v2037_v7  ;;  %v2792_v49 = vld [vmem:[#allocation20_spill] sm:$0xff] }
  0x58   : > { %v529_v25 = vrot.slane %v2779_v56, %v2037_v7  ;;  %v1097_v63 = vsel %vm2284_vm7, %v1092_v60, %v1096_v28  ;;  %v1463_v8 = vshrl.u32 %v1460_v30, 16  ;;  %v1466_v62 = vshll.u32 %v1460_v30, 16  ;;  %v2790_v60 = vld [vmem:[#allocation18_spill] sm:$0xff] }
  0x59   : > { %v1145_v35 = vcombine.low %v987_v12, %v1097_v63  ;;  %1816 = vmatpush3.bf16.msra.mxu1 %v2780_v15  ;;  %v1286_v12 = vsel %vm2284_vm7, %v1281_v58, %v1285_v48  ;;  %v1334_v3 = vcombine.low %v2784_v16, %v2403_v4  ;;  %v1461_v45 = vcombine.high %v1460_v30, %v1460_v30  ;;  %v2794_v30 = vld [vmem:[#allocation2_spill] sm:$0xff]  ;;  %v2795_v63 = vld [vmem:[#allocation4_spill] sm:$0xff]  ;;  %v2796_v58 = vld [vmem:[#allocation3_spill] sm:$0xff] }
  0x5a   : > { %v530_v6 = vcombine.low %v2523_v50, %v529_v25  ;;  %1817 = vmatprep.subr.bf16.mxu1 %v2781_v36  ;;  %v1335_v1 = vcombine.low %v2409_v9, %v1286_v12  ;;  %v1465_v26 = vrot.slane %v1463_v8, 6  ;;  %v1468_v29 = vrot.slane %v1466_v62, 7  ;;  %v2789_v9 = vld [vmem:[#allocation17_spill] sm:$0xff]  ;;  %v2797_v8 = vld [vmem:[#allocation6_spill] sm:$0xff] }
  0x5b   : > { %1312 = vrot.lane.b32.xlu0 %v1311_v54, %s1981_s17  ;;  %v1159_v33 = vrot.slane %v1145_v35, %v2037_v7  ;;  %1287 = vrot.lane.b32.xlu1 %v2512_v59, %s1980_s10  ;;  %v1342_v39 = vrot.slane %v1334_v3, %v2037_v7  ;;  %v1472_v4 = vshll.u32 %v1461_v45, 16  ;;  %v2793_v57 = vmov 0.0   ;;  %v2798_v3 = vld [vmem:[#allocation10_spill] sm:$0xff] }
  0x5c   : > { %v1349_v19 = vrot.slane %v1335_v1, %v2037_v7  ;;  %v1469_v40 = vor.u32 %v1468_v29, %v1465_v26 }
  0x5d   : > { %1818 = vmatpush3.bf16.msra.mxu1 %v2782_v53  ;;  %v1160_v10 = vcombine.low %v1152_v18, %v1159_v33  ;;  %v1474_v61 = vrot.slane %v1472_v4, 7 }
  0x5e   : > { %1819 = vmatprep.subr.bf16.mxu1 %v2783_v11  ;;  %v2569_v52 = vcombine.low %v1342_v39, %v1349_v19  ;;  %v1470_v43 = vrot.slane %v1469_v40, 2 }
  0x5f   : > { %1332 = vrot.lane.b32.xlu0 %v1331_v24, %s1982_s25  ;;  %1289 = vrot.lane.b32.xlu1 %v2414_v34, %s1981_s17 }
  0x60   : > { %v1475_v13 = vsel %vm2284_vm7, %v1470_v43, %v1474_v61 }
  0x61   : > { %1820 = vmatpush3.bf16.msra.mxu1 %v2785_v17  ;;  %v1485_v44 = vcombine.low %v2451_v51, %v1475_v13 }
  0x62   : > { %1821 = vmatprep.subr.bf16.mxu1 %v2786_v37 }
  0x63   : > { %1478 = vrot.lane.b32.xlu0 %v1160_v10, %s1980_s10  ;;  %1291 = vrot.lane.b32.xlu1 %v2787_v38, %s1982_s25  ;;  %v2587_v28 = vrot.slane %v1485_v44, %v2037_v7 }
  0x65   : > { %1822 = vmatpush3.bf16.msra.mxu1 %v2788_v42 }
  0x66   : > { %1823 = vmatprep.subr.bf16.mxu1 %v2789_v9 }
  0x67   : > { %1476 = vrot.lane.b32.xlu0 %v2485_v47, %s1981_s17  ;;  %1480 = vrot.lane.b32.xlu1 %v1331_v24, %s1981_s17  ;;  %v2581_v47 = vrot.slane %v1484_v0, %v2037_v7 }
  0x69   : > { %1824 = vmatpush3.bf16.msra.mxu1 %v2790_v60  ;;  %v1500_v32 = vcombine.low %v2581_v47, %v2587_v28 }
  0x6a   : > { %1825 = vmatprep.subr.bf16.mxu1 %v2791_v46 }
  0x6b   : > { %1482 = vrot.lane.b32.xlu1 %v2569_v52, %s1982_s25 }
  0x6d   : > { %1826 = vmatpush3.bf16.msra.mxu1 %v2792_v49 }
  0x6e   : > { %1902 = vmatprep.subr.bf16.mxu1 %v2793_v57 }
  0x8c   : > { %v553_v21 = vpop.permute.xlu0 %552 }
  0x8d   : > { %v691_v0 = vsel %vm688_vm8, %v530_v6, %v553_v21 }
  0x93   : > { %v650_v2 = vpop.permute.xlu1 %649 }
  0x97   : > { %v2591_v50 = vpop.permute.xlu0 %669 }
  0x9b   : > { %v1141_v23 = vpop.permute.xlu0 %1140 }
  0x9c   : > { %v591_v54 = vpop.permute.xlu1 %590 }
  0xa8   : > { %v572_v20 = vpop.permute.xlu1 %571 }
  0xa9   : > { %v694_v51 = vsel %vm692_vm9, %v691_v0, %v572_v20 }
  0xaa   : > { %v697_v25 = vsel %vm695_vm10, %v694_v51, %v591_v54 }
  0xb5   : > { %v631_v55 = vpop.permute.xlu0 %630 }
  0xb6   : > { %v2597_v7 = vsel %vm688_vm8, %v2512_v59, %v631_v55  ;;  %v1099_v59 = vpop.permute.xlu1 %1098 }
  0xb7   : > { %v703_v14 = vsel %vm692_vm9, %v2597_v7, %v650_v2  ;;  %v1163_v62 = vsel %vm688_vm8, %v2797_v8, %v1099_v59 }
  0xb8   : > { %v705_v56 = vsel %vm695_vm10, %v703_v14, %v2591_v50 }
  0xb9   : > { %850 = vmatprep.mubr.bf16.mxu0 %v705_v56 }
  0xba   : > { %851 = vmatmul.mubr.bf16.vlgmr.msra.gmra.mxu0 %v697_v25 }
  0xbb   : > { %1895 = vmatpush3.bf16.msra.mxu0 %v2794_v30  ;;  %1898 = vmatprep.mubr.msk.bf16.mxu0 %vm1979_vm0, %v2793_v57 }
  0xbc   : > { %1896 = vmatprep.subr.bf16.mxu0 %v2793_v57 }
  0xbf   : > { %1897 = vmatpush3.bf16.msra.mxu0 %v2795_v63 }
  0xc0   : > { %1836 = vmatprep.subr.bf16.mxu0 %v2796_v58 }
  0xc1   : > { %v1139_v48 = vpop.permute.xlu0 %1138 }
  0xc2   : > { %v1171_v35 = vsel %vm688_vm8, %v2414_v34, %v1139_v48  ;;  %1899 = vmatmul.mubr.msk.bf16.vlgmr.msra.gmra.mxu0 %vm688_vm8, %v1160_v10 }
  0xc3   : > { %1837 = vmatpush3.bf16.msra.mxu0 %v2102_v31  ;;  %v1173_v18 = vsel %vm692_vm9, %v1171_v35, %v1141_v23 }
  0xc4   : > { %1838 = vmatprep.subr.bf16.mxu0 %v2125_v41 }
  0xc5   : > { %v1118_v6 = vpop.permute.xlu1 %1117  ;;  %v1143_v24 = vpop.permute.xlu0 %1142 }
  0xc6   : > { %v1175_v33 = vsel %vm695_vm10, %v1173_v18, %v1143_v24  ;;  %v1165_v34 = vsel %vm692_vm9, %v1163_v62, %v1118_v6 }
  0xc7   : > { %1212 = vmatprep.mubr.bf16.mxu1 %v1175_v33  ;;  %1839 = vmatpush3.bf16.msra.mxu0 %v2176_v22 }
  0xc8   : > { %1840 = vmatprep.subr.bf16.mxu0 %v2188_v27 }
  0xc9   : > { %v1120_v12 = vpop.permute.xlu1 %1119  ;;  %v1294_v10 = vpop.permute.xlu0 %1293 }
  0xca   : > { %v1167_v16 = vsel %vm695_vm10, %v1165_v34, %v1120_v12  ;;  %v1361_v1 = vsel %vm688_vm8, %v2798_v3, %v1294_v10 }
  0xcb   : > { %1213 = vmatmul.mubr.bf16.vlgmr.msra.gmra.mxu1 %v1167_v16  ;;  %1841 = vmatpush3.bf16.msra.mxu0 %v2780_v15 }
  0xcc   : > { %1903 = vmatpush3.bf16.msra.mxu1 %v2794_v30  ;;  %1906 = vmatprep.mubr.msk.bf16.mxu1 %vm1979_vm0, %v2793_v57 }
  0xcd   : > { %v1313_v45 = vpop.permute.xlu0 %1312  ;;  %1904 = vmatprep.subr.bf16.mxu1 %v2793_v57  ;;  %1842 = vmatprep.subr.bf16.mxu0 %v2781_v36  ;;  %v1288_v26 = vpop.permute.xlu1 %1287 }
  0xce   : > { %v1363_v29 = vsel %vm692_vm9, %v1361_v1, %v1313_v45 }
  0xcf   : > { %1843 = vmatpush3.bf16.msra.mxu0 %v2782_v53 }
  0xd0   : > { %1905 = vmatpush3.bf16.msra.mxu1 %v2795_v63  ;;  %1844 = vmatprep.subr.bf16.mxu0 %v2783_v11 }
  0xd1   : > { %v1333_v38 = vpop.permute.xlu0 %1332  ;;  %1861 = vmatprep.subr.bf16.mxu1 %v2796_v58  ;;  %v1290_v39 = vpop.permute.xlu1 %1289 }
  0xd2   : > { %v1365_v19 = vsel %vm695_vm10, %v1363_v29, %v1333_v38 }
  0xd3   : > { %1907 = vmatmul.mubr.msk.bf16.vlgmr.msra.gmra.mxu1 %vm688_vm8, %v2569_v52  ;;  %1845 = vmatpush3.bf16.msra.mxu0 %v2785_v17 }
  0xd4   : > { %1862 = vmatpush3.bf16.msra.mxu1 %v2102_v31  ;;  %1846 = vmatprep.subr.bf16.mxu0 %v2786_v37  ;;  %v2799_v31 = vld [vmem:[#allocation14_spill] sm:$0xff] }
  0xd5   : > { %1863 = vmatprep.subr.bf16.mxu1 %v2125_v41  ;;  %v1292_v40 = vpop.permute.xlu1 %1291  ;;  %1402 = vmatprep.mubr.bf16.mxu0 %v1365_v19  ;;  %v1479_v4 = vpop.permute.xlu0 %1478  ;;  %v1353_v61 = vsel %vm688_vm8, %v2799_v31, %v1288_v26  ;;  %v1774_v19 = vld [vmem:[%s2707_s2] ss:$0 sm:$0xff] }
  0xd6   : > { %v1506_v43 = vsel %vm688_vm8, %v2489_v5, %v1479_v4 }
  0xd7   : > { %1847 = vmatpush3.bf16.msra.mxu0 %v2788_v42 }
  0xd8   : > { %1864 = vmatpush3.bf16.msra.mxu1 %v2176_v22  ;;  %1848 = vmatprep.subr.bf16.mxu0 %v2789_v9  ;;  %v1355_v22 = vsel %vm692_vm9, %v1353_v61, %v1290_v39 }
  0xd9   : > { %1865 = vmatprep.subr.bf16.mxu1 %v2188_v27  ;;  %v1481_v52 = vpop.permute.xlu1 %1480  ;;  %v1357_v27 = vsel %vm695_vm10, %v1355_v22, %v1292_v40 }
  0xda   : > { %v1508_v41 = vsel %vm692_vm9, %v1506_v43, %v1481_v52 }
  0xdb   : > { %1849 = vmatpush3.bf16.msra.mxu0 %v2790_v60 }
  0xdc   : > { %1866 = vmatpush3.bf16.msra.mxu1 %v2780_v15  ;;  %1850 = vmatprep.subr.bf16.mxu0 %v2791_v46  ;;  %v1967_v15 = vld [vmem:[%s2706_s1 + $0x88] sm:$0xff]  }
  0xdd   : > { %1867 = vmatprep.subr.bf16.mxu1 %v2781_v36  ;;  %v1483_v5 = vpop.permute.xlu1 %1482  ;;  %v1968_v36 = vld [vmem:[%s2706_s1 + $0x80] sm:$0xff]  }
  0xde   : > { %v1510_v13 = vsel %vm695_vm10, %v1508_v41, %v1483_v5 }
  0xdf   : > { %1851 = vmatpush3.bf16.msra.mxu0 %v2792_v49  ;;  %1547 = vmatprep.mubr.bf16.mxu1 %v1510_v13 }
  0xe0   : > { %1868 = vmatpush3.bf16.msra.mxu1 %v2782_v53  ;;  %1910 = vmatprep.subr.bf16.mxu0 %v2793_v57  ;;  %v1477_v53 = vpop.permute.xlu0 %1476 }
  0xe1   : > { %1869 = vmatprep.subr.bf16.mxu1 %v2783_v11  ;;  %v1502_v11 = vsel %vm692_vm9, %v2597_v7, %v1477_v53 }
  0xe2   : > { %1403 = vmatmul.mubr.bf16.vlgmr.msra.gmra.mxu0 %v1357_v27 }
  0xe3   : > { %1911 = vmatpush3.bf16.msra.mxu0 %v1967_v15  ;;  %1914 = vmatprep.mubr.msk.bf16.mxu0 %vm1979_vm0, %v2793_v57 }
  0xe4   : > { %1870 = vmatpush3.bf16.msra.mxu1 %v2785_v17  ;;  %1912 = vmatprep.subr.bf16.mxu0 %v2793_v57  ;;  %v1503_v17 = vsel %vm695_vm10, %v1502_v11, %v2591_v50 }
  0xe5   : > { %1871 = vmatprep.subr.bf16.mxu1 %v2786_v37 }
  0xe7   : > { %1913 = vmatpush3.bf16.msra.mxu0 %v1968_v36 }
  0xe8   : > { %1872 = vmatpush3.bf16.msra.mxu1 %v2788_v42 }
  0xe9   : > { %1873 = vmatprep.subr.bf16.mxu1 %v2789_v9 }
  0xea   : > { %1915 = vmatmul.mubr.msk.bf16.vlgmr.msra.gmra.mxu0 %vm688_vm8, %v1500_v32 }
  0xec   : > { %1874 = vmatpush3.bf16.msra.mxu1 %v2790_v60 }
  0xed   : > { %1875 = vmatprep.subr.bf16.mxu1 %v2791_v46 }
  0xf0   : > { %1876 = vmatpush3.bf16.msra.mxu1 %v2792_v49 }
  0xf3   : > { %1548 = vmatmul.mubr.bf16.vlgmr.msra.gmra.mxu1 %v1503_v17 }
 0x110   : > { %v893_v37 = vpop.f32.mrf.mxu1 }
 0x112   : > { %v1892_v42 = vpop.f32.mrf.mxu1 }
 0x114   : > { %v896_v9 = vpop.f32.mrf.mxu1 }
 0x116   : > { %v1893_v47 = vpop.f32.mrf.mxu1 }
 0x17a   : > { %v1802_v44 = vpop.f32.mrf.mxu0 }
 0x17c   : > { %v1803_v57 = vpop.f32.mrf.mxu0 }
 0x17d   : > { %v1804_v48 = vadd.f32 %v1803_v57, %v1802_v44 }
 0x17e   : > { %v1805_v28 = vpop.f32.mrf.mxu0 }
 0x17f   : > { %v894_v8 = vadd.f32 %v1804_v48, %v893_v37 }
 0x180   : > { %v1806_v32 = vpop.f32.mrf.mxu0 }
 0x181   : > { %v1807_v62 = vadd.f32 %v1806_v32, %v1805_v28 }
 0x182   : > { %v1255_v60 = vpop.f32.mrf.mxu0 }
 0x183   : > { %v897_v26 = vadd.f32 %v1807_v62, %v896_v9 }
 0x184   : > { %v1900_v21 = vpop.f32.mrf.mxu0 }
 0x186   : > { %v1258_v46 = vpop.f32.mrf.mxu0 }
 0x188   : > { %v1901_v2 = vpop.f32.mrf.mxu0 }
 0x18b   : > { %v1827_v54 = vpop.f32.mrf.mxu1 }
 0x18d   : > { %v1828_v23 = vpop.f32.mrf.mxu1 }
 0x18e   : > { %v1829_v63 = vadd.f32 %v1828_v23, %v1827_v54 }
 0x18f   : > { %v1830_v20 = vpop.f32.mrf.mxu1 }
 0x190   : > { %v1256_v24 = vadd.f32 %v1829_v63, %v1255_v60 }
 0x191   : > { %v1831_v49 = vpop.f32.mrf.mxu1 }
 0x192   : > { %v1832_v18 = vadd.f32 %v1831_v49, %v1830_v20  ;;  %v1262_v16 = vmax.f32 %v894_v8, %v1256_v24 }
 0x193   : > { %v1445_v0 = vpop.f32.mrf.mxu1 }
 0x194   : > { %v1259_v3 = vadd.f32 %v1832_v18, %v1258_v46 }
 0x195   : > { %v1908_v55 = vpop.f32.mrf.mxu1 }
 0x196   : > { %v1263_v4 = vmax.f32 %v897_v26, %v1259_v3 }
 0x197   : > { %v1448_v50 = vpop.f32.mrf.mxu1 }
 0x199   : > { %v1909_v51 = vpop.f32.mrf.mxu1 }
 0x1a2   : > { %v1852_v7 = vpop.f32.mrf.mxu0 }
 0x1a4   : > { %v1853_v14 = vpop.f32.mrf.mxu0 }
 0x1a5   : > { %v1854_v35 = vadd.f32 %v1853_v14, %v1852_v7 }
 0x1a6   : > { %v1855_v56 = vpop.f32.mrf.mxu0 }
 0x1a7   : > { %v1446_v34 = vadd.f32 %v1854_v35, %v1445_v0 }
 0x1a8   : > { %v1856_v25 = vpop.f32.mrf.mxu0 }
 0x1a9   : > { %v1857_v12 = vadd.f32 %v1856_v25, %v1855_v56  ;;  %v1452_v29 = vmax.f32 %v1262_v16, %v1446_v34 }
 0x1aa   : > { %v1590_v30 = vpop.f32.mrf.mxu0 }
 0x1ab   : > { %v1449_v38 = vadd.f32 %v1857_v12, %v1448_v50 }
 0x1ac   : > { %v1916_v59 = vpop.f32.mrf.mxu0 }
 0x1ad   : > { %v1453_v31 = vmax.f32 %v1263_v4, %v1449_v38 }
 0x1ae   : > { %v1593_v58 = vpop.f32.mrf.mxu0 }
 0x1b0   : > { %v1917_v6 = vpop.f32.mrf.mxu0 }
 0x1b3   : > { %v1877_v33 = vpop.f32.mrf.mxu1 }
 0x1b5   : > { %v1878_v10 = vpop.f32.mrf.mxu1 }
 0x1b6   : > { %v1879_v1 = vadd.f32 %v1878_v10, %v1877_v33 }
 0x1b7   : > { %v1880_v45 = vpop.f32.mrf.mxu1 }
 0x1b8   : > { %v1591_v39 = vadd.f32 %v1879_v1, %v1590_v30 }
 0x1b9   : > { %v1881_v40 = vpop.f32.mrf.mxu1 }
 0x1ba   : > { %v1597_v43 = vmax.f32 %v1452_v29, %v1591_v39  ;;  %v1882_v52 = vadd.f32 %v1881_v40, %v1880_v45 }
 0x1bc   : > { %v1606_v61 = vadd.f32 %v1774_v19, %v1597_v43  ;;  %v1594_v41 = vadd.f32 %v1882_v52, %v1593_v58 }
 0x1be   : > { %v1598_v5 = vmax.f32 %v1453_v31, %v1594_v41  ;;  %v1608_v22 = vmax.f32 %v1606_v61, 0.0 }
 0x1c0   : > { %v1607_v13 = vadd.f32 %v1774_v19, %v1598_v5  ;;  %v1628_v15 = vmul.f32 %v1608_v22, %v1608_v22 }
 0x1c2   : > { %v1609_v27 = vmax.f32 %v1607_v13, 0.0 }
 0x1c4   : > { %v1784_v36 = vpack.c.bf16 %v1609_v27, %v1608_v22  ;;  %v1620_v53 = vadd.f32 %v1609_v27, %v1608_v22  ;;  %v1629_v11 = vmul.f32 %v1609_v27, %v1609_v27 }
 0x1c6   : > { %1785 = vst [vmem:[%s235_s30] sm:$0xff] %v1784_v36   ;;  %v1621_v17 = vrot.slane %v1620_v53, 4  ;;  %v1630_v37 = vadd.f32 %v1629_v11, %v1628_v15 }
 0x1c8   : > { %v1622_v42 = vadd.f32 %v1621_v17, %v1620_v53  ;;  %v1631_v9 = vrot.slane %v1630_v37, 4 }
 0x1ca   : > { %v1623_v47 = vrot.slane %v1622_v42, 2  ;;  %v1632_v44 = vadd.f32 %v1631_v9, %v1630_v37 }
 0x1cc   : > { %v1624_v57 = vadd.f32 %v1623_v47, %v1622_v42  ;;  %v1633_v28 = vrot.slane %v1632_v44, 2 }
 0x1ce   : > { %v1625_v32 = vrot.slane %v1624_v57, 1  ;;  %v1634_v60 = vadd.f32 %v1633_v28, %v1632_v44 }
 0x1d0   : > { %v1626_v21 = vadd.f32 %v1625_v32, %v1624_v57  ;;  %v1635_v46 = vrot.slane %v1634_v60, 1 }
 0x1d2   : > { %1627 = vst [vmem:[%s239_s8] sm:$0x1] %v1626_v21  ;;  %v1636_v2 = vadd.f32 %v1635_v46, %v1634_v60 }
 0x1d4   : > { %1637 = vst [vmem:[%s242_s12] sm:$0x1] %v1636_v2 }
 0x1d5 PF: > { %s16_s18 = sadd.s32 1, %s1975_s18  }
 0x1d6   : > { %p13_p5 = scmp.ge.s32.totalorder %s16_s18, 4  }
 0x1d8   :  { %15 = sbr.rel (!%p13_p5) target bundleno = 1 (0x1), region = 86 }

// kernel: cnn_extractor_2d.11
= control target key start
LH: loop header
LB: loop body
LE: loop exit
PB: predicated region body
PF: predicated region fallthrough
CT: control target
= control target key end

     0   :  { %s106_s0 = inlined_call_operand.vmem [shape: bf16[8,128], index: 0, kind: input, shape index: {}]   ;;  %s107_s1 = inlined_call_operand.vmem [shape: f32[1,128], index: 1, kind: input, shape index: {}]   ;;  %s108_s2 = inlined_call_operand.vmem [shape: f32[1,128], index: 2, kind: input, shape index: {}]   ;;  %s109_s3 = inlined_call_operand.hbm [shape: f32[8,128], index: 3, kind: output, shape index: {}]  }
   0x1   :  { %v15_v0 = vld [vmem:[%s106_s0] sm:$0xf] }
   0x2   :  { %v48_v1 = vld [vmem:[%s107_s1] ss:$0 sm:$0xff]  ;;  %v16_v2 = vunpack.c.l.bf16 %v15_v0 }
   0x3   :  { %8 = vsyncpa [#allocation3], 0  ;;  %v49_v3 = vld [vmem:[%s108_s2] ss:$0 sm:$0xff]  ;;  %s73_s18 = smov [#allocation2]  }
   0x4   :  { %s40_s19 = sshll.u32 %s73_s18, 4  ;;  %v24_v4 = vmul.f32 %v48_v1, %v16_v2  ;;  %s41_s19 = int_to_ptr.vmem [resolvable:$true] %s40_s19 }
   0x5   :  { %s51_s20 = scalar_lea.vmem %s41_s19, 128  ;;  %p56_p1 = scmp.lt.s32.totalorder %s41_s19, %s41_s19 }
   0x6   :  { %v32_v5 = vadd.f32 %v49_v3, %v24_v4  ;;  %p52_p0 = scmp.ne.s32.totalorder %s41_s19, %s51_s20  ;;  %p57_p2 = scmp.lt.s32.totalorder %s51_s20, %s51_s20 }
   0x8   :  { %33 = vst [vmem:[#allocation2] sm:$0xff] %v32_v5  ;;  %p58_p3 = por %p57_p2, %p56_p1 }
   0xa   :  { %p59_p4 = pnand %p58_p3, %p52_p0 }
   0xc   :  { %62 = shalt.err (!%p59_p4)
}
   0xd   :  { %43 = dma.vmem_to_hbm [thread:$0]  %s41_s19, 128, %s109_s3, [#allocation3]  }
   0xe   :  { %71 = dma.done.wait [#allocation3], 128  }
   0xf   :  { %72 = vsyncadd [#allocation3], 4294967168 }
  0x10   :  { %47 = vsyncpa [#allocation3], 1 }

// kernel: cnn_extractor_2d.10
= control target key start
LH: loop header
LB: loop body
LE: loop exit
PB: predicated region body
PF: predicated region fallthrough
CT: control target
= control target key end

     0   :  { %v121_v0 = vlaneseq  ;;  %vm150_vm0 = vsmask.f32 256  ;;  %v2121_v4 = vmov 1966171168   ;;  %vm151_vm1 = vsmask.f32 1284  ;;  %s3047_s0 = inlined_call_operand.vmem [shape: bf16[2,4,3,3,64], index: 0, kind: input, shape index: {}]   ;;  %s3048_s1 = inlined_call_operand.vmem [shape: bf16[576,128], index: 1, kind: input, shape index: {}]   ;;  %s3049_s2 = inlined_call_operand.vmem [shape: f32[1,128], index: 2, kind: input, shape index: {}]   ;;  %s3050_s3 = inlined_call_operand.vmem [shape: bf16[8,128], index: 3, kind: output, shape index: {0}]   ;;  %s3051_s4 = inlined_call_operand.vmem [shape: f32[1,1,128], index: 4, kind: output, shape index: {1}]   ;;  %s3052_s5 = inlined_call_operand.vmem [shape: f32[1,1,128], index: 5, kind: output, shape index: {2}]  }
   0x1   :  { %v24_v1 = vld [vmem:[%s3047_s0 + $0xc] sm:$0x3]  ;;  %v2161_v2 = vld [vmem:[%s3047_s0 + $0xe] sm:$0x3]  ;;  %v2166_v3 = vld [vmem:[%s3047_s0 + $0x10] sm:$0x3]  ;;  %v119_v5 = vunpack.c.l.s4 %v2121_v4 }
   0x2   :  { %v36_v6 = vld [vmem:[%s3047_s0 + $0x24] sm:$0x3]  ;;  %v2174_v7 = vld [vmem:[%s3047_s0 + $0x26] sm:$0x3]  ;;  %v2179_v8 = vld [vmem:[%s3047_s0 + $0x28] sm:$0x3]  ;;  %v387_v12 = vcombine.low %v24_v1, %v2161_v2 }
   0x3   :  { %v120_v10 = vunpack.c.0.s8 %v119_v5  ;;  %v122_v11 = vshrl.u32 %v121_v0, 7  ;;  %v21_v14 = vld [vmem:[%s3047_s0 + $0x6] sm:$0x3]  ;;  %v22_v15 = vld [vmem:[%s3047_s0 + $0x8] sm:$0x3]  ;;  %v2195_v16 = vld [vmem:[%s3048_s1 + $0x78] sm:$0xff]   ;;  %v388_v17 = vcombine.low %v36_v6, %v2174_v7 }
   0x4   :  { %v33_v18 = vld [vmem:[%s3047_s0 + $0x1e] sm:$0x3]  ;;  %v34_v19 = vld [vmem:[%s3047_s0 + $0x20] sm:$0x3]  ;;  %v337_v20 = vcombine.low %v21_v14, %v22_v15  ;;  %v23_v21 = vld [vmem:[%s3047_s0 + $0xa] sm:$0x3]  ;;  %1836 = vmatprep.subr.bf16.mxu0 %v2195_v16 }
   0x5   :  { %v2207_v22 = vsub.s32 %v120_v10, %v122_v11  ;;  %v338_v23 = vcombine.low %v33_v18, %v34_v19  ;;  %v35_v24 = vld [vmem:[%s3047_s0 + $0x22] sm:$0x3]  ;;  %v493_v25 = vcombine.low %v22_v15, %v23_v21  ;;  %vm152_vm2 = vmor %vm150_vm0, %vm151_vm1  ;;  %vm153_vm3 = vsmask.f32 2312  ;;  %v2267_v51 = vld [vmem:[%s3048_s1 + $0x38] sm:$0xff]   ;;  %s2122_s21 = smov 64  }
   0x6   :  { %v494_v26 = vcombine.low %v34_v19, %v35_v24  ;;  %vm155_vm4 = vsmask.f32 3340  ;;  %vm157_vm5 = vsmask.f32 4368  ;;  %vm154_vm6 = vmor %vm152_vm2, %vm153_vm3  ;;  %v27_v61 = vld [vmem:[%s3047_s0 + $0x12] sm:$0x3]  ;;  %1837 = vmatpush3.bf16.msra.mxu0 %v2267_v51 }
   0x7   :  { %v2216_v27 = vrot.slane %v2161_v2, %v2207_v22  ;;  %v2219_v28 = vrot.slane %v36_v6, %v2207_v22  ;;  %v2223_v29 = vrot.slane %v2174_v7, %v2207_v22  ;;  %v395_v30 = vrot.slane %v387_v12, %v2207_v22  ;;  %vm156_vm7 = vmor %vm154_vm6, %vm155_vm4  ;;  %v2299_v62 = vld [vmem:[%s3047_s0 + $0x14] sm:$0x3]  ;;  %v39_v63 = vld [vmem:[%s3047_s0 + $0x2a] sm:$0x3] }
   0x8   :  { %v402_v31 = vrot.slane %v388_v17, %v2207_v22  ;;  %v2229_v32 = vrot.slane %v2166_v3, %v2207_v22  ;;  %v2233_v33 = vrot.slane %v2179_v8, %v2207_v22  ;;  %v2236_v34 = vrot.slane %v24_v1, %v2207_v22  ;;  %vm2282_vm8 = vmor %vm156_vm7, %vm157_vm5  ;;  %v2307_v0 = vld [vmem:[%s3047_s0 + $0x2c] sm:$0x3]  ;;  %v2319_v10 = vld [vmem:[%s3048_s1 + $0x70] sm:$0xff]  }
   0x9   :  { %v220_v35 = vcombine.high %v2216_v27, %v2216_v27  ;;  %v228_v36 = vcombine.high %v2219_v28, %v2219_v28  ;;  %v236_v37 = vcombine.high %v2223_v29, %v2223_v29  ;;  %v247_v38 = vshrl.u32 %v2216_v27, 16  ;;  %v2324_v11 = vld [vmem:[%s3048_s1 + $0x30] sm:$0xff]   ;;  %1838 = vmatprep.subr.bf16.mxu0 %v2319_v10  ;;  %v2445_v27 = vld [vmem:[%s3047_s0 + $0x4] sm:$0x3] }
   0xa   :  { %v256_v39 = vshrl.u32 %v2219_v28, 16  ;;  %v265_v40 = vshrl.u32 %v2223_v29, 16  ;;  %v403_v41 = vcombine.low %v395_v30, %v402_v31  ;;  %v212_v42 = vcombine.high %v2236_v34, %v2236_v34  ;;  %1839 = vmatpush3.bf16.msra.mxu0 %v2324_v11  ;;  %v2451_v28 = vld [vmem:[%s3048_s1 + $0x28] sm:$0xff]   ;;  %v2486_v13 = vld [vmem:[%s3048_s1 + $0x20] sm:$0xff]  }
   0xb   :  { %v2250_v43 = vshll.u32 %v220_v35, 16  ;;  %v2252_v44 = vshll.u32 %v228_v36, 16  ;;  %v2254_v45 = vshll.u32 %v236_v37, 16  ;;  %v238_v46 = vshrl.u32 %v2236_v34, 16  ;;  %v2369_v36 = vld [vmem:[%s3048_s1 + $0xb8] sm:$0xff]   ;;  %v2374_v37 = vld [vmem:[%s3048_s1 + $0x68] sm:$0xff]  }
   0xc   :  { %v2258_v47 = vrot.slane %v403_v41, %v2207_v22  ;;  %v2260_v48 = vshll.u32 %v212_v42, 16  ;;  %v345_v49 = vrot.slane %v337_v20, %v2207_v22  ;;  %v352_v50 = vrot.slane %v338_v23, %v2207_v22  ;;  %v2348_v23 = vld [vmem:[%s3048_s1 + $0xf8] sm:$0xff]   ;;  %3088 = vst [vmem:[#allocation5_spill] sm:$0xff] %v2374_v37  ;;  %1840 = vmatprep.subr.bf16.mxu0 %v2374_v37 }
   0xd   :  { %v2270_v52 = vrot.slane %v21_v14, %v2207_v22  ;;  %v2273_v53 = vrot.slane %v22_v15, %v2207_v22  ;;  %v2276_v54 = vrot.slane %v33_v18, %v2207_v22  ;;  %v2279_v55 = vrot.slane %v34_v19, %v2207_v22  ;;  %v2337_v18 = vld [vmem:[%s3047_s0] sm:$0x3]  ;;  %1858 = vmatprep.subr.bf16.mxu1 %v2348_v23 }
   0xe   :  { %3083 = vst [vmem:[#allocation2_spill] sm:$0xff] %v2258_v47  ;;  %411 = vrot.lane.b32.xlu0 %v2258_v47, %s2122_s21  ;;  %v353_v57 = vcombine.low %v345_v49, %v352_v50  ;;  %v501_v58 = vrot.slane %v493_v25, %v2207_v22  ;;  %v508_v59 = vrot.slane %v494_v26, %v2207_v22  ;;  %vm159_vm9 = vsmask.f32 5396  ;;  %3091 = vst [vmem:[#allocation6_spill] sm:$0xff] %v2451_v28 }
   0xf   :  { %v2291_v60 = vrot.slane %v23_v21, %v2207_v22  ;;  %v906_v1 = vcombine.high %v2270_v52, %v2270_v52  ;;  %v922_v4 = vcombine.high %v2276_v54, %v2276_v54  ;;  %v2332_v17 = vrot.slane %v35_v24, %v2207_v22  ;;  %vm160_vm10 = vmor %vm2282_vm8, %vm159_vm9  ;;  %1859 = vmatpush3.bf16.msra.mxu1 %v2369_v36 }
  0x10   :  { %v2327_v12 = vrot.slane %v353_v57, %v2207_v22  ;;  %v509_v14 = vcombine.low %v501_v58, %v508_v59  ;;  %vm161_vm11 = vsmask.f32 6424  ;;  %vm163_vm12 = vsmask.f32 7452  ;;  %1841 = vmatpush3.bf16.msra.mxu0 %v2451_v28  ;;  %3095 = vst [vmem:[#allocation10_spill] sm:$0xff] %v2486_v13 }
  0x11   :  { %v1042_v15 = vcombine.high %v2291_v60, %v2291_v60  ;;  %v2339_v19 = vshll.u32 %v906_v1, 16  ;;  %v2341_v20 = vshll.u32 %v922_v4, 16  ;;  %v1050_v25 = vcombine.high %v2332_v17, %v2332_v17  ;;  %vm162_vm13 = vmor %vm160_vm10, %vm161_vm11  ;;  %v2413_v1 = vld [vmem:[%s3047_s0 + $0x1a] sm:$0x3] }
  0x12   :  { %3086 = vst [vmem:[#allocation3_spill] sm:$0xff] %v2327_v12  ;;  %361 = vrot.lane.b32.xlu0 %v2327_v12, %s2122_s21  ;;  %v2353_v24 = vrot.slane %v509_v14, %v2207_v22  ;;  %v417_v31 = vcombine.low %v27_v61, %v2299_v62  ;;  %v418_v35 = vcombine.low %v39_v63, %v2307_v0  ;;  %vm2390_vm14 = vmor %vm162_vm13, %vm163_vm12  ;;  %vm543_vm15 = vcmask 523264  }
  0x13   :  { %v2357_v26 = vshll.u32 %v1042_v15, 16  ;;  %v2376_v41 = vshll.u32 %v1050_v25, 16  ;;  %v2381_v42 = vrot.slane %v27_v61, %v2207_v22  ;;  %v2385_v49 = vrot.slane %v2299_v62, %v2207_v22  ;;  %v2403_v61 = vld [vmem:[%s3047_s0 + $0x2] sm:$0x3] }
  0x14   :  { %3087 = vst [vmem:[#allocation4_spill] sm:$0xff] %v2353_v24  ;;  %517 = vrot.lane.b32.xlu1 %v2353_v24, %s2122_s21  ;;  %v2388_v50 = vrot.slane %v39_v63, %v2207_v22  ;;  %v425_v57 = vrot.slane %v417_v31, %v2207_v22  ;;  %v432_v58 = vrot.slane %v418_v35, %v2207_v22  ;;  %v2408_v63 = vld [vmem:[%s3047_s0 + $0x18] sm:$0x3]  ;;  %v2470_v31 = vld [vmem:[%s3048_s1 + $0xb0] sm:$0xff]   ;;  %v2475_v35 = vld [vmem:[%s3048_s1 + $0x60] sm:$0xff]   ;;  %vm2124_vm0 = vmmov 0  }
  0x15   :  { %v2398_v59 = vrot.slane %v2307_v0, %v2207_v22  ;;  %v124_v4 = vrot.slane %v2337_v18, %v2207_v22  ;;  %v245_v14 = vsel %vm2390_vm14, %v238_v46, %v2260_v48  ;;  %v2428_v15 = vsel %vm2390_vm14, %v247_v38, %v2250_v43  ;;  %v2460_v43 = vld [vmem:[%s3048_s1 + $0xf0] sm:$0xff]   ;;  %3093 = vst [vmem:[#allocation8_spill] sm:$0xff] %v2470_v31 }
  0x16   :  { %v263_v25 = vsel %vm2390_vm14, %v256_v39, %v2252_v44  ;;  %v2440_v34 = vsel %vm2390_vm14, %v265_v40, %v2254_v45  ;;  %v441_v38 = vcombine.low %v245_v14, %v2428_v15  ;;  %v433_v39 = vcombine.low %v425_v57, %v432_v58  ;;  %3092 = vst [vmem:[#allocation7_spill] sm:$0xff] %v2460_v43 }
  0x17   :  { %v442_v29 = vcombine.low %v263_v25, %v2440_v34  ;;  %v974_v40 = vcombine.high %v2381_v42, %v2381_v42  ;;  %v990_v44 = vcombine.high %v2388_v50, %v2388_v50  ;;  %v125_v48 = vcombine.high %v124_v4, %v124_v4  ;;  %3094 = vst [vmem:[#allocation9_spill] sm:$0xff] %v2475_v35 }
  0x18   :  { %v449_v57 = vrot.slane %v441_v38, %v2207_v22  ;;  %v2480_v14 = vrot.slane %v433_v39, %v2207_v22  ;;  %1860 = vmatprep.subr.bf16.mxu1 %v2460_v43  ;;  %v132_v30 = vrot.slane %v2403_v61, %v2207_v22  ;;  %v140_v38 = vrot.slane %v2408_v63, %v2207_v22  ;;  %v2499_v39 = vld [vmem:[%s3047_s0 + $0x1c] sm:$0x3] }
  0x19   :  { %v456_v58 = vrot.slane %v442_v29, %v2207_v22  ;;  %v1005_v25 = vshll.u32 %v974_v40, 16  ;;  %v2488_v9 = vshll.u32 %v990_v44, 16  ;;  %v148_v29 = vrot.slane %v2413_v1, %v2207_v22  ;;  %1861 = vmatpush3.bf16.msra.mxu1 %v2470_v31  ;;  %1842 = vmatprep.subr.bf16.mxu0 %v2475_v35  ;;  %v2506_v40 = vld [vmem:[%s3048_s1 + $0xe8] sm:$0xff]  }
  0x1a   :  { %3096 = vst [vmem:[#allocation11_spill] sm:$0xff] %v2506_v40  ;;  %1095 = vrot.lane.b32.xlu0 %v2480_v14, %s2122_s21  ;;  %v166_v21 = vshrl.u32 %v124_v4, 16  ;;  %v171_v6 = vshll.u32 %v125_v48, 16  ;;  %v281_v5 = vrot.slane %v2445_v27, %v2207_v22  ;;  %v133_v46 = vcombine.high %v132_v30, %v132_v30  ;;  %1843 = vmatpush3.bf16.msra.mxu0 %v2486_v13  ;;  %v2532_v13 = vld [vmem:[%s3048_s1 + $0x18] sm:$0xff]  }
  0x1b   :  { %v457_v44 = vcombine.low %v449_v57, %v456_v58  ;;  %v141_v45 = vcombine.high %v140_v38, %v140_v38  ;;  %v149_v47 = vcombine.high %v148_v29, %v148_v29  ;;  %v175_v12 = vshrl.u32 %v132_v30, 16  ;;  %1862 = vmatprep.subr.bf16.mxu1 %v2506_v40  ;;  %v2517_v57 = vld [vmem:[%s3048_s1 + $0xa8] sm:$0xff]   ;;  %v2527_v30 = vld [vmem:[%s3048_s1 + $0x58] sm:$0xff]  }
  0x1c   :  { %3097 = vst [vmem:[#allocation12_spill] sm:$0xff] %v2517_v57  ;;  %v173_v4 = vsel %vm2390_vm14, %v166_v21, %v171_v6  ;;  %v184_v48 = vshrl.u32 %v140_v38, 16  ;;  %v193_v24 = vshrl.u32 %v148_v29, 16  ;;  %3099 = vst [vmem:[#allocation14_spill] sm:$0xff] %v2527_v30  ;;  %v180_v35 = vshll.u32 %v133_v46, 16  ;;  %v2538_v6 = vld [vmem:[%s3048_s1 + $0xe0] sm:$0xff]   ;;  %1844 = vmatprep.subr.bf16.mxu0 %v2527_v30 }
  0x1d   :  { %v2520_v58 = vrot.slane %v457_v44, %v2207_v22  ;;  %v189_v40 = vshll.u32 %v141_v45, 16  ;;  %v198_v28 = vshll.u32 %v149_v47, 16  ;;  %v282_v44 = vcombine.high %v281_v5, %v281_v5  ;;  %1863 = vmatpush3.bf16.msra.mxu1 %v2517_v57  ;;  %v2552_v45 = vld [vmem:[%s3048_s1 + $0xa0] sm:$0xff]   ;;  %v2565_v30 = vld [vmem:[%s3048_s1 + $0x50] sm:$0xff]  }
  0x1e   :  { %v289_v21 = vrot.slane %v2499_v39, %v2207_v22  ;;  %v292_v38 = vshrl.u32 %v281_v5, 16  ;;  %v982_v46 = vcombine.high %v2385_v49, %v2385_v49  ;;  %v998_v47 = vcombine.high %v2398_v59, %v2398_v59  ;;  %1845 = vmatpush3.bf16.msra.mxu0 %v2532_v13  ;;  %1864 = vmatprep.subr.bf16.mxu1 %v2538_v6 }
  0x1f   :  { %3098 = vst [vmem:[#allocation13_spill] sm:$0xff] %v2520_v58  ;;  %465 = vrot.lane.b32.xlu1 %v2520_v58, %s2122_s21  ;;  %v182_v29 = vsel %vm2390_vm14, %v175_v12, %v180_v35  ;;  %v191_v58 = vsel %vm2390_vm14, %v184_v48, %v189_v40  ;;  %v200_v5 = vsel %vm2390_vm14, %v193_v24, %v198_v28  ;;  %v297_v57 = vshll.u32 %v282_v44, 16  ;;  %v2570_v35 = vld [vmem:[%s3048_s1 + $0x10] sm:$0xff]  }
  0x20   :  { %v363_v31 = vcombine.low %v173_v4, %v182_v29  ;;  %v364_v37 = vcombine.low %v191_v58, %v200_v5  ;;  %v290_v43 = vcombine.high %v289_v21, %v289_v21  ;;  %v301_v12 = vshrl.u32 %v289_v21, 16  ;;  %v29_v58 = vld [vmem:[%s3047_s0 + $0x16] sm:$0x3]  ;;  %1846 = vmatprep.subr.bf16.mxu0 %v2565_v30 }
  0x21   :  { %v299_v24 = vsel %vm2390_vm14, %v292_v38, %v297_v57  ;;  %v3100_v28 = vshrl.u32 %v2381_v42, 16  ;;  %v1009_v48 = vshrl.u32 %v2385_v49, 16  ;;  %v1014_v44 = vshll.u32 %v982_v46, 16  ;;  %1865 = vmatpush3.bf16.msra.mxu1 %v2552_v45  ;;  %v2592_v49 = vld [vmem:[%s3048_s1 + $0xd8] sm:$0xff]  }
  0x22   :  { %v371_v4 = vrot.slane %v363_v31, %v2207_v22  ;;  %v378_v57 = vrot.slane %v364_v37, %v2207_v22  ;;  %v306_v21 = vshll.u32 %v290_v43, 16  ;;  %v519_v42 = vcombine.low %v182_v29, %v299_v24  ;;  %1847 = vmatpush3.bf16.msra.mxu0 %v2570_v35  ;;  %1866 = vmatprep.subr.bf16.mxu1 %v2592_v49 }
  0x23   :  { %v1007_v40 = vsel %vm2390_vm14, %v3100_v28, %v1005_v25  ;;  %v41_v25 = vld [vmem:[%s3047_s0 + $0x2e] sm:$0x3]  ;;  %v2596_v38 = vsel %vm2390_vm14, %v1009_v48, %v1014_v44  ;;  %v3101_v31 = vshrl.u32 %v2388_v50, 16  ;;  %v1027_v43 = vshrl.u32 %v2398_v59, 16  ;;  %v2613_v50 = vld [vmem:[%s3048_s1 + $0x98] sm:$0xff]  }
  0x24   :  { %v1032_v46 = vshll.u32 %v998_v47, 16  ;;  %v379_v29 = vcombine.low %v371_v4, %v378_v57  ;;  %v308_v24 = vsel %vm2390_vm14, %v301_v12, %v306_v21  ;;  %v527_v28 = vrot.slane %v519_v42, %v2207_v22 }
  0x25   :  { %v1025_v37 = vsel %vm2390_vm14, %v3101_v31, %v2488_v9  ;;  %v1097_v48 = vcombine.low %v1007_v40, %v2596_v38  ;;  %v520_v9 = vcombine.low %v200_v5, %v308_v24  ;;  %v467_v47 = vcombine.low %v2403_v61, %v2445_v27  ;;  %v2626_v40 = vld [vmem:[%s3048_s1 + $0x48] sm:$0xff]   ;;  %1867 = vmatpush3.bf16.msra.mxu1 %v2613_v50 }
  0x26   :  { %v2617_v59 = vsel %vm2390_vm14, %v1027_v43, %v1032_v46  ;;  %v468_v12 = vcombine.low %v2413_v1, %v2499_v39  ;;  %v2629_v44 = vrot.slane %v379_v29, %v2207_v22  ;;  %v1353_v57 = vcombine.low %v2299_v62, %v29_v58  ;;  %v2638_v27 = vld [vmem:[%s3048_s1 + $0x8] sm:$0xff]   ;;  %1848 = vmatprep.subr.bf16.mxu0 %v2626_v40  ;;  %v2648_v62 = vld [vmem:[%s3048_s1 + $0xd0] sm:$0xff]  }
  0x27   :  { %v1098_v5 = vcombine.low %v1025_v37, %v2617_v59  ;;  %v1105_v4 = vrot.slane %v1097_v48, %v2207_v22  ;;  %v534_v39 = vrot.slane %v520_v9, %v2207_v22  ;;  %v475_v21 = vrot.slane %v467_v47, %v2207_v22  ;;  %1849 = vmatpush3.bf16.msra.mxu0 %v2638_v27  ;;  %v2667_v47 = vld [vmem:[%s3048_s1 + $0x40] sm:$0xff]  }
  0x28   :  { %v482_v42 = vrot.slane %v468_v12, %v2207_v22  ;;  %v1354_v31 = vcombine.low %v2307_v0, %v41_v25  ;;  %1069 = vrot.lane.b32.xlu1 %v2629_v44, %s2122_s21  ;;  %v1361_v43 = vrot.slane %v1353_v57, %v2207_v22  ;;  %v1543_v46 = vrot.slane %v29_v58, %v2207_v22  ;;  %v2659_v0 = vld [vmem:[%s3048_s1 + $0x90] sm:$0xff]  }
  0x29   :  { %v1112_v37 = vrot.slane %v1098_v5, %v2207_v22  ;;  %v1551_v29 = vrot.slane %v41_v25, %v2207_v22  ;;  %v535_v24 = vcombine.low %v527_v28, %v534_v39  ;;  %1868 = vmatprep.subr.bf16.mxu1 %v2648_v62  ;;  %v2673_v28 = vld [vmem:[%s3048_s1] sm:$0xff]   ;;  %1850 = vmatprep.subr.bf16.mxu0 %v2667_v47 }
  0x2a   :  { %v483_v48 = vcombine.low %v475_v21, %v482_v42  ;;  %v1368_v9 = vrot.slane %v1354_v31, %v2207_v22  ;;  %v1544_v25 = vcombine.high %v1543_v46, %v1543_v46  ;;  %v1554_v5 = vshrl.u32 %v1543_v46, 16  ;;  %1869 = vmatpush3.bf16.msra.mxu1 %v2659_v0  ;;  %3102 = vst [vmem:[#allocation15_spill] sm:$0xff] %v2673_v28 }
  0x2b   :  { %v1113_v58 = vcombine.low %v1105_v4, %v1112_v37  ;;  %v1552_v12 = vcombine.high %v1551_v29, %v1551_v29  ;;  %v2676_v57 = vrot.slane %v535_v24, %v2207_v22  ;;  %v1563_v42 = vshrl.u32 %v1551_v29, 16  ;;  %v2685_v4 = vld [vmem:[%s3048_s1 + $0xc8] sm:$0xff]   ;;  %v2700_v29 = vld [vmem:[%s3048_s1 + $0xc0] sm:$0xff]   ;;  %1851 = vmatpush3.bf16.msra.mxu0 %v2673_v28 }
  0x2c   :  { %v2679_v39 = vrot.slane %v483_v48, %v2207_v22  ;;  %v1369_v21 = vcombine.low %v1361_v43, %v1368_v9  ;;  %v1559_v37 = vshll.u32 %v1544_v25, 16  ;;  %v2693_v24 = vld [vmem:[%s3048_s1 + $0x88] sm:$0xff]   ;;  %v309_v43 = vcombine.low %v2337_v18, %v2403_v61  ;;  %3104 = vst [vmem:[#allocation17_spill] sm:$0xff] %v2700_v29  ;;  %1870 = vmatprep.subr.bf16.mxu1 %v2685_v4 }
  0x2d   :  { %v2688_v31 = vrot.slane %v1113_v58, %v2207_v22  ;;  %v1568_v46 = vshll.u32 %v1552_v12, 16  ;;  %1123 = vrot.lane.b32.xlu0 %v2676_v57, %s2122_s21  ;;  %v310_v9 = vcombine.low %v2408_v63, %v2413_v1  ;;  %v1298_v58 = vcombine.high %v2229_v32, %v2229_v32 }
  0x2e   :  { %v2705_v48 = vrot.slane %v1369_v21, %v2207_v22  ;;  %v2716_v18 = vsel %vm2390_vm14, %v1554_v5, %v1559_v37  ;;  %v317_v25 = vrot.slane %v309_v43, %v2207_v22  ;;  %v1308_v63 = vshrl.u32 %v2229_v32, 16  ;;  %1871 = vmatpush3.bf16.msra.mxu1 %v2693_v24  ;;  %v2731_v5 = vld [vmem:[%s3048_s1 + $0x80] sm:$0xff]  }
  0x2f   :  { %3103 = vst [vmem:[#allocation16_spill] sm:$0xff] %v2688_v31  ;;  %1121 = vrot.lane.b32.xlu1 %v2688_v31, %s2122_s21  ;;  %v2720_v61 = vsel %vm2390_vm14, %v1563_v42, %v1568_v46  ;;  %v3076_v1 = vmov 0.0   ;;  %v324_v12 = vrot.slane %v310_v9, %v2207_v22  ;;  %v1306_v21 = vcombine.high %v2233_v33, %v2233_v33 }
  0x30   :  { %2032 = vmatprep.subr.bf16.mxu0 %v3076_v1  ;;  %v1313_v42 = vshll.u32 %v1298_v58, 16  ;;  %v914_v37 = vcombine.high %v2273_v53, %v2273_v53  ;;  %1872 = vmatprep.subr.bf16.mxu1 %v2700_v29  ;;  %v1317_v32 = vshrl.u32 %v2233_v33, 16  ;;  %v930_v46 = vcombine.high %v2279_v55, %v2279_v55 }
  0x31   :  { %v3105_v43 = vshrl.u32 %v2270_v52, 16  ;;  %v3106_v1 = vshrl.u32 %v2276_v54, 16  ;;  %1325 = vrot.lane.b32.xlu0 %v2679_v39, %s2122_s21  ;;  %v325_v31 = vcombine.low %v317_v25, %v324_v12  ;;  %v1322_v29 = vshll.u32 %v1306_v21, 16 }
  0x32   :  { %v1315_v33 = vsel %vm2390_vm14, %v1308_v63, %v1313_v42  ;;  %v941_v28 = vshrl.u32 %v2273_v53, 16  ;;  %v959_v54 = vshrl.u32 %v2279_v55, 16  ;;  %1873 = vmatpush3.bf16.msra.mxu1 %v2731_v5  ;;  %v3107_v25 = vshrl.u32 %v2291_v60, 16 }
  0x33   :  { %v939_v9 = vsel %vm2390_vm14, %v3105_v43, %v2339_v19  ;;  %v957_v58 = vsel %vm2390_vm14, %v3106_v1, %v2341_v20  ;;  %1377 = vrot.lane.b32.xlu1 %v2705_v48, %s2122_s21  ;;  %v1379_v52 = vcombine.low %v2428_v15, %v1315_v33  ;;  %v946_v19 = vshll.u32 %v914_v37, 16  ;;  %1885 = vmatprep.subr.bf16.mxu1 %v2195_v16 }
  0x34   :  { %v964_v43 = vshll.u32 %v930_v46, 16  ;;  %v1324_v20 = vsel %vm2390_vm14, %v1317_v32, %v1322_v29  ;;  %v1059_v53 = vsel %vm2390_vm14, %v3107_v25, %v2357_v26  ;;  %v3108_v63 = vshrl.u32 %v2332_v17, 16 }
  0x35   :  { %v1380_v55 = vcombine.low %v2440_v34, %v1324_v20  ;;  %v1387_v1 = vrot.slane %v1379_v52, %v2207_v22  ;;  %v948_v29 = vsel %vm2390_vm14, %v941_v28, %v946_v19  ;;  %v3110_v19 = vcombine.low %v2174_v7, %v2179_v8 }
  0x36   :  { %v1068_v15 = vsel %vm2390_vm14, %v3108_v63, %v2376_v41  ;;  %v966_v60 = vsel %vm2390_vm14, %v959_v54, %v964_v43  ;;  %v1071_v12 = vcombine.low %v939_v9, %v948_v29  ;;  %v1125_v21 = vcombine.low %v948_v29, %v1059_v53 }
  0x37   :  { %v1072_v26 = vcombine.low %v957_v58, %v966_v60  ;;  %v1126_v42 = vcombine.low %v966_v60, %v1068_v15  ;;  %v1394_v17 = vrot.slane %v1380_v55, %v2207_v22  ;;  %v3109_v58 = vcombine.low %v2161_v2, %v2166_v3  ;;  %v2815_v2 = vld [vmem:[%s3048_s1 + $0x118] sm:$0xff]   ;;  %v2836_v15 = vld [vmem:[%s3048_s1 + $0x108] sm:$0xff]  }
  0x38   :  { %v1133_v41 = vrot.slane %v1125_v21, %v2207_v22  ;;  %v1079_v34 = vrot.slane %v1071_v12, %v2207_v22  ;;  %v2805_v54 = vrot.slane %v3110_v19, %v2207_v22  ;;  %v332_v53 = vrot.slane %v325_v31, %v2207_v22  ;;  %v2827_v31 = vld [vmem:[%s3048_s1 + $0x110] sm:$0xff]   ;;  %v2854_v12 = vld [vmem:[%s3048_s1 + $0x100] sm:$0xff]   ;;  %v3113_v21 = vld [vmem:[#allocation5_spill] sm:$0xff] }
  0x39   :  { %v1140_v37 = vrot.slane %v1126_v42, %v2207_v22  ;;  %v1086_v32 = vrot.slane %v1072_v26, %v2207_v22  ;;  %v1395_v46 = vcombine.low %v1387_v1, %v1394_v17  ;;  %v2799_v52 = vrot.slane %v3109_v58, %v2207_v22  ;;  %v3114_v42 = vld [vmem:[#allocation8_spill] sm:$0xff]  ;;  %v3115_v17 = vld [vmem:[#allocation6_spill] sm:$0xff] }
  0x3a   :  { %v3111_v63 = vmov 0.0   ;;  %v1576_v55 = vcombine.low %v2617_v59, %v2720_v61 }
  0x3b   :  { %v1141_v33 = vcombine.low %v1133_v41, %v1140_v37  ;;  %v1087_v28 = vcombine.low %v1079_v34, %v1086_v32  ;;  %v2786_v56 = vrot.slane %v1395_v46, %v2207_v22  ;;  %v1343_v43 = vcombine.low %v2799_v52, %v2805_v54  ;;  %v3116_v41 = vld [vmem:[#allocation11_spill] sm:$0xff]  ;;  %v3117_v37 = vld [vmem:[#allocation9_spill] sm:$0xff]  ;;  %v3118_v34 = vld [vmem:[#allocation12_spill] sm:$0xff] }
  0x3c   :  { %v2847_v29 = vrot.slane %v1576_v55, %v2207_v22  ;;  %v3119_v32 = vld [vmem:[#allocation10_spill] sm:$0xff]  ;;  %v2120_v54 = vld [vmem:[%s3048_s1 + $0x78] sm:$0xff]  }
  0x3d   :  { %v2789_v9 = vrot.slane %v1141_v33, %v2207_v22  ;;  %1573 = vrot.lane.b32.xlu0 %v2786_v56, %s2122_s21  ;;  %v1094_v60 = vrot.slane %v1087_v28, %v2207_v22  ;;  %v3120_v33 = vld [vmem:[#allocation14_spill] sm:$0xff]  ;;  %v3121_v28 = vld [vmem:[#allocation4_spill] sm:$0xff] }
  0x3f   :  { %1571 = vrot.lane.b32.xlu1 %v2789_v9, %s2122_s21 }
  0x80   :  { %v412_v20 = vpop.permute.xlu0 %411 }
  0x81   :  { %v550_v25 = vsel %vm543_vm15, %v2629_v44, %v412_v20  ;;  %v3122_v20 = vld [vmem:[#allocation15_spill] sm:$0xff] }
  0x82   :  { %811 = vmatprep.mubr.bf16.mxu0 %v550_v25  ;;  %v3123_v25 = vld [vmem:[#allocation3_spill] sm:$0xff] }
  0x84   :  { %v362_v3 = vpop.permute.xlu0 %361 }
  0x85   :  { %v546_v7 = vsel %vm543_vm15, %v332_v53, %v362_v3  ;;  %v3124_v3 = vld [vmem:[#allocation17_spill] sm:$0xff] }
  0x86   :  { %v2818_v8 = vpop.permute.xlu1 %517  ;;  %812 = vmatmul.mubr.bf16.vlgmr.msra.gmra.mxu0 %v546_v7 }
  0x87   :  { %2033 = vmatpush3.bf16.msra.mxu0 %v2815_v2  ;;  %v558_v44 = vsel %vm543_vm15, %v2679_v39, %v2818_v8  ;;  %2040 = vmatprep.mubr.msk.bf16.mxu0 %vm2124_vm0, %v3111_v63  ;;  %v1575_v39 = vcombine.low %v2596_v38, %v2716_v18 }
  0x88   :  { %851 = vmatprep.mubr.bf16.mxu1 %v558_v44  ;;  %2034 = vmatprep.subr.bf16.mxu0 %v3111_v63 }
  0x89   :  { %v2844_v1 = vrot.slane %v1575_v39, %v2207_v22  ;;  %v3125_v39 = vld [vmem:[#allocation13_spill] sm:$0xff] }
  0x8b   :  { %2035 = vmatpush3.bf16.msra.mxu0 %v2827_v31  ;;  %v1591_v59 = vcombine.low %v2844_v1, %v2847_v29 }
  0x8c   :  { %2036 = vmatprep.subr.bf16.mxu0 %v3111_v63  ;;  %v2856_v38 = vpop.permute.xlu0 %1095 }
  0x8d   :  { %v1155_v26 = vsel %vm543_vm15, %v1094_v60, %v2856_v38 }
  0x8f   :  { %2037 = vmatpush3.bf16.msra.mxu0 %v2836_v15 }
  0x90   :  { %2038 = vmatprep.subr.bf16.mxu0 %v3111_v63 }
  0x91   :  { %v466_v18 = vpop.permute.xlu1 %465 }
  0x92   :  { %v2863_v61 = vsel %vm543_vm15, %v2480_v14, %v466_v18  ;;  %v3112_v14 = vld [vmem:[#allocation7_spill] sm:$0xff] }
  0x93   :  { %852 = vmatmul.mubr.bf16.vlgmr.msra.gmra.mxu1 %v2863_v61  ;;  %2039 = vmatpush3.bf16.msra.mxu0 %v2854_v12 }
  0x94   :  { %1886 = vmatpush3.bf16.msra.mxu1 %v2267_v51  ;;  %1907 = vmatprep.subr.bf16.mxu0 %v2348_v23 }
  0x95   :  { %1887 = vmatprep.subr.bf16.mxu1 %v2319_v10  ;;  %1200 = vmatprep.mubr.bf16.mxu1 %v1155_v26 }
  0x96   :  { %2041 = vmatmul.mubr.msk.bf16.vlgmr.msra.gmra.mxu0 %vm543_vm15, %v2676_v57 }
  0x97   :  { %1908 = vmatpush3.bf16.msra.mxu0 %v2369_v36 }
  0x98   :  { %1888 = vmatpush3.bf16.msra.mxu1 %v2324_v11  ;;  %1909 = vmatprep.subr.bf16.mxu0 %v3112_v14 }
  0x99   :  { %1889 = vmatprep.subr.bf16.mxu1 %v3113_v21 }
  0x9a   :  { %v1070_v19 = vpop.permute.xlu1 %1069 }
  0x9b   :  { %1910 = vmatpush3.bf16.msra.mxu0 %v3114_v42  ;;  %v1151_v53 = vsel %vm543_vm15, %v3123_v25, %v1070_v19 }
  0x9c   :  { %1890 = vmatpush3.bf16.msra.mxu1 %v3115_v17  ;;  %1911 = vmatprep.subr.bf16.mxu0 %v3116_v41 }
  0x9d   :  { %1891 = vmatprep.subr.bf16.mxu1 %v3117_v37 }
  0x9f   :  { %1912 = vmatpush3.bf16.msra.mxu0 %v3118_v34  ;;  %v1124_v46 = vpop.permute.xlu0 %1123 }
  0xa0   :  { %1892 = vmatpush3.bf16.msra.mxu1 %v3119_v32  ;;  %1913 = vmatprep.subr.bf16.mxu0 %v2538_v6  ;;  %v2888_v58 = vsel %vm543_vm15, %v3121_v28, %v1124_v46 }
  0xa1   :  { %1893 = vmatprep.subr.bf16.mxu1 %v3120_v33  ;;  %1240 = vmatprep.mubr.bf16.mxu0 %v2888_v58  ;;  %v1122_v7 = vpop.permute.xlu1 %1121 }
  0xa2   :  { %v1159_v55 = vsel %vm543_vm15, %v3125_v39, %v1122_v7 }
  0xa3   :  { %1914 = vmatpush3.bf16.msra.mxu0 %v2552_v45  ;;  %v1326_v44 = vpop.permute.xlu0 %1325 }
  0xa4   :  { %1894 = vmatpush3.bf16.msra.mxu1 %v2532_v13  ;;  %1915 = vmatprep.subr.bf16.mxu0 %v2592_v49  ;;  %v1407_v60 = vsel %vm543_vm15, %v3125_v39, %v1326_v44 }
  0xa5   :  { %1895 = vmatprep.subr.bf16.mxu1 %v2565_v30  ;;  %v1378_v18 = vpop.permute.xlu1 %1377 }
  0xa7   :  { %1916 = vmatpush3.bf16.msra.mxu0 %v2613_v50 }
  0xa8   :  { %1896 = vmatpush3.bf16.msra.mxu1 %v2570_v35  ;;  %1917 = vmatprep.subr.bf16.mxu0 %v2648_v62 }
  0xa9   :  { %1897 = vmatprep.subr.bf16.mxu1 %v2626_v40 }
  0xab   :  { %1918 = vmatpush3.bf16.msra.mxu0 %v2659_v0 }
  0xac   :  { %1898 = vmatpush3.bf16.msra.mxu1 %v2638_v27  ;;  %1919 = vmatprep.subr.bf16.mxu0 %v2685_v4 }
  0xad   :  { %1899 = vmatprep.subr.bf16.mxu1 %v2667_v47 }
  0xaf   :  { %1920 = vmatpush3.bf16.msra.mxu0 %v2693_v24 }
  0xb0   :  { %1900 = vmatpush3.bf16.msra.mxu1 %v3122_v20  ;;  %1921 = vmatprep.subr.bf16.mxu0 %v3124_v3 }
  0xb1   :  { %2044 = vmatprep.subr.bf16.mxu1 %v3111_v63 }
  0xb3   :  { %1201 = vmatmul.mubr.bf16.vlgmr.msra.gmra.mxu1 %v1151_v53  ;;  %1922 = vmatpush3.bf16.msra.mxu0 %v2731_v5 }
  0xb4   :  { %2045 = vmatpush3.bf16.msra.mxu1 %v2815_v2  ;;  %1934 = vmatprep.subr.bf16.mxu0 %v2195_v16  ;;  %v1350_v16 = vrot.slane %v1343_v43, %v2207_v22  ;;  %v1574_v43 = vpop.permute.xlu0 %1573 }
  0xb5   :  { %2046 = vmatprep.subr.bf16.mxu1 %v3111_v63  ;;  %2052 = vmatprep.mubr.msk.bf16.mxu1 %vm2124_vm0, %v3111_v63  ;;  %v1607_v28 = vsel %vm543_vm15, %v2705_v48, %v1574_v43 }
  0xb6   :  { %1241 = vmatmul.mubr.bf16.vlgmr.msra.gmra.mxu0 %v1159_v55  ;;  %v1411_v26 = vsel %vm543_vm15, %v1350_v16, %v1378_v18 }
  0xb7   :  { %1935 = vmatpush3.bf16.msra.mxu0 %v2267_v51  ;;  %1448 = vmatprep.mubr.bf16.mxu0 %v1407_v60 }
  0xb8   :  { %2047 = vmatpush3.bf16.msra.mxu1 %v2827_v31  ;;  %1936 = vmatprep.subr.bf16.mxu0 %v2319_v10 }
  0xb9   :  { %2048 = vmatprep.subr.bf16.mxu1 %v3111_v63 }
  0xbb   :  { %1937 = vmatpush3.bf16.msra.mxu0 %v2324_v11 }
  0xbc   :  { %2049 = vmatpush3.bf16.msra.mxu1 %v2836_v15  ;;  %1938 = vmatprep.subr.bf16.mxu0 %v3113_v21 }
  0xbd   :  { %2050 = vmatprep.subr.bf16.mxu1 %v3111_v63 }
  0xbf   :  { %1939 = vmatpush3.bf16.msra.mxu0 %v3115_v17 }
  0xc0   :  { %2051 = vmatpush3.bf16.msra.mxu1 %v2854_v12  ;;  %1940 = vmatprep.subr.bf16.mxu0 %v3117_v37 }
  0xc1   :  { %1956 = vmatprep.subr.bf16.mxu1 %v2348_v23 }
  0xc3   :  { %2053 = vmatmul.mubr.msk.bf16.vlgmr.msra.gmra.mxu1 %vm543_vm15, %v2789_v9  ;;  %1941 = vmatpush3.bf16.msra.mxu0 %v3119_v32  ;;  %v3126_v9 = vld [vmem:[#allocation2_spill] sm:$0xff] }
  0xc4   :  { %1957 = vmatpush3.bf16.msra.mxu1 %v2369_v36  ;;  %1942 = vmatprep.subr.bf16.mxu0 %v3120_v33  ;;  %v1404_v52 = vsel %vm543_vm15, %v3126_v9, %v2856_v38  ;;  %v3127_v38 = vld [vmem:[#allocation16_spill] sm:$0xff] }
  0xc5   :  { %1958 = vmatprep.subr.bf16.mxu1 %v3112_v14  ;;  %1488 = vmatprep.mubr.bf16.mxu1 %v1411_v26  ;;  %v1600_v46 = vsel %vm543_vm15, %v3127_v38, %v2818_v8 }
  0xc7   :  { %1943 = vmatpush3.bf16.msra.mxu0 %v2532_v13 }
  0xc8   :  { %1959 = vmatpush3.bf16.msra.mxu1 %v3114_v42  ;;  %1944 = vmatprep.subr.bf16.mxu0 %v2565_v30 }
  0xc9   :  { %1960 = vmatprep.subr.bf16.mxu1 %v3116_v41 }
  0xcb   :  { %1945 = vmatpush3.bf16.msra.mxu0 %v2570_v35 }
  0xcc   :  { %1961 = vmatpush3.bf16.msra.mxu1 %v3118_v34  ;;  %1946 = vmatprep.subr.bf16.mxu0 %v2626_v40 }
  0xcd   :  { %1962 = vmatprep.subr.bf16.mxu1 %v2538_v6 }
  0xcf   :  { %1947 = vmatpush3.bf16.msra.mxu0 %v2638_v27 }
  0xd0   :  { %1963 = vmatpush3.bf16.msra.mxu1 %v2552_v45  ;;  %1948 = vmatprep.subr.bf16.mxu0 %v2667_v47 }
  0xd1   :  { %1964 = vmatprep.subr.bf16.mxu1 %v2592_v49 }
  0xd3   :  { %1949 = vmatpush3.bf16.msra.mxu0 %v3122_v20 }
  0xd4   :  { %1965 = vmatpush3.bf16.msra.mxu1 %v2613_v50  ;;  %2056 = vmatprep.subr.bf16.mxu0 %v3111_v63 }
  0xd5   :  { %1966 = vmatprep.subr.bf16.mxu1 %v2648_v62 }
  0xd6   :  { %1449 = vmatmul.mubr.bf16.vlgmr.msra.gmra.mxu0 %v1404_v52 }
  0xd7   :  { %2057 = vmatpush3.bf16.msra.mxu0 %v2815_v2  ;;  %2064 = vmatprep.mubr.msk.bf16.mxu0 %vm2124_vm0, %v3111_v63 }
  0xd8   :  { %1967 = vmatpush3.bf16.msra.mxu1 %v2659_v0  ;;  %2058 = vmatprep.subr.bf16.mxu0 %v3111_v63 }
  0xd9   :  { %1968 = vmatprep.subr.bf16.mxu1 %v2685_v4 }
  0xdb   :  { %2059 = vmatpush3.bf16.msra.mxu0 %v2827_v31 }
  0xdc   :  { %1969 = vmatpush3.bf16.msra.mxu1 %v2693_v24  ;;  %2060 = vmatprep.subr.bf16.mxu0 %v3111_v63 }
  0xdd   :  { %1970 = vmatprep.subr.bf16.mxu1 %v3124_v3 }
  0xdf   :  { %2061 = vmatpush3.bf16.msra.mxu0 %v2836_v15 }
  0xe0   :  { %1971 = vmatpush3.bf16.msra.mxu1 %v2731_v5  ;;  %2062 = vmatprep.subr.bf16.mxu0 %v3111_v63 }
  0xe1   :  { %1983 = vmatprep.subr.bf16.mxu1 %v2120_v54 }
  0xe3   :  { %1489 = vmatmul.mubr.bf16.vlgmr.msra.gmra.mxu1 %v2888_v58  ;;  %2063 = vmatpush3.bf16.msra.mxu0 %v2854_v12 }
  0xe4   :  { %1984 = vmatpush3.bf16.msra.mxu1 %v2267_v51  ;;  %1644 = vmatprep.mubr.bf16.mxu1 %v1600_v46 }
  0xe5   :  { %1985 = vmatprep.subr.bf16.mxu1 %v2319_v10  ;;  %2005 = vmatprep.subr.bf16.mxu0 %v2348_v23  ;;  %v1598_v10 = vrot.slane %v1591_v59, %v2207_v22 }
  0xe6   :  { %2065 = vmatmul.mubr.msk.bf16.vlgmr.msra.gmra.mxu0 %vm543_vm15, %v2786_v56 }
  0xe7   :  { %2006 = vmatpush3.bf16.msra.mxu0 %v2369_v36  ;;  %1684 = vmatprep.mubr.bf16.mxu0 %v1607_v28 }
  0xe8   :  { %1986 = vmatpush3.bf16.msra.mxu1 %v2324_v11  ;;  %2007 = vmatprep.subr.bf16.mxu0 %v3112_v14 }
  0xe9   :  { %1987 = vmatprep.subr.bf16.mxu1 %v3113_v21 }
  0xeb   :  { %2008 = vmatpush3.bf16.msra.mxu0 %v3114_v42 }
  0xec   :  { %1988 = vmatpush3.bf16.msra.mxu1 %v3115_v17  ;;  %2009 = vmatprep.subr.bf16.mxu0 %v3116_v41 }
  0xed   :  { %1989 = vmatprep.subr.bf16.mxu1 %v3117_v37 }
  0xef   :  { %2010 = vmatpush3.bf16.msra.mxu0 %v3118_v34 }
  0xf0   :  { %1990 = vmatpush3.bf16.msra.mxu1 %v3119_v32  ;;  %2011 = vmatprep.subr.bf16.mxu0 %v2538_v6 }
  0xf1   :  { %1991 = vmatprep.subr.bf16.mxu1 %v3120_v33 }
  0xf3   :  { %2012 = vmatpush3.bf16.msra.mxu0 %v2552_v45 }
  0xf4   :  { %1992 = vmatpush3.bf16.msra.mxu1 %v2532_v13  ;;  %2013 = vmatprep.subr.bf16.mxu0 %v2592_v49  ;;  %v1572_v13 = vpop.permute.xlu1 %1571 }
  0xf5   :  { %1993 = vmatprep.subr.bf16.mxu1 %v2565_v30  ;;  %v1603_v51 = vsel %vm543_vm15, %v2676_v57, %v1572_v13 }
  0xf7   :  { %2014 = vmatpush3.bf16.msra.mxu0 %v2613_v50 }
  0xf8   :  { %1994 = vmatpush3.bf16.msra.mxu1 %v2570_v35  ;;  %2015 = vmatprep.subr.bf16.mxu0 %v2648_v62 }
  0xf9   :  { %1995 = vmatprep.subr.bf16.mxu1 %v2626_v40 }
  0xfb   :  { %2016 = vmatpush3.bf16.msra.mxu0 %v2659_v0 }
  0xfc   :  { %1996 = vmatpush3.bf16.msra.mxu1 %v2638_v27  ;;  %2017 = vmatprep.subr.bf16.mxu0 %v2685_v4 }
  0xfd   :  { %1997 = vmatprep.subr.bf16.mxu1 %v2667_v47 }
  0xff   :  { %2018 = vmatpush3.bf16.msra.mxu0 %v2693_v24 }
 0x100   :  { %1998 = vmatpush3.bf16.msra.mxu1 %v3122_v20  ;;  %2019 = vmatprep.subr.bf16.mxu0 %v3124_v3 }
 0x101   :  { %2068 = vmatprep.subr.bf16.mxu1 %v3111_v63 }
 0x103   :  { %1645 = vmatmul.mubr.bf16.vlgmr.msra.gmra.mxu1 %v2863_v61  ;;  %2020 = vmatpush3.bf16.msra.mxu0 %v2731_v5 }
 0x104   :  { %2069 = vmatpush3.bf16.msra.mxu1 %v2815_v2  ;;  %2076 = vmatprep.mubr.msk.bf16.mxu1 %vm2124_vm0, %v3111_v63 }
 0x105   :  { %2070 = vmatprep.subr.bf16.mxu1 %v3111_v63 }
 0x106   :  { %1685 = vmatmul.mubr.bf16.vlgmr.msra.gmra.mxu0 %v1603_v51 }
 0x108   :  { %2071 = vmatpush3.bf16.msra.mxu1 %v2827_v31 }
 0x109   :  { %2072 = vmatprep.subr.bf16.mxu1 %v3111_v63 }
 0x10c   :  { %2073 = vmatpush3.bf16.msra.mxu1 %v2836_v15 }
 0x10d   :  { %2074 = vmatprep.subr.bf16.mxu1 %v3111_v63 }
 0x110   :  { %2075 = vmatpush3.bf16.msra.mxu1 %v2854_v12 }
 0x113   :  { %2077 = vmatmul.mubr.msk.bf16.vlgmr.msra.gmra.mxu1 %vm543_vm15, %v1598_v10  ;;  %v1835_v10 = vld [vmem:[%s3049_s2] ss:$0 sm:$0xff] }
 0x146   :  { %v1852_v11 = vpop.f32.mrf.mxu0 }
 0x148   :  { %v1853_v23 = vpop.f32.mrf.mxu0 }
 0x149   :  { %v1854_v36 = vadd.f32 %v1853_v23, %v1852_v11 }
 0x14a   :  { %v1855_v30 = vpop.f32.mrf.mxu0 }
 0x14c   :  { %v1856_v6 = vpop.f32.mrf.mxu0 }
 0x153   :  { %v1874_v45 = vpop.f32.mrf.mxu1 }
 0x155   :  { %v1875_v35 = vpop.f32.mrf.mxu1 }
 0x156   :  { %v1876_v49 = vadd.f32 %v1875_v35, %v1874_v45  ;;  %v893_v50 = vpop.f32.mrf.mxu0 }
 0x157   :  { %v1877_v40 = vpop.f32.mrf.mxu1 }
 0x158   :  { %v854_v27 = vadd.f32 %v1876_v49, %v1854_v36  ;;  %v2042_v62 = vpop.f32.mrf.mxu0 }
 0x159   :  { %v1878_v0 = vpop.f32.mrf.mxu1 }
 0x15a   :  { %v894_v47 = vadd.f32 %v893_v50, %v854_v27  ;;  %v896_v57 = vpop.f32.mrf.mxu0 }
 0x15c   :  { %v2043_v22 = vpop.f32.mrf.mxu0 }
 0x173   :  { %v1901_v4 = vpop.f32.mrf.mxu1 }
 0x175   :  { %v1902_v24 = vpop.f32.mrf.mxu1 }
 0x176   :  { %v1903_v48 = vadd.f32 %v1902_v24, %v1901_v4  ;;  %v1923_v5 = vpop.f32.mrf.mxu0 }
 0x177   :  { %v1904_v56 = vpop.f32.mrf.mxu1 }
 0x178   :  { %v1924_v2 = vpop.f32.mrf.mxu0 }
 0x179   :  { %v1905_v8 = vpop.f32.mrf.mxu1  ;;  %v1925_v31 = vadd.f32 %v1924_v2, %v1923_v5 }
 0x17a   :  { %v1926_v63 = vpop.f32.mrf.mxu0 }
 0x17b   :  { %v1243_v15 = vadd.f32 %v1925_v31, %v1903_v48 }
 0x17c   :  { %v1927_v1 = vpop.f32.mrf.mxu0 }
 0x183   :  { %v1282_v29 = vpop.f32.mrf.mxu1 }
 0x184   :  { %v1283_v12 = vadd.f32 %v1282_v29, %v1243_v15 }
 0x185   :  { %v2054_v59 = vpop.f32.mrf.mxu1 }
 0x186   :  { %v1288_v61 = vmax.f32 %v894_v47, %v1283_v12 }
 0x187   :  { %v1285_v14 = vpop.f32.mrf.mxu1 }
 0x189   :  { %v2055_v21 = vpop.f32.mrf.mxu1 }
 0x196   :  { %v1950_v42 = vpop.f32.mrf.mxu0 }
 0x198   :  { %v1951_v17 = vpop.f32.mrf.mxu0 }
 0x199   :  { %v1952_v26 = vadd.f32 %v1951_v17, %v1950_v42 }
 0x19a   :  { %v1953_v41 = vpop.f32.mrf.mxu0 }
 0x19c   :  { %v1954_v37 = vpop.f32.mrf.mxu0 }
 0x1a3   :  { %v1972_v34 = vpop.f32.mrf.mxu1 }
 0x1a5   :  { %v1973_v32 = vpop.f32.mrf.mxu1 }
 0x1a6   :  { %v1530_v33 = vpop.f32.mrf.mxu0  ;;  %v1974_v16 = vadd.f32 %v1973_v32, %v1972_v34 }
 0x1a7   :  { %v1975_v58 = vpop.f32.mrf.mxu1 }
 0x1a8   :  { %v2066_v19 = vpop.f32.mrf.mxu0  ;;  %v1491_v54 = vadd.f32 %v1974_v16, %v1952_v26 }
 0x1a9   :  { %v1976_v20 = vpop.f32.mrf.mxu1 }
 0x1aa   :  { %v1533_v25 = vpop.f32.mrf.mxu0  ;;  %v1531_v38 = vadd.f32 %v1530_v33, %v1491_v54 }
 0x1ac   :  { %v2067_v53 = vpop.f32.mrf.mxu0  ;;  %v1536_v13 = vmax.f32 %v1288_v61, %v1531_v38 }
 0x1c3   :  { %v1999_v3 = vpop.f32.mrf.mxu1 }
 0x1c5   :  { %v2000_v7 = vpop.f32.mrf.mxu1 }
 0x1c6   :  { %v2021_v44 = vpop.f32.mrf.mxu0  ;;  %v2001_v43 = vadd.f32 %v2000_v7, %v1999_v3 }
 0x1c7   :  { %v2002_v39 = vpop.f32.mrf.mxu1 }
 0x1c8   :  { %v2022_v55 = vpop.f32.mrf.mxu0 }
 0x1c9   :  { %v2003_v60 = vpop.f32.mrf.mxu1  ;;  %v2023_v9 = vadd.f32 %v2022_v55, %v2021_v44 }
 0x1ca   :  { %v2024_v18 = vpop.f32.mrf.mxu0 }
 0x1cb   :  { %v1687_v46 = vadd.f32 %v2023_v9, %v2001_v43 }
 0x1cc   :  { %v2025_v52 = vpop.f32.mrf.mxu0 }
 0x1d3   :  { %v1726_v28 = vpop.f32.mrf.mxu1 }
 0x1d4   :  { %v1727_v51 = vadd.f32 %v1726_v28, %v1687_v46 }
 0x1d5   :  { %v2078_v11 = vpop.f32.mrf.mxu1 }
 0x1d6   :  { %v1732_v23 = vmax.f32 %v1536_v13, %v1727_v51 }
 0x1d7   :  { %v1729_v36 = vpop.f32.mrf.mxu1 }
 0x1d8   :  { %v1740_v30 = vadd.f32 %v1835_v10, %v1732_v23 }
 0x1d9   :  { %v2079_v6 = vpop.f32.mrf.mxu1 }
 0x1da   :  { %v1741_v45 = vmax.f32 %v1740_v30, 0.0 }
 0x1dc   :  { %v1742_v35 = vpack.c.bf16 %v1741_v45, %v1741_v45  ;;  %v1744_v49 = vrot.slane %v1741_v45, 4  ;;  %v1751_v50 = vmul.f32 %v1741_v45, %v1741_v45 }
 0x1de   :  { %1743 = vst [vmem:[%s3050_s3] sm:$0xf] %v1742_v35  ;;  %v1745_v40 = vadd.f32 %v1744_v49, %v1741_v45  ;;  %v1752_v27 = vrot.slane %v1751_v50, 4 }
 0x1e0   :  { %v1746_v62 = vrot.slane %v1745_v40, 2  ;;  %v1753_v0 = vadd.f32 %v1752_v27, %v1751_v50 }
 0x1e2   :  { %v1747_v47 = vadd.f32 %v1746_v62, %v1745_v40  ;;  %v1754_v57 = vrot.slane %v1753_v0, 2 }
 0x1e4   :  { %v1748_v22 = vrot.slane %v1747_v47, 1  ;;  %v1755_v4 = vadd.f32 %v1754_v57, %v1753_v0 }
 0x1e6   :  { %v1749_v24 = vadd.f32 %v1748_v22, %v1747_v47  ;;  %v1756_v48 = vrot.slane %v1755_v4, 1 }
 0x1e8   :  { %1750 = vst [vmem:[%s3051_s4] sm:$0x1] %v1749_v24  ;;  %v1757_v5 = vadd.f32 %v1756_v48, %v1755_v4 }
 0x1ea   :  { %1758 = vst [vmem:[%s3052_s5] sm:$0x1] %v1757_v5 }

</bundles_post_ra>
